<compile_context>
chip_gen: v6e
topology: v6e:2x2x1
jax: 0.10.0
libtpu: 0.0.40
codegen_flags: <defaults>
</compile_context>

<pallas_src>
import functools

import jax
import jax.numpy as jnp
from jax import lax
from jax.experimental import pallas as pl
from jax.experimental.pallas import tpu as pltpu

BN_EPS = 1e-5
LANE = 128

# MXU operand dtype.  Set to jnp.bfloat16 on v6e/v7x for full MXU rate; kept
# f32 here so the tiny demo validates tightly against the f32 reference.
MXU_DTYPE = jnp.float32
# Storage dtype of inter-pass activations (y1/y2/y3/yp).  bf16 halves HBM
# traffic between passes on v6e/v7x; f32 here for validation.
STORE_DTYPE = jnp.float32

VMEM_LIMIT = 32 * 1024 * 1024  # explicit scoped-VMEM limit, safe on v5e/v6e/v7x


# ------------------------------- small helpers ------------------------------ #

def _rup(n, m=LANE):
    return ((n + m - 1) // m) * m


def _pad_last(a, target):
    pad = target - a.shape[-1]
    if pad == 0:
        return a
    return jnp.pad(a, [(0, 0)] * (a.ndim - 1) + [(0, pad)])


def _pad2(w, rows, cols):
    r, c = w.shape
    return jnp.pad(w, ((0, rows - r), (0, cols - c)))


def _pick_tile(m, cap):
    """Largest tile <= cap that divides m exactly (exact stats, no ragged rows)."""
    for t in (1024, 512, 256, 128, 64, 32, 16, 8):
        if t <= cap and m % t == 0:
            return t
    return m


def _cparams(ngrid):
    return pltpu.CompilerParams(
        dimension_semantics=("parallel",) * ngrid,
        vmem_limit_bytes=VMEM_LIMIT)


def _bn_scale_shift(partials, gamma_p, beta_p, count):
    """Fold per-tile (sum, sumsq) partials into per-channel scale/shift (tiny)."""
    s = jnp.sum(partials, axis=0)                    # (2, C)
    mean = s[0] / count
    var = jnp.maximum(s[1] / count - mean * mean, 0.0)
    scale = gamma_p * lax.rsqrt(var + BN_EPS)
    shift = beta_p - mean * scale
    return (scale.reshape(1, -1).astype(jnp.float32),
            shift.reshape(1, -1).astype(jnp.float32))


# ------------------------------- Pallas kernels ----------------------------- #

def _matmul_stats_kernel(x_ref, w_ref, b_ref, y_ref, ps_ref):
    """y = x @ w + b (MXU, f32 accumulate); per-tile per-channel sum/sumsq."""
    y = jnp.dot(x_ref[...].astype(MXU_DTYPE), w_ref[...].astype(MXU_DTYPE),
                preferred_element_type=jnp.float32) + b_ref[...]
    y_ref[...] = y.astype(y_ref.dtype)
    ps_ref[0, 0:1, :] = jnp.sum(y, axis=0, keepdims=True)
    ps_ref[0, 1:2, :] = jnp.sum(y * y, axis=0, keepdims=True)


def _bn_act_kernel(y_ref, scale_ref, shift_ref, o_ref, *, relu):
    y = y_ref[...].astype(jnp.float32) * scale_ref[...] + shift_ref[...]
    if relu:
        y = jnp.maximum(y, 0.0)
    o_ref[...] = y.astype(o_ref.dtype)


def _bn_relu_conv3x3_stats_kernel(y1_ref, s1_ref, t1_ref, w_ref, b_ref,
                                  y2_ref, ps_ref, fpad_ref, *, h, w):
    """Fused: f1 = relu(bn1(y1)) -> zero-pad (VMEM only) -> 3x3 stride-1 conv
    (9 accumulated MXU matmuls per output row, no im2col) + per-image stats."""
    c = fpad_ref.shape[-1]

    # BN1-apply + ReLU directly into a zero-padded VMEM image.  The padded
    # halo must be zero every grid step (scratch persists across steps).
    fpad_ref[...] = jnp.zeros(fpad_ref.shape, fpad_ref.dtype)
    f1 = jnp.maximum(
        y1_ref[0].astype(jnp.float32) * s1_ref[...] + t1_ref[...], 0.0)
    fpad_ref[pl.ds(1, h), pl.ds(1, w), :] = f1

    bias = b_ref[...]                                  # (1, C)
    ps_ref[...] = jnp.zeros(ps_ref.shape, jnp.float32)

    @pl.loop(0, h)
    def _(r):
        acc = jnp.zeros((w, c), jnp.float32)
        for ky in range(3):
            for kx in range(3):
                a = fpad_ref[r + ky, pl.ds(kx, w), :]          # (W, C)
                acc += jnp.dot(a.astype(MXU_DTYPE),
                               w_ref[ky * 3 + kx].astype(MXU_DTYPE),
                               preferred_element_type=jnp.float32)
        acc = acc + bias
        y2_ref[0, r] = acc.astype(y2_ref.dtype)
        ps_ref[0, 0:1, :] += jnp.sum(acc, axis=0, keepdims=True)
        ps_ref[0, 1:2, :] += jnp.sum(acc * acc, axis=0, keepdims=True)


def _bn_matmul_stats_kernel(y2_ref, s2_ref, t2_ref, w3_ref, b3_ref,
                            y3_ref, ps3_ref):
    """f2 = relu(bn2(y2)) fused with the conv3 1x1 matmul + its stats."""
    f2 = jnp.maximum(y2_ref[...].astype(jnp.float32) * s2_ref[...] + t2_ref[...], 0.0)
    y3 = jnp.dot(f2.astype(MXU_DTYPE), w3_ref[...].astype(MXU_DTYPE),
                 preferred_element_type=jnp.float32) + b3_ref[...]
    y3_ref[...] = y3.astype(y3_ref.dtype)
    ps3_ref[0, 0:1, :] = jnp.sum(y3, axis=0, keepdims=True)
    ps3_ref[0, 1:2, :] = jnp.sum(y3 * y3, axis=0, keepdims=True)


def _bn_matmul_stats_proj_kernel(y2_ref, s2_ref, t2_ref, w3_ref, b3_ref,
                                 xr_ref, wp_ref, bp_ref,
                                 y3_ref, ps3_ref, yp_ref, psp_ref):
    """Same as above plus the projection 1x1 matmul fused into the same pass."""
    _bn_matmul_stats_kernel(y2_ref, s2_ref, t2_ref, w3_ref, b3_ref, y3_ref, ps3_ref)
    yp = jnp.dot(xr_ref[...].astype(MXU_DTYPE), wp_ref[...].astype(MXU_DTYPE),
                 preferred_element_type=jnp.float32) + bp_ref[...]
    yp_ref[...] = yp.astype(yp_ref.dtype)
    psp_ref[0, 0:1, :] = jnp.sum(yp, axis=0, keepdims=True)
    psp_ref[0, 1:2, :] = jnp.sum(yp * yp, axis=0, keepdims=True)


def _bn_add_relu_kernel(y3_ref, s3_ref, t3_ref, r_ref, o_ref):
    """out = relu(bn3(y3) + residual)  (identity residual)."""
    a = y3_ref[...].astype(jnp.float32) * s3_ref[...] + t3_ref[...]
    o_ref[...] = jnp.maximum(a + r_ref[...].astype(jnp.float32), 0.0).astype(o_ref.dtype)


def _bn_add_bn_relu_kernel(y3_ref, s3_ref, t3_ref, yp_ref, sp_ref, tp_ref, o_ref):
    """out = relu(bn3(y3) + bnp(yp))  (projection residual, BN fused here)."""
    a = y3_ref[...].astype(jnp.float32) * s3_ref[...] + t3_ref[...]
    r = yp_ref[...].astype(jnp.float32) * sp_ref[...] + tp_ref[...]
    o_ref[...] = jnp.maximum(a + r, 0.0).astype(o_ref.dtype)


# ---------------------------- pallas_call wrappers --------------------------- #

def _matmul_stats(x, w, b, *, tm, out_dtype):
    m, k = x.shape
    c = w.shape[1]
    g = m // tm
    row = lambda i: (i, 0)
    const = lambda i: (0, 0)
    return pl.pallas_call(
        _matmul_stats_kernel,
        out_shape=(jax.ShapeDtypeStruct((m, c), out_dtype),
                   jax.ShapeDtypeStruct((g, 2, c), jnp.float32)),
        grid=(g,),
        in_specs=[pl.BlockSpec((tm, k), row),
                  pl.BlockSpec((k, c), const),      # weights: VMEM-resident
                  pl.BlockSpec((1, c), const)],
        out_specs=(pl.BlockSpec((tm, c), row),
                   pl.BlockSpec((1, 2, c), lambda i: (i, 0, 0))),
        compiler_params=_cparams(1),
        cost_estimate=pl.CostEstimate(
            flops=2 * m * k * c, transcendentals=0,
            bytes_accessed=4 * (m * k + k * c + m * c + g * 2 * c)),
    )(x, w, b)


def _bn_act(y, scale, shift, *, tm, relu, out_dtype):
    m, c = y.shape
    g = m // tm
    row = lambda i: (i, 0)
    const = lambda i: (0, 0)
    return pl.pallas_call(
        functools.partial(_bn_act_kernel, relu=relu),
        out_shape=jax.ShapeDtypeStruct((m, c), out_dtype),
        grid=(g,),
        in_specs=[pl.BlockSpec((tm, c), row),
                  pl.BlockSpec((1, c), const),
                  pl.BlockSpec((1, c), const)],
        out_specs=pl.BlockSpec((tm, c), row),
        compiler_params=_cparams(1),
        cost_estimate=pl.CostEstimate(flops=2 * m * c, transcendentals=0,
                                      bytes_accessed=4 * 2 * m * c),
    )(y, scale, shift)


def _bn_relu_conv3x3_stats(y1_img, s1, t1, w_taps, b, *, out_dtype):
    """Fused BN1-apply+ReLU+pad+3x3(stride 1) conv+stats; one image per step."""
    n, h, w, c = y1_img.shape
    img = lambda i: (i, 0, 0, 0)
    const2 = lambda i: (0, 0)
    return pl.pallas_call(
        functools.partial(_bn_relu_conv3x3_stats_kernel, h=h, w=w),
        out_shape=(jax.ShapeDtypeStruct((n, h, w, c), out_dtype),
                   jax.ShapeDtypeStruct((n, 2, c), jnp.float32)),
        grid=(n,),
        in_specs=[pl.BlockSpec((1, h, w, c), img),
                  pl.BlockSpec((1, c), const2),
                  pl.BlockSpec((1, c), const2),
                  pl.BlockSpec((9, c, c), lambda i: (0, 0, 0)),
                  pl.BlockSpec((1, c), const2)],
        out_specs=(pl.BlockSpec((1, h, w, c), img),
                   pl.BlockSpec((1, 2, c), lambda i: (i, 0, 0))),
        scratch_shapes=[pltpu.VMEM((h + 2, w + 2, c), jnp.float32)],
        compiler_params=_cparams(1),
        cost_estimate=pl.CostEstimate(
            flops=2 * n * h * w * 9 * c * c + 4 * n * h * w * c,
            transcendentals=0,
            bytes_accessed=4 * (2 * n * h * w * c + 9 * c * c + n * 2 * c)),
    )(y1_img, s1, t1, w_taps, b)


def _bn_matmul_stats(y2, s2, t2, w3, b3, *, tm, out_dtype, xr=None, wp=None, bp=None):
    m, k = y2.shape
    c = w3.shape[1]
    g = m // tm
    row = lambda i: (i, 0)
    const = lambda i: (0, 0)
    psmap = lambda i: (i, 0, 0)
    in_specs = [pl.BlockSpec((tm, k), row),
                pl.BlockSpec((1, k), const),
                pl.BlockSpec((1, k), const),
                pl.BlockSpec((k, c), const),
                pl.BlockSpec((1, c), const)]
    out_shape = [jax.ShapeDtypeStruct((m, c), out_dtype),
                 jax.ShapeDtypeStruct((g, 2, c), jnp.float32)]
    out_specs = [pl.BlockSpec((tm, c), row), pl.BlockSpec((1, 2, c), psmap)]
    flops = 2 * m * k * c
    nbytes = 4 * (m * k + k * c + m * c)
    if xr is None:
        kernel = _bn_matmul_stats_kernel
        args = (y2, s2, t2, w3, b3)
    else:
        kr = xr.shape[1]
        kernel = _bn_matmul_stats_proj_kernel
        args = (y2, s2, t2, w3, b3, xr, wp, bp)
        in_specs += [pl.BlockSpec((tm, kr), row),
                     pl.BlockSpec((kr, c), const),
                     pl.BlockSpec((1, c), const)]
        out_shape += [jax.ShapeDtypeStruct((m, c), out_dtype),
                      jax.ShapeDtypeStruct((g, 2, c), jnp.float32)]
        out_specs += [pl.BlockSpec((tm, c), row), pl.BlockSpec((1, 2, c), psmap)]
        flops += 2 * m * kr * c
        nbytes += 4 * (m * kr + kr * c + m * c)
    return pl.pallas_call(
        kernel,
        out_shape=tuple(out_shape),
        grid=(g,),
        in_specs=in_specs,
        out_specs=tuple(out_specs),
        compiler_params=_cparams(1),
        cost_estimate=pl.CostEstimate(flops=flops, transcendentals=0,
                                      bytes_accessed=nbytes),
    )(*args)


def _bn_add_relu(y3, s3, t3, residual, *, tm, sp=None, tp=None):
    m, c = y3.shape
    g = m // tm
    row = lambda i: (i, 0)
    const = lambda i: (0, 0)
    if sp is None:
        kernel = _bn_add_relu_kernel
        args = (y3, s3, t3, residual)
        in_specs = [pl.BlockSpec((tm, c), row), pl.BlockSpec((1, c), const),
                    pl.BlockSpec((1, c), const), pl.BlockSpec((tm, c), row)]
    else:
        kernel = _bn_add_bn_relu_kernel
        args = (y3, s3, t3, residual, sp, tp)
        in_specs = [pl.BlockSpec((tm, c), row), pl.BlockSpec((1, c), const),
                    pl.BlockSpec((1, c), const), pl.BlockSpec((tm, c), row),
                    pl.BlockSpec((1, c), const), pl.BlockSpec((1, c), const)]
    return pl.pallas_call(
        kernel,
        out_shape=jax.ShapeDtypeStruct((m, c), jnp.float32),
        grid=(g,),
        in_specs=in_specs,
        out_specs=pl.BlockSpec((tm, c), row),
        compiler_params=_cparams(1),
        cost_estimate=pl.CostEstimate(flops=6 * m * c, transcendentals=0,
                                      bytes_accessed=4 * 3 * m * c),
    )(*args)


# ------------------------------ JAX-side glue -------------------------------- #

def _im2col_3x3(x_nhwc, stride, pad=1):
    """Tap-major im2col fallback for the strided 3x3 path (not used when stride==1)."""
    n, h, w, c = x_nhwc.shape
    xp = jnp.pad(x_nhwc, ((0, 0), (pad, pad), (pad, pad), (0, 0)))
    ho = (h + 2 * pad - 3) // stride + 1
    wo = (w + 2 * pad - 3) // stride + 1
    taps = [xp[:, ky:ky + (ho - 1) * stride + 1:stride,
               kx:kx + (wo - 1) * stride + 1:stride, :]
            for ky in range(3) for kx in range(3)]
    patches = jnp.stack(taps, axis=3)              # (N, Ho, Wo, 9, C) tap-major
    return patches.reshape(n * ho * wo, 9 * c), ho, wo


def residual_block_forward(x_nchw, params, *, tm_cap=512):
    n, cin, h, w = x_nchw.shape
    stride = params["stride"]
    cr = params["c1_w"].shape[0]
    cout = params["c3_w"].shape[0]
    cin_p, cr_p, cout_p = _rup(cin), _rup(cr), _rup(cout)

    x_nhwc = jnp.transpose(x_nchw, (0, 2, 3, 1))
    m1 = n * h * w
    x2d = _pad_last(x_nhwc.reshape(m1, cin), cin_p)
    tm1 = _pick_tile(m1, tm_cap)

    # ---- c1: 1x1 conv + conv-bias (matmul+stats pass) ------------------------
    w1 = _pad2(params["c1_w"].reshape(cr, cin).T, cin_p, cr_p)
    b1 = _pad_last(params["c1_b"].reshape(1, cr), cr_p)
    y1, ps1 = _matmul_stats(x2d, w1, b1, tm=tm1, out_dtype=STORE_DTYPE)
    s1, t1 = _bn_scale_shift(ps1, _pad_last(params["c1_g"], cr_p),
                             _pad_last(params["c1_beta"], cr_p), m1)

    # ---- c2: BN1-apply + ReLU + 3x3 conv (pad=1) + stats, fully fused --------
    w2_taps = jnp.pad(
        jnp.transpose(params["c2_w"], (2, 3, 1, 0)).reshape(9, cr, cr),
        ((0, 0), (0, cr_p - cr), (0, cr_p - cr)))
    b2 = _pad_last(params["c2_b"].reshape(1, cr), cr_p)
    if stride == 1:
        y1_img = y1.reshape(n, h, w, cr_p)
        y2_img, ps2 = _bn_relu_conv3x3_stats(y1_img, s1, t1, w2_taps, b2,
                                             out_dtype=STORE_DTYPE)
        ho, wo = h, w
        y2 = y2_img.reshape(n * ho * wo, cr_p)
    else:
        # TODO(synk): stride>1 3x3 path still builds a JAX-side (tap-major) im2col;
        # fold the strided halo loads into the kernel to remove this HBM traffic.
        f1 = _bn_act(y1, s1, t1, tm=tm1, relu=True, out_dtype=STORE_DTYPE)
        patches, ho, wo = _im2col_3x3(f1.reshape(n, h, w, cr_p), stride)
        y2, ps2 = _matmul_stats(patches, w2_taps.reshape(9 * cr_p, cr_p), b2,
                                tm=_pick_tile(n * ho * wo, tm_cap),
                                out_dtype=STORE_DTYPE)
    m2 = n * ho * wo
    tm2 = _pick_tile(m2, tm_cap)
    s2, t2 = _bn_scale_shift(ps2, _pad_last(params["c2_g"], cr_p),
                             _pad_last(params["c2_beta"], cr_p), m2)

    # ---- c3 matmul (fused with bn2-apply) [+ fused projection matmul] --------
    w3 = _pad2(params["c3_w"].reshape(cout, cr).T, cr_p, cout_p)
    b3 = _pad_last(params["c3_b"].reshape(1, cout), cout_p)
    if params["projection"]:
        pstride = params["p_stride"]
        xr = _pad_last(x_nhwc[:, ::pstride, ::pstride, :].reshape(m2, cin), cin_p)
        wp = _pad2(params["p_w"].reshape(cout, cin).T, cin_p, cout_p)
        bp = _pad_last(params["p_b"].reshape(1, cout), cout_p)
        y3, ps3, yp, psp = _bn_matmul_stats(y2, s2, t2, w3, b3, tm=tm2,
                                            out_dtype=STORE_DTYPE,
                                            xr=xr, wp=wp, bp=bp)
        s3, t3 = _bn_scale_shift(ps3, _pad_last(params["c3_g"], cout_p),
                                 _pad_last(params["c3_beta"], cout_p), m2)
        sp, tp = _bn_scale_shift(psp, _pad_last(params["p_g"], cout_p),
                                 _pad_last(params["p_beta"], cout_p), m2)
        out2d = _bn_add_relu(y3, s3, t3, yp, tm=tm2, sp=sp, tp=tp)
    else:
        # identity residual: module guarantees stride == 1 and Cin == Cout here
        y3, ps3 = _bn_matmul_stats(y2, s2, t2, w3, b3, tm=tm2, out_dtype=STORE_DTYPE)
        s3, t3 = _bn_scale_shift(ps3, _pad_last(params["c3_g"], cout_p),
                                 _pad_last(params["c3_beta"], cout_p), m2)
        out2d = _bn_add_relu(y3, s3, t3, x2d, tm=tm2)

    out = out2d[:, :cout].reshape(n, ho, wo, cout)
    return jnp.transpose(out, (0, 3, 1, 2))


# --------------------------- Parameter construction -------------------------- #

def init_params(key, in_channels, out_channels, is_first_block):
    projection = in_channels != out_channels
    stride = 1
    res_channels = in_channels // 4
    keys = iter(jax.random.split(key, 16))

    def conv_w(cout, cin, k):
        return jax.random.normal(next(keys), (cout, cin, k, k), jnp.float32) * 0.1

    def conv_b(cout):
        return jax.random.normal(next(keys), (cout,), jnp.float32) * 0.1

    params = {"projection": projection}
    if projection:
        if is_first_block:
            p_stride, res_channels = 1, in_channels
        else:
            p_stride, stride, res_channels = 2, 2, in_channels // 2
        params.update(p_w=conv_w(out_channels, in_channels, 1), p_b=conv_b(out_channels),
                      p_g=jnp.ones((out_channels,), jnp.float32),
                      p_beta=jnp.zeros((out_channels,), jnp.float32),
                      p_stride=p_stride)
    params["stride"] = stride
    params.update(c1_w=conv_w(res_channels, in_channels, 1), c1_b=conv_b(res_channels),
                  c1_g=jnp.ones((res_channels,), jnp.float32),
                  c1_beta=jnp.zeros((res_channels,), jnp.float32))
    params.update(c2_w=conv_w(res_channels, res_channels, 3), c2_b=conv_b(res_channels),
                  c2_g=jnp.ones((res_channels,), jnp.float32),
                  c2_beta=jnp.zeros((res_channels,), jnp.float32))
    params.update(c3_w=conv_w(out_channels, res_channels, 1), c3_b=conv_b(out_channels),
                  c3_g=jnp.ones((out_channels,), jnp.float32),
                  c3_beta=jnp.zeros((out_channels,), jnp.float32))
    return params


# ------------------------------ pure-JAX reference ---------------------------- #

def _ref_conv_bn(x, w, b, g, beta, stride, pad, relu):
    y = lax.conv_general_dilated(x, w, (stride, stride), [(pad, pad), (pad, pad)],
                                 dimension_numbers=("NCHW", "OIHW", "NCHW"))
    y = y + b[None, :, None, None]
    mean = y.mean(axis=(0, 2, 3), keepdims=True)
    var = ((y - mean) ** 2).mean(axis=(0, 2, 3), keepdims=True)
    y = (y - mean) * g[None, :, None, None] * lax.rsqrt(var + BN_EPS) + beta[None, :, None, None]
    return jnp.maximum(y, 0.0) if relu else y


def residual_block_reference(x, params):
    f = _ref_conv_bn(x, params["c1_w"], params["c1_b"], params["c1_g"], params["c1_beta"], 1, 0, True)
    f = _ref_conv_bn(f, params["c2_w"], params["c2_b"], params["c2_g"], params["c2_beta"],
                     params["stride"], 1, True)
    f = _ref_conv_bn(f, params["c3_w"], params["c3_b"], params["c3_g"], params["c3_beta"], 1, 0, False)
    if params["projection"]:
        x = _ref_conv_bn(x, params["p_w"], params["p_b"], params["p_g"], params["p_beta"],
                         params["p_stride"], 0, False)
    return jnp.maximum(f + x, 0.0)


# ----------------------------------- main ------------------------------------ #

if __name__ == "__main__":
    # TODO(synk): BatchNorm running_mean/running_var updates (module training
    # state) are not materialized; only the forward output under training-mode
    # batch statistics is produced.
    key = jax.random.PRNGKey(0)
    k_x, k_p = jax.random.split(key)

    in_channels, out_channels = 4, 8          # projection branch, is_first_block=True
    x = jax.random.normal(k_x, (2, in_channels, 16, 16), jnp.float32)
    params = init_params(k_p, in_channels, out_channels, is_first_block=True)

    # tm_cap=256 so the 512-row demo M axis runs a 2-step grid and exercises the
    # cross-tile partial-statistics reduction (use 512-1024 at production shapes).
    fwd = jax.jit(lambda inp: residual_block_forward(inp, params, tm_cap=256))
    out = jax.block_until_ready(fwd(x))

    ref = jax.block_until_ready(residual_block_reference(x, params))
    assert out.shape == ref.shape, (out.shape, ref.shape)
    max_err = float(jnp.max(jnp.abs(out - ref)))
    assert jnp.allclose(out, ref, atol=1e-3, rtol=1e-3), max_err

    print("KERNEL_OK")
</pallas_src>

<mosaic_0001>
module attributes {stable_mosaic.version = 11 : i64} {
  func.func @_matmul_stats_kernel(%arg0: i32, %arg1: memref<256x128xf32, #tpu.memory_space<vmem>>, %arg2: memref<128x128xf32, #tpu.memory_space<vmem>>, %arg3: memref<1x128xf32, #tpu.memory_space<vmem>>, %arg4: memref<256x128xf32, #tpu.memory_space<vmem>>, %arg5: memref<1x2x128xf32, #tpu.memory_space<vmem>>) attributes {dimension_semantics = [#tpu.dimension_semantics<parallel>], iteration_bounds = array<i64: 2>, scalar_prefetch = 0 : i64, scratch_operands = 0 : i64, tpu.core_type = #tpu.core_type<tc>, window_params = [{transform_indices = @transform_0, window_bounds = array<i64: 256, 128>}, {pipeline_mode = #tpu.pipeline_mode<synchronous>, transform_indices = @transform_1, window_bounds = array<i64: 128, 128>}, {pipeline_mode = #tpu.pipeline_mode<synchronous>, transform_indices = @transform_2, window_bounds = array<i64: 1, 128>}, {transform_indices = @transform_3, window_bounds = array<i64: 256, 128>}, {transform_indices = @transform_4, window_bounds = array<i64: 1, 2, 128>}]} {
    %c0 = arith.constant 0 : index
    %c0_0 = arith.constant 0 : index
    %0 = vector.load %arg1[%c0, %c0_0] : memref<256x128xf32, #tpu.memory_space<vmem>>, vector<256x128xf32>
    %c0_1 = arith.constant 0 : index
    %c0_2 = arith.constant 0 : index
    %1 = vector.load %arg2[%c0_1, %c0_2] : memref<128x128xf32, #tpu.memory_space<vmem>>, vector<128x128xf32>
    %cst = arith.constant dense<0.000000e+00> : vector<256x128xf32>
    %2 = tpu.matmul %0, %1, %cst {dimension_numbers = #tpu.dot_dimension_numbers<[1], [0], [0], [1], [0, 0, 1, 1], [], []>} : vector<256x128xf32>, vector<128x128xf32>, vector<256x128xf32> -> vector<256x128xf32>
    %c0_3 = arith.constant 0 : index
    %c0_4 = arith.constant 0 : index
    %3 = vector.load %arg3[%c0_3, %c0_4] : memref<1x128xf32, #tpu.memory_space<vmem>>, vector<1x128xf32>
    %4 = vector.broadcast %3 : vector<1x128xf32> to vector<256x128xf32>
    %5 = arith.addf %2, %4 : vector<256x128xf32>
    %c0_5 = arith.constant 0 : index
    %c0_6 = arith.constant 0 : index
    %6 = vector.load %arg4[%c0_5, %c0_6] : memref<256x128xf32, #tpu.memory_space<vmem>>, vector<256x128xf32>
    tpu.vector_store %arg4[%c0_5, %c0_6], %5 {strides = array<i32>} : memref<256x128xf32, #tpu.memory_space<vmem>>, vector<256x128xf32>,
    %cst_7 = arith.constant dense<0.000000e+00> : vector<128xf32>
    %7 = vector.multi_reduction <add>, %5, %cst_7 [0] : vector<256x128xf32> to vector<128xf32>
    %8 = vector.shape_cast %7 : vector<128xf32> to vector<1x128xf32>
    %c0_8 = arith.constant 0 : index
    %c0_9 = arith.constant 0 : index
    %c0_10 = arith.constant 0 : index
    %9 = vector.load %arg5[%c0_8, %c0_9, %c0_10] : memref<1x2x128xf32, #tpu.memory_space<vmem>>, vector<1x1x128xf32>
    %10 = vector.shape_cast %9 : vector<1x1x128xf32> to vector<1x128xf32>
    %11 = vector.shape_cast %8 : vector<1x128xf32> to vector<1x1x128xf32>
    tpu.vector_store %arg5[%c0_8, %c0_9, %c0_10], %11 {strides = array<i32>} : memref<1x2x128xf32, #tpu.memory_space<vmem>>, vector<1x1x128xf32>,
    %12 = arith.mulf %5, %5 : vector<256x128xf32>
    %cst_11 = arith.constant dense<0.000000e+00> : vector<128xf32>
    %13 = vector.multi_reduction <add>, %12, %cst_11 [0] : vector<256x128xf32> to vector<128xf32>
    %14 = vector.shape_cast %13 : vector<128xf32> to vector<1x128xf32>
    %c0_12 = arith.constant 0 : index
    %c1 = arith.constant 1 : index
    %c0_13 = arith.constant 0 : index
    %15 = vector.load %arg5[%c0_12, %c1, %c0_13] : memref<1x2x128xf32, #tpu.memory_space<vmem>>, vector<1x1x128xf32>
    %16 = vector.shape_cast %15 : vector<1x1x128xf32> to vector<1x128xf32>
    %17 = vector.shape_cast %14 : vector<1x128xf32> to vector<1x1x128xf32>
    tpu.vector_store %arg5[%c0_12, %c1, %c0_13], %17 {strides = array<i32>} : memref<1x2x128xf32, #tpu.memory_space<vmem>>, vector<1x1x128xf32>,
    return
  }
  func.func @transform_0(%arg0: i32) -> (i32, i32) {
    %c0_i32 = arith.constant 0 : i32
    %c0_i32_0 = arith.constant 0 : i32
    return %arg0, %c0_i32 : i32, i32
  }
  func.func @transform_1(%arg0: i32) -> (i32, i32) {
    %c0_i32 = arith.constant 0 : i32
    %c0_i32_0 = arith.constant 0 : i32
    %c0_i32_1 = arith.constant 0 : i32
    return %c0_i32, %c0_i32_0 : i32, i32
  }
  func.func @transform_2(%arg0: i32) -> (i32, i32) {
    %c0_i32 = arith.constant 0 : i32
    %c0_i32_0 = arith.constant 0 : i32
    %c0_i32_1 = arith.constant 0 : i32
    return %c0_i32, %c0_i32_0 : i32, i32
  }
  func.func @transform_3(%arg0: i32) -> (i32, i32) {
    %c0_i32 = arith.constant 0 : i32
    %c0_i32_0 = arith.constant 0 : i32
    return %arg0, %c0_i32 : i32, i32
  }
  func.func @transform_4(%arg0: i32) -> (i32, i32, i32) {
    %c0_i32 = arith.constant 0 : i32
    %c0_i32_0 = arith.constant 0 : i32
    %c0_i32_1 = arith.constant 0 : i32
    return %arg0, %c0_i32, %c0_i32_0 : i32, i32, i32
  }
}

module attributes {stable_mosaic.version = 11 : i64} {
  func.func @_bn_relu_conv3x3_stats_kernel(%arg0: i32, %arg1: memref<1x16x16x128xf32, #tpu.memory_space<vmem>>, %arg2: memref<1x128xf32, #tpu.memory_space<vmem>>, %arg3: memref<1x128xf32, #tpu.memory_space<vmem>>, %arg4: memref<9x128x128xf32, #tpu.memory_space<vmem>>, %arg5: memref<1x128xf32, #tpu.memory_space<vmem>>, %arg6: memref<1x16x16x128xf32, #tpu.memory_space<vmem>>, %arg7: memref<1x2x128xf32, #tpu.memory_space<vmem>>, %arg8: memref<18x18x128xf32, #tpu.memory_space<vmem>>) attributes {dimension_semantics = [#tpu.dimension_semantics<parallel>], iteration_bounds = array<i64: 2>, scalar_prefetch = 0 : i64, scratch_operands = 1 : i64, tpu.core_type = #tpu.core_type<tc>, window_params = [{transform_indices = @transform_0, window_bounds = array<i64: 1, 16, 16, 128>}, {pipeline_mode = #tpu.pipeline_mode<synchronous>, transform_indices = @transform_1, window_bounds = array<i64: 1, 128>}, {pipeline_mode = #tpu.pipeline_mode<synchronous>, transform_indices = @transform_2, window_bounds = array<i64: 1, 128>}, {pipeline_mode = #tpu.pipeline_mode<synchronous>, transform_indices = @transform_3, window_bounds = array<i64: 9, 128, 128>}, {pipeline_mode = #tpu.pipeline_mode<synchronous>, transform_indices = @transform_4, window_bounds = array<i64: 1, 128>}, {transform_indices = @transform_5, window_bounds = array<i64: 1, 16, 16, 128>}, {transform_indices = @transform_6, window_bounds = array<i64: 1, 2, 128>}]} {
    %cst = arith.constant 0.000000e+00 : f32
    %0 = vector.broadcast %cst : f32 to vector<18x18x128xf32>
    %c0 = arith.constant 0 : index
    %c0_0 = arith.constant 0 : index
    %c0_1 = arith.constant 0 : index
    %1 = vector.load %arg8[%c0, %c0_0, %c0_1] : memref<18x18x128xf32, #tpu.memory_space<vmem>>, vector<18x18x128xf32>
    tpu.vector_store %arg8[%c0, %c0_0, %c0_1], %0 {strides = array<i32>} : memref<18x18x128xf32, #tpu.memory_space<vmem>>, vector<18x18x128xf32>,
    %c0_2 = arith.constant 0 : index
    %c0_3 = arith.constant 0 : index
    %c0_4 = arith.constant 0 : index
    %c0_5 = arith.constant 0 : index
    %2 = vector.load %arg1[%c0_2, %c0_3, %c0_4, %c0_5] : memref<1x16x16x128xf32, #tpu.memory_space<vmem>>, vector<1x16x16x128xf32>
    %3 = vector.shape_cast %2 : vector<1x16x16x128xf32> to vector<16x16x128xf32>
    %c0_6 = arith.constant 0 : index
    %c0_7 = arith.constant 0 : index
    %4 = vector.load %arg2[%c0_6, %c0_7] : memref<1x128xf32, #tpu.memory_space<vmem>>, vector<1x128xf32>
    %5 = vector.shape_cast %4 : vector<1x128xf32> to vector<1x1x128xf32>
    %6 = vector.broadcast %5 : vector<1x1x128xf32> to vector<16x16x128xf32>
    %7 = arith.mulf %3, %6 : vector<16x16x128xf32>
    %c0_8 = arith.constant 0 : index
    %c0_9 = arith.constant 0 : index
    %8 = vector.load %arg3[%c0_8, %c0_9] : memref<1x128xf32, #tpu.memory_space<vmem>>, vector<1x128xf32>
    %9 = vector.shape_cast %8 : vector<1x128xf32> to vector<1x1x128xf32>
    %10 = vector.broadcast %9 : vector<1x1x128xf32> to vector<16x16x128xf32>
    %11 = arith.addf %7, %10 : vector<16x16x128xf32>
    %cst_10 = arith.constant 0.000000e+00 : f32
    %12 = vector.broadcast %cst_10 : f32 to vector<16x16x128xf32>
    %13 = arith.maximumf %11, %12 : vector<16x16x128xf32>
    %c1 = arith.constant 1 : index
    %c1_11 = arith.constant 1 : index
    %c0_12 = arith.constant 0 : index
    %14 = vector.load %arg8[%c1, %c1_11, %c0_12] : memref<18x18x128xf32, #tpu.memory_space<vmem>>, vector<16x16x128xf32>
    tpu.vector_store %arg8[%c1, %c1_11, %c0_12], %13 {strides = array<i32>} : memref<18x18x128xf32, #tpu.memory_space<vmem>>, vector<16x16x128xf32>,
    %c0_13 = arith.constant 0 : index
    %c0_14 = arith.constant 0 : index
    %15 = vector.load %arg5[%c0_13, %c0_14] : memref<1x128xf32, #tpu.memory_space<vmem>>, vector<1x128xf32>
    %cst_15 = arith.constant 0.000000e+00 : f32
    %16 = vector.broadcast %cst_15 : f32 to vector<1x2x128xf32>
    %c0_16 = arith.constant 0 : index
    %c0_17 = arith.constant 0 : index
    %c0_18 = arith.constant 0 : index
    %17 = vector.load %arg7[%c0_16, %c0_17, %c0_18] : memref<1x2x128xf32, #tpu.memory_space<vmem>>, vector<1x2x128xf32>
    tpu.vector_store %arg7[%c0_16, %c0_17, %c0_18], %16 {strides = array<i32>} : memref<1x2x128xf32, #tpu.memory_space<vmem>>, vector<1x2x128xf32>,
    %c0_i32 = arith.constant 0 : i32
    %c16_i32 = arith.constant 16 : i32
    %18 = arith.addi %c0_i32, %c16_i32 : i32
    %c1_i32 = arith.constant 1 : i32
    scf.for %arg9 = %c0_i32 to %18 step %c1_i32  : i32 {
      %c1_i32_20 = arith.constant 1 : i32
      %19 = arith.muli %arg9, %c1_i32_20 : i32
      %c0_i32_21 = arith.constant 0 : i32
      %20 = arith.addi %c0_i32_21, %19 : i32
      %cst_22 = arith.constant 0.000000e+00 : f32
      %21 = vector.broadcast %cst_22 : f32 to vector<16x128xf32>
      %c0_i32_23 = arith.constant 0 : i32
      %22 = arith.addi %20, %c0_i32_23 : i32
      %23 = arith.index_cast %22 : i32 to index
      %c0_24 = arith.constant 0 : index
      %c0_25 = arith.constant 0 : index
      %24 = vector.load %arg8[%23, %c0_24, %c0_25] : memref<18x18x128xf32, #tpu.memory_space<vmem>>, vector<1x16x128xf32>
      %25 = vector.shape_cast %24 : vector<1x16x128xf32> to vector<16x128xf32>
      %c0_26 = arith.constant 0 : index
      %c0_27 = arith.constant 0 : index
      %c0_28 = arith.constant 0 : index
      %26 = vector.load %arg4[%c0_26, %c0_27, %c0_28] : memref<9x128x128xf32, #tpu.memory_space<vmem>>, vector<1x128x128xf32>
      %27 = vector.shape_cast %26 : vector<1x128x128xf32> to vector<128x128xf32>
      %cst_29 = arith.constant dense<0.000000e+00> : vector<16x128xf32>
      %28 = tpu.matmul %25, %27, %cst_29 {dimension_numbers = #tpu.dot_dimension_numbers<[1], [0], [0], [1], [0, 0, 1, 1], [], []>} : vector<16x128xf32>, vector<128x128xf32>, vector<16x128xf32> -> vector<16x128xf32>
      %29 = arith.addf %21, %28 : vector<16x128xf32>
      %c0_i32_30 = arith.constant 0 : i32
      %30 = arith.addi %20, %c0_i32_30 : i32
      %31 = arith.index_cast %30 : i32 to index
      %c1_31 = arith.constant 1 : index
      %c0_32 = arith.constant 0 : index
      %32 = vector.load %arg8[%31, %c1_31, %c0_32] : memref<18x18x128xf32, #tpu.memory_space<vmem>>, vector<1x16x128xf32>
      %33 = vector.shape_cast %32 : vector<1x16x128xf32> to vector<16x128xf32>
      %c1_33 = arith.constant 1 : index
      %c0_34 = arith.constant 0 : index
      %c0_35 = arith.constant 0 : index
      %34 = vector.load %arg4[%c1_33, %c0_34, %c0_35] : memref<9x128x128xf32, #tpu.memory_space<vmem>>, vector<1x128x128xf32>
      %35 = vector.shape_cast %34 : vector<1x128x128xf32> to vector<128x128xf32>
      %cst_36 = arith.constant dense<0.000000e+00> : vector<16x128xf32>
      %36 = tpu.matmul %33, %35, %cst_36 {dimension_numbers = #tpu.dot_dimension_numbers<[1], [0], [0], [1], [0, 0, 1, 1], [], []>} : vector<16x128xf32>, vector<128x128xf32>, vector<16x128xf32> -> vector<16x128xf32>
      %37 = arith.addf %29, %36 : vector<16x128xf32>
      %c0_i32_37 = arith.constant 0 : i32
      %38 = arith.addi %20, %c0_i32_37 : i32
      %39 = arith.index_cast %38 : i32 to index
      %c2 = arith.constant 2 : index
      %c0_38 = arith.constant 0 : index
      %40 = vector.load %arg8[%39, %c2, %c0_38] : memref<18x18x128xf32, #tpu.memory_space<vmem>>, vector<1x16x128xf32>
      %41 = vector.shape_cast %40 : vector<1x16x128xf32> to vector<16x128xf32>
      %c2_39 = arith.constant 2 : index
      %c0_40 = arith.constant 0 : index
      %c0_41 = arith.constant 0 : index
      %42 = vector.load %arg4[%c2_39, %c0_40, %c0_41] : memref<9x128x128xf32, #tpu.memory_space<vmem>>, vector<1x128x128xf32>
      %43 = vector.shape_cast %42 : vector<1x128x128xf32> to vector<128x128xf32>
      %cst_42 = arith.constant dense<0.000000e+00> : vector<16x128xf32>
      %44 = tpu.matmul %41, %43, %cst_42 {dimension_numbers = #tpu.dot_dimension_numbers<[1], [0], [0], [1], [0, 0, 1, 1], [], []>} : vector<16x128xf32>, vector<128x128xf32>, vector<16x128xf32> -> vector<16x128xf32>
      %45 = arith.addf %37, %44 : vector<16x128xf32>
      %c1_i32_43 = arith.constant 1 : i32
      %46 = arith.addi %20, %c1_i32_43 : i32
      %47 = arith.index_cast %46 : i32 to index
      %c0_44 = arith.constant 0 : index
      %c0_45 = arith.constant 0 : index
      %48 = vector.load %arg8[%47, %c0_44, %c0_45] : memref<18x18x128xf32, #tpu.memory_space<vmem>>, vector<1x16x128xf32>
      %49 = vector.shape_cast %48 : vector<1x16x128xf32> to vector<16x128xf32>
      %c3 = arith.constant 3 : index
      %c0_46 = arith.constant 0 : index
      %c0_47 = arith.constant 0 : index
      %50 = vector.load %arg4[%c3, %c0_46, %c0_47] : memref<9x128x128xf32, #tpu.memory_space<vmem>>, vector<1x128x128xf32>
      %51 = vector.shape_cast %50 : vector<1x128x128xf32> to vector<128x128xf32>
      %cst_48 = arith.constant dense<0.000000e+00> : vector<16x128xf32>
      %52 = tpu.matmul %49, %51, %cst_48 {dimension_numbers = #tpu.dot_dimension_numbers<[1], [0], [0], [1], [0, 0, 1, 1], [], []>} : vector<16x128xf32>, vector<128x128xf32>, vector<16x128xf32> -> vector<16x128xf32>
      %53 = arith.addf %45, %52 : vector<16x128xf32>
      %c1_i32_49 = arith.constant 1 : i32
      %54 = arith.addi %20, %c1_i32_49 : i32
      %55 = arith.index_cast %54 : i32 to index
      %c1_50 = arith.constant 1 : index
      %c0_51 = arith.constant 0 : index
      %56 = vector.load %arg8[%55, %c1_50, %c0_51] : memref<18x18x128xf32, #tpu.memory_space<vmem>>, vector<1x16x128xf32>
      %57 = vector.shape_cast %56 : vector<1x16x128xf32> to vector<16x128xf32>
      %c4 = arith.constant 4 : index
      %c0_52 = arith.constant 0 : index
      %c0_53 = arith.constant 0 : index
      %58 = vector.load %arg4[%c4, %c0_52, %c0_53] : memref<9x128x128xf32, #tpu.memory_space<vmem>>, vector<1x128x128xf32>
      %59 = vector.shape_cast %58 : vector<1x128x128xf32> to vector<128x128xf32>
      %cst_54 = arith.constant dense<0.000000e+00> : vector<16x128xf32>
      %60 = tpu.matmul %57, %59, %cst_54 {dimension_numbers = #tpu.dot_dimension_numbers<[1], [0], [0], [1], [0, 0, 1, 1], [], []>} : vector<16x128xf32>, vector<128x128xf32>, vector<16x128xf32> -> vector<16x128xf32>
      %61 = arith.addf %53, %60 : vector<16x128xf32>
      %c1_i32_55 = arith.constant 1 : i32
      %62 = arith.addi %20, %c1_i32_55 : i32
      %63 = arith.index_cast %62 : i32 to index
      %c2_56 = arith.constant 2 : index
      %c0_57 = arith.constant 0 : index
      %64 = vector.load %arg8[%63, %c2_56, %c0_57] : memref<18x18x128xf32, #tpu.memory_space<vmem>>, vector<1x16x128xf32>
      %65 = vector.shape_cast %64 : vector<1x16x128xf32> to vector<16x128xf32>
      %c5 = arith.constant 5 : index
      %c0_58 = arith.constant 0 : index
      %c0_59 = arith.constant 0 : index
      %66 = vector.load %arg4[%c5, %c0_58, %c0_59] : memref<9x128x128xf32, #tpu.memory_space<vmem>>, vector<1x128x128xf32>
      %67 = vector.shape_cast %66 : vector<1x128x128xf32> to vector<128x128xf32>
      %cst_60 = arith.constant dense<0.000000e+00> : vector<16x128xf32>
      %68 = tpu.matmul %65, %67, %cst_60 {dimension_numbers = #tpu.dot_dimension_numbers<[1], [0], [0], [1], [0, 0, 1, 1], [], []>} : vector<16x128xf32>, vector<128x128xf32>, vector<16x128xf32> -> vector<16x128xf32>
      %69 = arith.addf %61, %68 : vector<16x128xf32>
      %c2_i32 = arith.constant 2 : i32
      %70 = arith.addi %20, %c2_i32 : i32
      %71 = arith.index_cast %70 : i32 to index
      %c0_61 = arith.constant 0 : index
      %c0_62 = arith.constant 0 : index
      %72 = vector.load %arg8[%71, %c0_61, %c0_62] : memref<18x18x128xf32, #tpu.memory_space<vmem>>, vector<1x16x128xf32>
      %73 = vector.shape_cast %72 : vector<1x16x128xf32> to vector<16x128xf32>
      %c6 = arith.constant 6 : index
      %c0_63 = arith.constant 0 : index
      %c0_64 = arith.constant 0 : index
      %74 = vector.load %arg4[%c6, %c0_63, %c0_64] : memref<9x128x128xf32, #tpu.memory_space<vmem>>, vector<1x128x128xf32>
      %75 = vector.shape_cast %74 : vector<1x128x128xf32> to vector<128x128xf32>
      %cst_65 = arith.constant dense<0.000000e+00> : vector<16x128xf32>
      %76 = tpu.matmul %73, %75, %cst_65 {dimension_numbers = #tpu.dot_dimension_numbers<[1], [0], [0], [1], [0, 0, 1, 1], [], []>} : vector<16x128xf32>, vector<128x128xf32>, vector<16x128xf32> -> vector<16x128xf32>
      %77 = arith.addf %69, %76 : vector<16x128xf32>
      %c2_i32_66 = arith.constant 2 : i32
      %78 = arith.addi %20, %c2_i32_66 : i32
      %79 = arith.index_cast %78 : i32 to index
      %c1_67 = arith.constant 1 : index
      %c0_68 = arith.constant 0 : index
      %80 = vector.load %arg8[%79, %c1_67, %c0_68] : memref<18x18x128xf32, #tpu.memory_space<vmem>>, vector<1x16x128xf32>
      %81 = vector.shape_cast %80 : vector<1x16x128xf32> to vector<16x128xf32>
      %c7 = arith.constant 7 : index
      %c0_69 = arith.constant 0 : index
      %c0_70 = arith.constant 0 : index
      %82 = vector.load %arg4[%c7, %c0_69, %c0_70] : memref<9x128x128xf32, #tpu.memory_space<vmem>>, vector<1x128x128xf32>
      %83 = vector.shape_cast %82 : vector<1x128x128xf32> to vector<128x128xf32>
      %cst_71 = arith.constant dense<0.000000e+00> : vector<16x128xf32>
      %84 = tpu.matmul %81, %83, %cst_71 {dimension_numbers = #tpu.dot_dimension_numbers<[1], [0], [0], [1], [0, 0, 1, 1], [], []>} : vector<16x128xf32>, vector<128x128xf32>, vector<16x128xf32> -> vector<16x128xf32>
      %85 = arith.addf %77, %84 : vector<16x128xf32>
      %c2_i32_72 = arith.constant 2 : i32
      %86 = arith.addi %20, %c2_i32_72 : i32
      %87 = arith.index_cast %86 : i32 to index
      %c2_73 = arith.constant 2 : index
      %c0_74 = arith.constant 0 : index
      %88 = vector.load %arg8[%87, %c2_73, %c0_74] : memref<18x18x128xf32, #tpu.memory_space<vmem>>, vector<1x16x128xf32>
      %89 = vector.shape_cast %88 : vector<1x16x128xf32> to vector<16x128xf32>
      %c8 = arith.constant 8 : index
      %c0_75 = arith.constant 0 : index
      %c0_76 = arith.constant 0 : index
      %90 = vector.load %arg4[%c8, %c0_75, %c0_76] : memref<9x128x128xf32, #tpu.memory_space<vmem>>, vector<1x128x128xf32>
      %91 = vector.shape_cast %90 : vector<1x128x128xf32> to vector<128x128xf32>
      %cst_77 = arith.constant dense<0.000000e+00> : vector<16x128xf32>
      %92 = tpu.matmul %89, %91, %cst_77 {dimension_numbers = #tpu.dot_dimension_numbers<[1], [0], [0], [1], [0, 0, 1, 1], [], []>} : vector<16x128xf32>, vector<128x128xf32>, vector<16x128xf32> -> vector<16x128xf32>
      %93 = arith.addf %85, %92 : vector<16x128xf32>
      %94 = vector.broadcast %15 : vector<1x128xf32> to vector<16x128xf32>
      %95 = arith.addf %93, %94 : vector<16x128xf32>
      %c0_78 = arith.constant 0 : index
      %96 = arith.index_cast %20 : i32 to index
      %c0_79 = arith.constant 0 : index
      %c0_80 = arith.constant 0 : index
      %97 = vector.load %arg6[%c0_78, %96, %c0_79, %c0_80] : memref<1x16x16x128xf32, #tpu.memory_space<vmem>>, vector<1x1x16x128xf32>
      %98 = vector.shape_cast %97 : vector<1x1x16x128xf32> to vector<16x128xf32>
      %99 = vector.shape_cast %95 : vector<16x128xf32> to vector<1x1x16x128xf32>
      tpu.vector_store %arg6[%c0_78, %96, %c0_79, %c0_80], %99 {strides = array<i32>} : memref<1x16x16x128xf32, #tpu.memory_space<vmem>>, vector<1x1x16x128xf32>,
      %c0_81 = arith.constant 0 : index
      %c0_82 = arith.constant 0 : index
      %c0_83 = arith.constant 0 : index
      %100 = vector.load %arg7[%c0_81, %c0_82, %c0_83] : memref<1x2x128xf32, #tpu.memory_space<vmem>>, vector<1x1x128xf32>
      %101 = vector.shape_cast %100 : vector<1x1x128xf32> to vector<1x128xf32>
      %cst_84 = arith.constant dense<0.000000e+00> : vector<128xf32>
      %102 = vector.multi_reduction <add>, %95, %cst_84 [0] : vector<16x128xf32> to vector<128xf32>
      %103 = vector.shape_cast %102 : vector<128xf32> to vector<1x128xf32>
      %104 = arith.addf %101, %103 : vector<1x128xf32>
      %c0_85 = arith.constant 0 : index
      %c0_86 = arith.constant 0 : index
      %c0_87 = arith.constant 0 : index
      %105 = vector.load %arg7[%c0_85, %c0_86, %c0_87] : memref<1x2x128xf32, #tpu.memory_space<vmem>>, vector<1x1x128xf32>
      %106 = vector.shape_cast %105 : vector<1x1x128xf32> to vector<1x128xf32>
      %107 = vector.shape_cast %104 : vector<1x128xf32> to vector<1x1x128xf32>
      tpu.vector_store %arg7[%c0_85, %c0_86, %c0_87], %107 {strides = array<i32>} : memref<1x2x128xf32, #tpu.memory_space<vmem>>, vector<1x1x128xf32>,
      %c0_88 = arith.constant 0 : index
      %c1_89 = arith.constant 1 : index
      %c0_90 = arith.constant 0 : index
      %108 = vector.load %arg7[%c0_88, %c1_89, %c0_90] : memref<1x2x128xf32, #tpu.memory_space<vmem>>, vector<1x1x128xf32>
      %109 = vector.shape_cast %108 : vector<1x1x128xf32> to vector<1x128xf32>
      %110 = arith.mulf %95, %95 : vector<16x128xf32>
      %cst_91 = arith.constant dense<0.000000e+00> : vector<128xf32>
      %111 = vector.multi_reduction <add>, %110, %cst_91 [0] : vector<16x128xf32> to vector<128xf32>
      %112 = vector.shape_cast %111 : vector<128xf32> to vector<1x128xf32>
      %113 = arith.addf %109, %112 : vector<1x128xf32>
      %c0_92 = arith.constant 0 : index
      %c1_93 = arith.constant 1 : index
      %c0_94 = arith.constant 0 : index
      %114 = vector.load %arg7[%c0_92, %c1_93, %c0_94] : memref<1x2x128xf32, #tpu.memory_space<vmem>>, vector<1x1x128xf32>
      %115 = vector.shape_cast %114 : vector<1x1x128xf32> to vector<1x128xf32>
      %116 = vector.shape_cast %113 : vector<1x128xf32> to vector<1x1x128xf32>
      tpu.vector_store %arg7[%c0_92, %c1_93, %c0_94], %116 {strides = array<i32>} : memref<1x2x128xf32, #tpu.memory_space<vmem>>, vector<1x1x128xf32>,
    }
    %c16_i32_19 = arith.constant 16 : i32
    return
  }
  func.func @transform_0(%arg0: i32) -> (i32, i32, i32, i32) {
    %c0_i32 = arith.constant 0 : i32
    %c0_i32_0 = arith.constant 0 : i32
    %c0_i32_1 = arith.constant 0 : i32
    %c0_i32_2 = arith.constant 0 : i32
    return %arg0, %c0_i32, %c0_i32_0, %c0_i32_1 : i32, i32, i32, i32
  }
  func.func @transform_1(%arg0: i32) -> (i32, i32) {
    %c0_i32 = arith.constant 0 : i32
    %c0_i32_0 = arith.constant 0 : i32
    %c0_i32_1 = arith.constant 0 : i32
    return %c0_i32, %c0_i32_0 : i32, i32
  }
  func.func @transform_2(%arg0: i32) -> (i32, i32) {
    %c0_i32 = arith.constant 0 : i32
    %c0_i32_0 = arith.constant 0 : i32
    %c0_i32_1 = arith.constant 0 : i32
    return %c0_i32, %c0_i32_0 : i32, i32
  }
  func.func @transform_3(%arg0: i32) -> (i32, i32, i32) {
    %c0_i32 = arith.constant 0 : i32
    %c0_i32_0 = arith.constant 0 : i32
    %c0_i32_1 = arith.constant 0 : i32
    %c0_i32_2 = arith.constant 0 : i32
    return %c0_i32, %c0_i32_0, %c0_i32_1 : i32, i32, i32
  }
  func.func @transform_4(%arg0: i32) -> (i32, i32) {
    %c0_i32 = arith.constant 0 : i32
    %c0_i32_0 = arith.constant 0 : i32
    %c0_i32_1 = arith.constant 0 : i32
    return %c0_i32, %c0_i32_0 : i32, i32
  }
  func.func @transform_5(%arg0: i32) -> (i32, i32, i32, i32) {
    %c0_i32 = arith.constant 0 : i32
    %c0_i32_0 = arith.constant 0 : i32
    %c0_i32_1 = arith.constant 0 : i32
    %c0_i32_2 = arith.constant 0 : i32
    return %arg0, %c0_i32, %c0_i32_0, %c0_i32_1 : i32, i32, i32, i32
  }
  func.func @transform_6(%arg0: i32) -> (i32, i32, i32) {
    %c0_i32 = arith.constant 0 : i32
    %c0_i32_0 = arith.constant 0 : i32
    %c0_i32_1 = arith.constant 0 : i32
    return %arg0, %c0_i32, %c0_i32_0 : i32, i32, i32
  }
}

module attributes {stable_mosaic.version = 11 : i64} {
  func.func @_bn_matmul_stats_proj_kernel(%arg0: i32, %arg1: memref<256x128xf32, #tpu.memory_space<vmem>>, %arg2: memref<1x128xf32, #tpu.memory_space<vmem>>, %arg3: memref<1x128xf32, #tpu.memory_space<vmem>>, %arg4: memref<128x128xf32, #tpu.memory_space<vmem>>, %arg5: memref<1x128xf32, #tpu.memory_space<vmem>>, %arg6: memref<256x128xf32, #tpu.memory_space<vmem>>, %arg7: memref<128x128xf32, #tpu.memory_space<vmem>>, %arg8: memref<1x128xf32, #tpu.memory_space<vmem>>, %arg9: memref<256x128xf32, #tpu.memory_space<vmem>>, %arg10: memref<1x2x128xf32, #tpu.memory_space<vmem>>, %arg11: memref<256x128xf32, #tpu.memory_space<vmem>>, %arg12: memref<1x2x128xf32, #tpu.memory_space<vmem>>) attributes {dimension_semantics = [#tpu.dimension_semantics<parallel>], iteration_bounds = array<i64: 2>, scalar_prefetch = 0 : i64, scratch_operands = 0 : i64, tpu.core_type = #tpu.core_type<tc>, window_params = [{transform_indices = @transform_0, window_bounds = array<i64: 256, 128>}, {pipeline_mode = #tpu.pipeline_mode<synchronous>, transform_indices = @transform_1, window_bounds = array<i64: 1, 128>}, {pipeline_mode = #tpu.pipeline_mode<synchronous>, transform_indices = @transform_2, window_bounds = array<i64: 1, 128>}, {pipeline_mode = #tpu.pipeline_mode<synchronous>, transform_indices = @transform_3, window_bounds = array<i64: 128, 128>}, {pipeline_mode = #tpu.pipeline_mode<synchronous>, transform_indices = @transform_4, window_bounds = array<i64: 1, 128>}, {transform_indices = @transform_5, window_bounds = array<i64: 256, 128>}, {pipeline_mode = #tpu.pipeline_mode<synchronous>, transform_indices = @transform_6, window_bounds = array<i64: 128, 128>}, {pipeline_mode = #tpu.pipeline_mode<synchronous>, transform_indices = @transform_7, window_bounds = array<i64: 1, 128>}, {transform_indices = @transform_8, window_bounds = array<i64: 256, 128>}, {transform_indices = @transform_9, window_bounds = array<i64: 1, 2, 128>}, {transform_indices = @transform_10, window_bounds = array<i64: 256, 128>}, {transform_indices = @transform_11, window_bounds = array<i64: 1, 2, 128>}]} {
    %c0 = arith.constant 0 : index
    %c0_0 = arith.constant 0 : index
    %0 = vector.load %arg1[%c0, %c0_0] : memref<256x128xf32, #tpu.memory_space<vmem>>, vector<256x128xf32>
    %c0_1 = arith.constant 0 : index
    %c0_2 = arith.constant 0 : index
    %1 = vector.load %arg2[%c0_1, %c0_2] : memref<1x128xf32, #tpu.memory_space<vmem>>, vector<1x128xf32>
    %2 = vector.broadcast %1 : vector<1x128xf32> to vector<256x128xf32>
    %3 = arith.mulf %0, %2 : vector<256x128xf32>
    %c0_3 = arith.constant 0 : index
    %c0_4 = arith.constant 0 : index
    %4 = vector.load %arg3[%c0_3, %c0_4] : memref<1x128xf32, #tpu.memory_space<vmem>>, vector<1x128xf32>
    %5 = vector.broadcast %4 : vector<1x128xf32> to vector<256x128xf32>
    %6 = arith.addf %3, %5 : vector<256x128xf32>
    %cst = arith.constant 0.000000e+00 : f32
    %7 = vector.broadcast %cst : f32 to vector<256x128xf32>
    %8 = arith.maximumf %6, %7 : vector<256x128xf32>
    %c0_5 = arith.constant 0 : index
    %c0_6 = arith.constant 0 : index
    %9 = vector.load %arg4[%c0_5, %c0_6] : memref<128x128xf32, #tpu.memory_space<vmem>>, vector<128x128xf32>
    %cst_7 = arith.constant dense<0.000000e+00> : vector<256x128xf32>
    %10 = tpu.matmul %8, %9, %cst_7 {dimension_numbers = #tpu.dot_dimension_numbers<[1], [0], [0], [1], [0, 0, 1, 1], [], []>} : vector<256x128xf32>, vector<128x128xf32>, vector<256x128xf32> -> vector<256x128xf32>
    %c0_8 = arith.constant 0 : index
    %c0_9 = arith.constant 0 : index
    %11 = vector.load %arg5[%c0_8, %c0_9] : memref<1x128xf32, #tpu.memory_space<vmem>>, vector<1x128xf32>
    %12 = vector.broadcast %11 : vector<1x128xf32> to vector<256x128xf32>
    %13 = arith.addf %10, %12 : vector<256x128xf32>
    %c0_10 = arith.constant 0 : index
    %c0_11 = arith.constant 0 : index
    %14 = vector.load %arg9[%c0_10, %c0_11] : memref<256x128xf32, #tpu.memory_space<vmem>>, vector<256x128xf32>
    tpu.vector_store %arg9[%c0_10, %c0_11], %13 {strides = array<i32>} : memref<256x128xf32, #tpu.memory_space<vmem>>, vector<256x128xf32>,
    %cst_12 = arith.constant dense<0.000000e+00> : vector<128xf32>
    %15 = vector.multi_reduction <add>, %13, %cst_12 [0] : vector<256x128xf32> to vector<128xf32>
    %16 = vector.shape_cast %15 : vector<128xf32> to vector<1x128xf32>
    %c0_13 = arith.constant 0 : index
    %c0_14 = arith.constant 0 : index
    %c0_15 = arith.constant 0 : index
    %17 = vector.load %arg10[%c0_13, %c0_14, %c0_15] : memref<1x2x128xf32, #tpu.memory_space<vmem>>, vector<1x1x128xf32>
    %18 = vector.shape_cast %17 : vector<1x1x128xf32> to vector<1x128xf32>
    %19 = vector.shape_cast %16 : vector<1x128xf32> to vector<1x1x128xf32>
    tpu.vector_store %arg10[%c0_13, %c0_14, %c0_15], %19 {strides = array<i32>} : memref<1x2x128xf32, #tpu.memory_space<vmem>>, vector<1x1x128xf32>,
    %20 = arith.mulf %13, %13 : vector<256x128xf32>
    %cst_16 = arith.constant dense<0.000000e+00> : vector<128xf32>
    %21 = vector.multi_reduction <add>, %20, %cst_16 [0] : vector<256x128xf32> to vector<128xf32>
    %22 = vector.shape_cast %21 : vector<128xf32> to vector<1x128xf32>
    %c0_17 = arith.constant 0 : index
    %c1 = arith.constant 1 : index
    %c0_18 = arith.constant 0 : index
    %23 = vector.load %arg10[%c0_17, %c1, %c0_18] : memref<1x2x128xf32, #tpu.memory_space<vmem>>, vector<1x1x128xf32>
    %24 = vector.shape_cast %23 : vector<1x1x128xf32> to vector<1x128xf32>
    %25 = vector.shape_cast %22 : vector<1x128xf32> to vector<1x1x128xf32>
    tpu.vector_store %arg10[%c0_17, %c1, %c0_18], %25 {strides = array<i32>} : memref<1x2x128xf32, #tpu.memory_space<vmem>>, vector<1x1x128xf32>,
    %c0_19 = arith.constant 0 : index
    %c0_20 = arith.constant 0 : index
    %26 = vector.load %arg6[%c0_19, %c0_20] : memref<256x128xf32, #tpu.memory_space<vmem>>, vector<256x128xf32>
    %c0_21 = arith.constant 0 : index
    %c0_22 = arith.constant 0 : index
    %27 = vector.load %arg7[%c0_21, %c0_22] : memref<128x128xf32, #tpu.memory_space<vmem>>, vector<128x128xf32>
    %cst_23 = arith.constant dense<0.000000e+00> : vector<256x128xf32>
    %28 = tpu.matmul %26, %27, %cst_23 {dimension_numbers = #tpu.dot_dimension_numbers<[1], [0], [0], [1], [0, 0, 1, 1], [], []>} : vector<256x128xf32>, vector<128x128xf32>, vector<256x128xf32> -> vector<256x128xf32>
    %c0_24 = arith.constant 0 : index
    %c0_25 = arith.constant 0 : index
    %29 = vector.load %arg8[%c0_24, %c0_25] : memref<1x128xf32, #tpu.memory_space<vmem>>, vector<1x128xf32>
    %30 = vector.broadcast %29 : vector<1x128xf32> to vector<256x128xf32>
    %31 = arith.addf %28, %30 : vector<256x128xf32>
    %c0_26 = arith.constant 0 : index
    %c0_27 = arith.constant 0 : index
    %32 = vector.load %arg11[%c0_26, %c0_27] : memref<256x128xf32, #tpu.memory_space<vmem>>, vector<256x128xf32>
    tpu.vector_store %arg11[%c0_26, %c0_27], %31 {strides = array<i32>} : memref<256x128xf32, #tpu.memory_space<vmem>>, vector<256x128xf32>,
    %cst_28 = arith.constant dense<0.000000e+00> : vector<128xf32>
    %33 = vector.multi_reduction <add>, %31, %cst_28 [0] : vector<256x128xf32> to vector<128xf32>
    %34 = vector.shape_cast %33 : vector<128xf32> to vector<1x128xf32>
    %c0_29 = arith.constant 0 : index
    %c0_30 = arith.constant 0 : index
    %c0_31 = arith.constant 0 : index
    %35 = vector.load %arg12[%c0_29, %c0_30, %c0_31] : memref<1x2x128xf32, #tpu.memory_space<vmem>>, vector<1x1x128xf32>
    %36 = vector.shape_cast %35 : vector<1x1x128xf32> to vector<1x128xf32>
    %37 = vector.shape_cast %34 : vector<1x128xf32> to vector<1x1x128xf32>
    tpu.vector_store %arg12[%c0_29, %c0_30, %c0_31], %37 {strides = array<i32>} : memref<1x2x128xf32, #tpu.memory_space<vmem>>, vector<1x1x128xf32>,
    %38 = arith.mulf %31, %31 : vector<256x128xf32>
    %cst_32 = arith.constant dense<0.000000e+00> : vector<128xf32>
    %39 = vector.multi_reduction <add>, %38, %cst_32 [0] : vector<256x128xf32> to vector<128xf32>
    %40 = vector.shape_cast %39 : vector<128xf32> to vector<1x128xf32>
    %c0_33 = arith.constant 0 : index
    %c1_34 = arith.constant 1 : index
    %c0_35 = arith.constant 0 : index
    %41 = vector.load %arg12[%c0_33, %c1_34, %c0_35] : memref<1x2x128xf32, #tpu.memory_space<vmem>>, vector<1x1x128xf32>
    %42 = vector.shape_cast %41 : vector<1x1x128xf32> to vector<1x128xf32>
    %43 = vector.shape_cast %40 : vector<1x128xf32> to vector<1x1x128xf32>
    tpu.vector_store %arg12[%c0_33, %c1_34, %c0_35], %43 {strides = array<i32>} : memref<1x2x128xf32, #tpu.memory_space<vmem>>, vector<1x1x128xf32>,
    return
  }
  func.func @transform_0(%arg0: i32) -> (i32, i32) {
    %c0_i32 = arith.constant 0 : i32
    %c0_i32_0 = arith.constant 0 : i32
    return %arg0, %c0_i32 : i32, i32
  }
  func.func @transform_1(%arg0: i32) -> (i32, i32) {
    %c0_i32 = arith.constant 0 : i32
    %c0_i32_0 = arith.constant 0 : i32
    %c0_i32_1 = arith.constant 0 : i32
    return %c0_i32, %c0_i32_0 : i32, i32
  }
  func.func @transform_2(%arg0: i32) -> (i32, i32) {
    %c0_i32 = arith.constant 0 : i32
    %c0_i32_0 = arith.constant 0 : i32
    %c0_i32_1 = arith.constant 0 : i32
    return %c0_i32, %c0_i32_0 : i32, i32
  }
  func.func @transform_3(%arg0: i32) -> (i32, i32) {
    %c0_i32 = arith.constant 0 : i32
    %c0_i32_0 = arith.constant 0 : i32
    %c0_i32_1 = arith.constant 0 : i32
    return %c0_i32, %c0_i32_0 : i32, i32
  }
  func.func @transform_4(%arg0: i32) -> (i32, i32) {
    %c0_i32 = arith.constant 0 : i32
    %c0_i32_0 = arith.constant 0 : i32
    %c0_i32_1 = arith.constant 0 : i32
    return %c0_i32, %c0_i32_0 : i32, i32
  }
  func.func @transform_5(%arg0: i32) -> (i32, i32) {
    %c0_i32 = arith.constant 0 : i32
    %c0_i32_0 = arith.constant 0 : i32
    return %arg0, %c0_i32 : i32, i32
  }
  func.func @transform_6(%arg0: i32) -> (i32, i32) {
    %c0_i32 = arith.constant 0 : i32
    %c0_i32_0 = arith.constant 0 : i32
    %c0_i32_1 = arith.constant 0 : i32
    return %c0_i32, %c0_i32_0 : i32, i32
  }
  func.func @transform_7(%arg0: i32) -> (i32, i32) {
    %c0_i32 = arith.constant 0 : i32
    %c0_i32_0 = arith.constant 0 : i32
    %c0_i32_1 = arith.constant 0 : i32
    return %c0_i32, %c0_i32_0 : i32, i32
  }
  func.func @transform_8(%arg0: i32) -> (i32, i32) {
    %c0_i32 = arith.constant 0 : i32
    %c0_i32_0 = arith.constant 0 : i32
    return %arg0, %c0_i32 : i32, i32
  }
  func.func @transform_9(%arg0: i32) -> (i32, i32, i32) {
    %c0_i32 = arith.constant 0 : i32
    %c0_i32_0 = arith.constant 0 : i32
    %c0_i32_1 = arith.constant 0 : i32
    return %arg0, %c0_i32, %c0_i32_0 : i32, i32, i32
  }
  func.func @transform_10(%arg0: i32) -> (i32, i32) {
    %c0_i32 = arith.constant 0 : i32
    %c0_i32_0 = arith.constant 0 : i32
    return %arg0, %c0_i32 : i32, i32
  }
  func.func @transform_11(%arg0: i32) -> (i32, i32, i32) {
    %c0_i32 = arith.constant 0 : i32
    %c0_i32_0 = arith.constant 0 : i32
    %c0_i32_1 = arith.constant 0 : i32
    return %arg0, %c0_i32, %c0_i32_0 : i32, i32, i32
  }
}

module attributes {stable_mosaic.version = 11 : i64} {
  func.func @_bn_add_bn_relu_kernel(%arg0: i32, %arg1: memref<256x128xf32, #tpu.memory_space<vmem>>, %arg2: memref<1x128xf32, #tpu.memory_space<vmem>>, %arg3: memref<1x128xf32, #tpu.memory_space<vmem>>, %arg4: memref<256x128xf32, #tpu.memory_space<vmem>>, %arg5: memref<1x128xf32, #tpu.memory_space<vmem>>, %arg6: memref<1x128xf32, #tpu.memory_space<vmem>>, %arg7: memref<256x128xf32, #tpu.memory_space<vmem>>) attributes {dimension_semantics = [#tpu.dimension_semantics<parallel>], iteration_bounds = array<i64: 2>, scalar_prefetch = 0 : i64, scratch_operands = 0 : i64, tpu.core_type = #tpu.core_type<tc>, window_params = [{transform_indices = @transform_0, window_bounds = array<i64: 256, 128>}, {pipeline_mode = #tpu.pipeline_mode<synchronous>, transform_indices = @transform_1, window_bounds = array<i64: 1, 128>}, {pipeline_mode = #tpu.pipeline_mode<synchronous>, transform_indices = @transform_2, window_bounds = array<i64: 1, 128>}, {transform_indices = @transform_3, window_bounds = array<i64: 256, 128>}, {pipeline_mode = #tpu.pipeline_mode<synchronous>, transform_indices = @transform_4, window_bounds = array<i64: 1, 128>}, {pipeline_mode = #tpu.pipeline_mode<synchronous>, transform_indices = @transform_5, window_bounds = array<i64: 1, 128>}, {transform_indices = @transform_6, window_bounds = array<i64: 256, 128>}]} {
    %c0 = arith.constant 0 : index
    %c0_0 = arith.constant 0 : index
    %0 = vector.load %arg1[%c0, %c0_0] : memref<256x128xf32, #tpu.memory_space<vmem>>, vector<256x128xf32>
    %c0_1 = arith.constant 0 : index
    %c0_2 = arith.constant 0 : index
    %1 = vector.load %arg2[%c0_1, %c0_2] : memref<1x128xf32, #tpu.memory_space<vmem>>, vector<1x128xf32>
    %2 = vector.broadcast %1 : vector<1x128xf32> to vector<256x128xf32>
    %3 = arith.mulf %0, %2 : vector<256x128xf32>
    %c0_3 = arith.constant 0 : index
    %c0_4 = arith.constant 0 : index
    %4 = vector.load %arg3[%c0_3, %c0_4] : memref<1x128xf32, #tpu.memory_space<vmem>>, vector<1x128xf32>
    %5 = vector.broadcast %4 : vector<1x128xf32> to vector<256x128xf32>
    %6 = arith.addf %3, %5 : vector<256x128xf32>
    %c0_5 = arith.constant 0 : index
    %c0_6 = arith.constant 0 : index
    %7 = vector.load %arg4[%c0_5, %c0_6] : memref<256x128xf32, #tpu.memory_space<vmem>>, vector<256x128xf32>
    %c0_7 = arith.constant 0 : index
    %c0_8 = arith.constant 0 : index
    %8 = vector.load %arg5[%c0_7, %c0_8] : memref<1x128xf32, #tpu.memory_space<vmem>>, vector<1x128xf32>
    %9 = vector.broadcast %8 : vector<1x128xf32> to vector<256x128xf32>
    %10 = arith.mulf %7, %9 : vector<256x128xf32>
    %c0_9 = arith.constant 0 : index
    %c0_10 = arith.constant 0 : index
    %11 = vector.load %arg6[%c0_9, %c0_10] : memref<1x128xf32, #tpu.memory_space<vmem>>, vector<1x128xf32>
    %12 = vector.broadcast %11 : vector<1x128xf32> to vector<256x128xf32>
    %13 = arith.addf %10, %12 : vector<256x128xf32>
    %14 = arith.addf %6, %13 : vector<256x128xf32>
    %cst = arith.constant 0.000000e+00 : f32
    %15 = vector.broadcast %cst : f32 to vector<256x128xf32>
    %16 = arith.maximumf %14, %15 : vector<256x128xf32>
    %c0_11 = arith.constant 0 : index
    %c0_12 = arith.constant 0 : index
    %17 = vector.load %arg7[%c0_11, %c0_12] : memref<256x128xf32, #tpu.memory_space<vmem>>, vector<256x128xf32>
    tpu.vector_store %arg7[%c0_11, %c0_12], %16 {strides = array<i32>} : memref<256x128xf32, #tpu.memory_space<vmem>>, vector<256x128xf32>,
    return
  }
  func.func @transform_0(%arg0: i32) -> (i32, i32) {
    %c0_i32 = arith.constant 0 : i32
    %c0_i32_0 = arith.constant 0 : i32
    return %arg0, %c0_i32 : i32, i32
  }
  func.func @transform_1(%arg0: i32) -> (i32, i32) {
    %c0_i32 = arith.constant 0 : i32
    %c0_i32_0 = arith.constant 0 : i32
    %c0_i32_1 = arith.constant 0 : i32
    return %c0_i32, %c0_i32_0 : i32, i32
  }
  func.func @transform_2(%arg0: i32) -> (i32, i32) {
    %c0_i32 = arith.constant 0 : i32
    %c0_i32_0 = arith.constant 0 : i32
    %c0_i32_1 = arith.constant 0 : i32
    return %c0_i32, %c0_i32_0 : i32, i32
  }
  func.func @transform_3(%arg0: i32) -> (i32, i32) {
    %c0_i32 = arith.constant 0 : i32
    %c0_i32_0 = arith.constant 0 : i32
    return %arg0, %c0_i32 : i32, i32
  }
  func.func @transform_4(%arg0: i32) -> (i32, i32) {
    %c0_i32 = arith.constant 0 : i32
    %c0_i32_0 = arith.constant 0 : i32
    %c0_i32_1 = arith.constant 0 : i32
    return %c0_i32, %c0_i32_0 : i32, i32
  }
  func.func @transform_5(%arg0: i32) -> (i32, i32) {
    %c0_i32 = arith.constant 0 : i32
    %c0_i32_0 = arith.constant 0 : i32
    %c0_i32_1 = arith.constant 0 : i32
    return %c0_i32, %c0_i32_0 : i32, i32
  }
  func.func @transform_6(%arg0: i32) -> (i32, i32) {
    %c0_i32 = arith.constant 0 : i32
    %c0_i32_0 = arith.constant 0 : i32
    return %arg0, %c0_i32 : i32, i32
  }
}

</mosaic_0001>

<bundles_post_ra>
// kernel: _lambda_.4
= control target key start
LH: loop header
LB: loop body
LE: loop exit
PB: predicated region body
PF: predicated region fallthrough
CT: control target
= control target key end

     0   :  { %s933_s15 = smov 0   ;;  %s1196_s0 = inlined_call_operand.vmem [shape: f32[512,128], index: 0, kind: input, shape index: {}]   ;;  %s1197_s1 = inlined_call_operand.vmem [shape: f32[128,128], index: 1, kind: input, shape index: {}]   ;;  %s1198_s2 = inlined_call_operand.vmem [shape: f32[1,128], index: 2, kind: input, shape index: {}]   ;;  %s1199_s3 = inlined_call_operand.vmem [shape: f32[512,128], index: 3, kind: output, shape index: {0}]   ;;  %s1200_s4 = inlined_call_operand.vmem [shape: f32[2,2,128], index: 4, kind: output, shape index: {1}]  }
   0x1 LB: > { %s939_s16 = sadd.s32 4294967295, %s906_s15   ;;  %p723_p0 = scmp.ge.s32.totalorder %s906_s15, 1  ;;  %s906_s15 = sphi %s933_s15, %s15_s15  }
   0x2   : > { %p166_p1 = scmp.lt.s32.totalorder %s906_s15, 3 }
   0x4   : > { %p167_p2 = pnand %p723_p0, %p166_p1 }
   0x5   : > { %s724_s21 = sshll.u32 (!%p167_p2), %s939_s16, 5  ;;  %p208_p4 = scmp.lt.s32.totalorder (!%p167_p2), %s939_s16, 1 }
   0x6   : > { %170 = sbr.rel (%p167_p2) target bundleno = 320 (0x140), region = 32  ;;  %p197_p3 = scmp.lt.s32.totalorder (!%p167_p2), %s724_s21, 63 }
   0xb   : > { %v259_v0 = vld [vmem:[%s1197_s1 + $0x78] sm:$0xff]  ;;  %v258_v1 = vld [vmem:[%s1197_s1 + $0x70] sm:$0xff]  ;;  %v257_v2 = vld [vmem:[%s1197_s1 + $0x68] sm:$0xff]  ;;  %s1202_s21 = smov (!%p197_p3, %s724_s21), 63  ;;  %s1204_s16 = smov (!%p208_p4, %s939_s16), 1 }
   0xc   : > { %780 = vmatprep.subr.mxu0 %v259_v0  ;;  %860 = vmatprep.subr.mxu1 %v259_v0  ;;  %v256_v3 = vld [vmem:[%s1197_s1 + $0x60] sm:$0xff]  ;;  %s725_s26 = sshll.u32 %s1202_s21, 3  ;;  %v255_v4 = vld [vmem:[%s1197_s1 + $0x58] sm:$0xff]  ;;  %v254_v6 = vld [vmem:[%s1197_s1 + $0x50] sm:$0xff]  ;;  %s728_s21 = sshll.u32 %s1204_s16, 1 }
   0xd   : > { %781 = vmatpush3.msra.mxu0 %v259_v0  ;;  %876 = vmatpush3.msra.mxu1 %v259_v0  ;;  %s967_s5 = scalar_lea.vmem %s1196_s0, %s725_s26  ;;  %v253_v7 = vld [vmem:[%s1197_s1 + $0x48] sm:$0xff]  ;;  %v252_v8 = vld [vmem:[%s1197_s1 + $0x40] sm:$0xff]  ;;  %v251_v9 = vld [vmem:[%s1197_s1 + $0x38] sm:$0xff]  ;;  %s1044_s11 = scalar_lea.vmem %s1199_s3, %s725_s26 }
   0xe   : > { %782 = vmatprep.subr.mxu0 %v258_v1  ;;  %861 = vmatprep.subr.mxu1 %v258_v1  ;;  %v212_v5 = vld [vmem:[%s967_s5] sm:$0xff]  ;;  %v250_v10 = vld [vmem:[%s1197_s1 + $0x30] sm:$0xff]  ;;  %v249_v11 = vld [vmem:[%s1197_s1 + $0x28] sm:$0xff]  ;;  %s211_s12 = scalar_lea.vmem %s1200_s4, %s728_s21 }
   0xf   : > { %783 = vmatpush3.msra.mxu0 %v258_v1  ;;  %877 = vmatpush3.msra.mxu1 %v258_v1  ;;  %v248_v12 = vld [vmem:[%s1197_s1 + $0x20] sm:$0xff]  ;;  %v247_v13 = vld [vmem:[%s1197_s1 + $0x18] sm:$0xff]  ;;  %v246_v14 = vld [vmem:[%s1197_s1 + $0x10] sm:$0xff] }
  0x10   : > { %784 = vmatprep.subr.mxu0 %v257_v2  ;;  %862 = vmatprep.subr.mxu1 %v257_v2  ;;  %v245_v15 = vld [vmem:[%s1197_s1 + $0x8] sm:$0xff]  ;;  %v244_v16 = vld [vmem:[%s1197_s1] sm:$0xff]  ;;  %v214_v18 = vld [vmem:[%s967_s5 + $0x10] sm:$0xff] }
  0x11   : > { %785 = vmatpush3.msra.mxu0 %v257_v2  ;;  %878 = vmatpush3.msra.mxu1 %v257_v2  ;;  %v213_v17 = vld [vmem:[%s967_s5 + $0x8] sm:$0xff]  ;;  %v228_v19 = vld [vmem:[%s967_s5 + $0x80] sm:$0xff]  ;;  %v230_v21 = vld [vmem:[%s967_s5 + $0x90] sm:$0xff] }
  0x12   : > { %786 = vmatprep.subr.mxu0 %v256_v3  ;;  %863 = vmatprep.subr.mxu1 %v256_v3  ;;  %v229_v20 = vld [vmem:[%s967_s5 + $0x88] sm:$0xff]  ;;  %v215_v22 = vld [vmem:[%s967_s5 + $0x18] sm:$0xff]  ;;  %v216_v23 = vld [vmem:[%s967_s5 + $0x20] sm:$0xff] }
  0x13   : > { %787 = vmatpush3.msra.mxu0 %v256_v3  ;;  %812 = vmatprep.mubr.f32.mxu0 %v212_v5  ;;  %v231_v24 = vld [vmem:[%s967_s5 + $0x98] sm:$0xff]  ;;  %v232_v25 = vld [vmem:[%s967_s5 + $0xa0] sm:$0xff]  ;;  %v217_v26 = vld [vmem:[%s967_s5 + $0x28] sm:$0xff] }
  0x14   : > { %788 = vmatprep.subr.mxu0 %v255_v4  ;;  %879 = vmatpush3.msra.mxu1 %v256_v3  ;;  %v218_v27 = vld [vmem:[%s967_s5 + $0x30] sm:$0xff]  ;;  %v233_v28 = vld [vmem:[%s967_s5 + $0xa8] sm:$0xff]  ;;  %v219_v30 = vld [vmem:[%s967_s5 + $0x38] sm:$0xff] }
  0x15   : > { %789 = vmatpush3.msra.mxu0 %v255_v4  ;;  %864 = vmatprep.subr.mxu1 %v255_v4  ;;  %v234_v29 = vld [vmem:[%s967_s5 + $0xb0] sm:$0xff]  ;;  %v220_v31 = vld [vmem:[%s967_s5 + $0x40] sm:$0xff]  ;;  %v235_v32 = vld [vmem:[%s967_s5 + $0xb8] sm:$0xff] }
  0x16   : > { %790 = vmatprep.subr.mxu0 %v254_v6  ;;  %880 = vmatpush3.msra.mxu1 %v255_v4  ;;  %v236_v33 = vld [vmem:[%s967_s5 + $0xc0] sm:$0xff]  ;;  %v221_v34 = vld [vmem:[%s967_s5 + $0x48] sm:$0xff]  ;;  %v222_v35 = vld [vmem:[%s967_s5 + $0x50] sm:$0xff] }
  0x17   : > { %791 = vmatpush3.msra.mxu0 %v254_v6  ;;  %865 = vmatprep.subr.mxu1 %v254_v6  ;;  %v237_v36 = vld [vmem:[%s967_s5 + $0xc8] sm:$0xff]  ;;  %v238_v37 = vld [vmem:[%s967_s5 + $0xd0] sm:$0xff]  ;;  %v223_v38 = vld [vmem:[%s967_s5 + $0x58] sm:$0xff] }
  0x18   : > { %792 = vmatprep.subr.mxu0 %v253_v7  ;;  %881 = vmatpush3.msra.mxu1 %v254_v6  ;;  %v224_v39 = vld [vmem:[%s967_s5 + $0x60] sm:$0xff]  ;;  %v239_v40 = vld [vmem:[%s967_s5 + $0xd8] sm:$0xff]  ;;  %v225_v42 = vld [vmem:[%s967_s5 + $0x68] sm:$0xff] }
  0x19   : > { %793 = vmatpush3.msra.mxu0 %v253_v7  ;;  %866 = vmatprep.subr.mxu1 %v253_v7  ;;  %v240_v41 = vld [vmem:[%s967_s5 + $0xe0] sm:$0xff]  ;;  %v226_v43 = vld [vmem:[%s967_s5 + $0x70] sm:$0xff]  ;;  %v241_v44 = vld [vmem:[%s967_s5 + $0xe8] sm:$0xff] }
  0x1a   : > { %794 = vmatprep.subr.mxu0 %v252_v8  ;;  %882 = vmatpush3.msra.mxu1 %v253_v7  ;;  %v242_v45 = vld [vmem:[%s967_s5 + $0xf0] sm:$0xff]  ;;  %v227_v46 = vld [vmem:[%s967_s5 + $0x78] sm:$0xff]  ;;  %v1037_v48 = vld [vmem:[%s1198_s2] ss:$0 sm:$0xff] }
  0x1b   : > { %795 = vmatpush3.msra.mxu0 %v252_v8  ;;  %867 = vmatprep.subr.mxu1 %v252_v8  ;;  %v243_v47 = vld [vmem:[%s967_s5 + $0xf8] sm:$0xff] }
  0x1c   : > { %796 = vmatprep.subr.mxu0 %v251_v9  ;;  %883 = vmatpush3.msra.mxu1 %v252_v8 }
  0x1d   : > { %797 = vmatpush3.msra.mxu0 %v251_v9  ;;  %868 = vmatprep.subr.mxu1 %v251_v9 }
  0x1e   : > { %798 = vmatprep.subr.mxu0 %v250_v10  ;;  %884 = vmatpush3.msra.mxu1 %v251_v9 }
  0x1f   : > { %799 = vmatpush3.msra.mxu0 %v250_v10  ;;  %869 = vmatprep.subr.mxu1 %v250_v10 }
  0x20   : > { %800 = vmatprep.subr.mxu0 %v249_v11  ;;  %885 = vmatpush3.msra.mxu1 %v250_v10 }
  0x21   : > { %801 = vmatpush3.msra.mxu0 %v249_v11  ;;  %870 = vmatprep.subr.mxu1 %v249_v11 }
  0x22   : > { %802 = vmatprep.subr.mxu0 %v248_v12  ;;  %886 = vmatpush3.msra.mxu1 %v249_v11 }
  0x23   : > { %803 = vmatpush3.msra.mxu0 %v248_v12  ;;  %871 = vmatprep.subr.mxu1 %v248_v12 }
  0x24   : > { %804 = vmatprep.subr.mxu0 %v247_v13  ;;  %887 = vmatpush3.msra.mxu1 %v248_v12 }
  0x25   : > { %805 = vmatpush3.msra.mxu0 %v247_v13  ;;  %872 = vmatprep.subr.mxu1 %v247_v13 }
  0x26   : > { %806 = vmatprep.subr.mxu0 %v246_v14  ;;  %888 = vmatpush3.msra.mxu1 %v247_v13 }
  0x27   : > { %807 = vmatpush3.msra.mxu0 %v246_v14  ;;  %873 = vmatprep.subr.mxu1 %v246_v14 }
  0x28   : > { %808 = vmatprep.subr.mxu0 %v245_v15  ;;  %889 = vmatpush3.msra.mxu1 %v246_v14 }
  0x29   : > { %809 = vmatpush3.msra.mxu0 %v245_v15  ;;  %874 = vmatprep.subr.mxu1 %v245_v15 }
  0x2a   : > { %810 = vmatprep.subr.mxu0 %v244_v16  ;;  %890 = vmatpush3.msra.mxu1 %v245_v15 }
  0x2b   : > { %811 = vmatpush3.msra.mxu0 %v244_v16  ;;  %875 = vmatprep.subr.mxu1 %v244_v16 }
  0x2c   : > { %813 = vmatmul.mubr.f32.vlgmr.msra.gmra.mxu0 %v213_v17  ;;  %891 = vmatpush3.msra.mxu1 %v244_v16 }
  0x2d   : > { %815 = vmatprep.mubr.f32.mxu0 %v214_v18  ;;  %836 = vmatprep.mubr.f32.mxu1 %v228_v19 }
  0x2e   : > { %837 = vmatmul.mubr.f32.vlgmr.msra.gmra.mxu1 %v229_v20 }
  0x2f   : > { %839 = vmatprep.mubr.f32.mxu1 %v230_v21 }
  0x30   : > { %816 = vmatmul.mubr.f32.gmra.mxu0 %v215_v22 }
  0x31   : > { %818 = vmatprep.mubr.f32.mxu0 %v216_v23 }
  0x32   : > { %840 = vmatmul.mubr.f32.gmra.mxu1 %v231_v24 }
  0x33   : > { %842 = vmatprep.mubr.f32.mxu1 %v232_v25 }
  0x34   : > { %819 = vmatmul.mubr.f32.gmra.mxu0 %v217_v26 }
  0x35   : > { %821 = vmatprep.mubr.f32.mxu0 %v218_v27 }
  0x36   : > { %843 = vmatmul.mubr.f32.gmra.mxu1 %v233_v28 }
  0x37   : > { %845 = vmatprep.mubr.f32.mxu1 %v234_v29 }
  0x38   : > { %822 = vmatmul.mubr.f32.gmra.mxu0 %v219_v30 }
  0x39   : > { %824 = vmatprep.mubr.f32.mxu0 %v220_v31 }
  0x3a   : > { %846 = vmatmul.mubr.f32.gmra.mxu1 %v235_v32 }
  0x3b   : > { %848 = vmatprep.mubr.f32.mxu1 %v236_v33 }
  0x3c   : > { %825 = vmatmul.mubr.f32.gmra.mxu0 %v221_v34 }
  0x3d   : > { %827 = vmatprep.mubr.f32.mxu0 %v222_v35 }
  0x3e   : > { %849 = vmatmul.mubr.f32.gmra.mxu1 %v237_v36 }
  0x3f   : > { %851 = vmatprep.mubr.f32.mxu1 %v238_v37 }
  0x40   : > { %828 = vmatmul.mubr.f32.gmra.mxu0 %v223_v38 }
  0x41   : > { %830 = vmatprep.mubr.f32.mxu0 %v224_v39 }
  0x42   : > { %852 = vmatmul.mubr.f32.gmra.mxu1 %v239_v40 }
  0x43   : > { %854 = vmatprep.mubr.f32.mxu1 %v240_v41 }
  0x44   : > { %831 = vmatmul.mubr.f32.gmra.mxu0 %v225_v42 }
  0x45   : > { %833 = vmatprep.mubr.f32.mxu0 %v226_v43 }
  0x46   : > { %855 = vmatmul.mubr.f32.gmra.mxu1 %v241_v44 }
  0x47   : > { %857 = vmatprep.mubr.f32.mxu1 %v242_v45 }
  0x48   : > { %834 = vmatmul.mubr.f32.gmra.mxu0 %v227_v46 }
  0x4a   : > { %858 = vmatmul.mubr.f32.gmra.mxu1 %v243_v47 }
  0xec   : > { %v814_v49 = vpop.f32.mrf.mxu0 }
  0xed   : > { %v339_v50 = vadd.f32 %v814_v49, %v1037_v48 }
  0xee   : > { %v333_v51 = vpop.f32.mrf.mxu0  ;;  %v838_v52 = vpop.f32.mrf.mxu1 }
  0xef   : > { %493 = vst [vmem:[%s1044_s11 + $0x8] sm:$0xff] %v339_v50  ;;  %v334_v53 = vadd.f32 %v1037_v48, %v333_v51  ;;  %v1050_v54 = vadd.f32 %v838_v52, %v1037_v48  ;;  %v563_v62 = vmul.f32 %v339_v50, %v339_v50 }
  0xf0   : > { %v817_v55 = vpop.f32.mrf.mxu0  ;;  %v413_v56 = vpop.f32.mrf.mxu1 }
  0xf1   : > { %492 = vst [vmem:[%s1044_s11] sm:$0xff] %v334_v53  ;;  %v562_v57 = vmul.f32 %v334_v53, %v334_v53  ;;  %v349_v58 = vadd.f32 %v817_v55, %v1037_v48  ;;  %509 = vst [vmem:[%s1044_s11 + $0x88] sm:$0xff] %v1050_v54  ;;  %v1057_v60 = vadd.f32 %v1037_v48, %v413_v56 }
  0xf2   : > { %v343_v59 = vpop.f32.mrf.mxu0  ;;  %v841_v61 = vpop.f32.mrf.mxu1  ;;  %v524_v63 = vadd.f32 %v339_v50, %v334_v53 }
  0xf3   : > { %495 = vst [vmem:[%s1044_s11 + $0x18] sm:$0xff] %v349_v58  ;;  %v344_v0 = vadd.f32 %v1037_v48, %v343_v59  ;;  %v1062_v1 = vadd.f32 %v841_v61, %v1037_v48  ;;  %508 = vst [vmem:[%s1044_s11 + $0x80] sm:$0xff] %v1057_v60  ;;  %v594_v4 = vadd.f32 %v563_v62, %v562_v57 }
  0xf4   : > { %v820_v2 = vpop.f32.mrf.mxu0  ;;  %v423_v3 = vpop.f32.mrf.mxu1  ;;  %v565_v11 = vmul.f32 %v349_v58, %v349_v58 }
  0xf5   : > { %494 = vst [vmem:[%s1044_s11 + $0x10] sm:$0xff] %v344_v0  ;;  %v525_v5 = vadd.f32 %v524_v63, %v344_v0  ;;  %v564_v6 = vmul.f32 %v344_v0, %v344_v0  ;;  %v359_v7 = vadd.f32 %v820_v2, %v1037_v48  ;;  %511 = vst [vmem:[%s1044_s11 + $0x98] sm:$0xff] %v1062_v1 }
  0xf6   : > { %v353_v8 = vpop.f32.mrf.mxu0  ;;  %v1071_v9 = vadd.f32 %v1037_v48, %v423_v3  ;;  %v844_v10 = vpop.f32.mrf.mxu1 }
  0xf7   : > { %v595_v12 = vadd.f32 %v594_v4, %v564_v6  ;;  %497 = vst [vmem:[%s1044_s11 + $0x28] sm:$0xff] %v359_v7  ;;  %v354_v13 = vadd.f32 %v1037_v48, %v353_v8  ;;  %v526_v14 = vadd.f32 %v525_v5, %v349_v58  ;;  %v1078_v16 = vadd.f32 %v844_v10, %v1037_v48 }
  0xf8   : > { %v823_v15 = vpop.f32.mrf.mxu0  ;;  %510 = vst [vmem:[%s1044_s11 + $0x90] sm:$0xff] %v1071_v9  ;;  %v433_v17 = vpop.f32.mrf.mxu1  ;;  %v567_v25 = vmul.f32 %v359_v7, %v359_v7 }
  0xf9   : > { %496 = vst [vmem:[%s1044_s11 + $0x20] sm:$0xff] %v354_v13  ;;  %v527_v18 = vadd.f32 %v526_v14, %v354_v13  ;;  %v566_v19 = vmul.f32 %v354_v13, %v354_v13  ;;  %v596_v20 = vadd.f32 %v595_v12, %v565_v11  ;;  %v369_v21 = vadd.f32 %v823_v15, %v1037_v48 }
  0xfa   : > { %v363_v22 = vpop.f32.mrf.mxu0  ;;  %513 = vst [vmem:[%s1044_s11 + $0xa8] sm:$0xff] %v1078_v16  ;;  %v1085_v23 = vadd.f32 %v1037_v48, %v433_v17  ;;  %v847_v24 = vpop.f32.mrf.mxu1 }
  0xfb   : > { %v597_v26 = vadd.f32 %v596_v20, %v566_v19  ;;  %499 = vst [vmem:[%s1044_s11 + $0x38] sm:$0xff] %v369_v21  ;;  %v364_v27 = vadd.f32 %v1037_v48, %v363_v22  ;;  %v528_v28 = vadd.f32 %v527_v18, %v359_v7  ;;  %v1092_v30 = vadd.f32 %v847_v24, %v1037_v48 }
  0xfc   : > { %v826_v29 = vpop.f32.mrf.mxu0  ;;  %512 = vst [vmem:[%s1044_s11 + $0xa0] sm:$0xff] %v1085_v23  ;;  %v443_v31 = vpop.f32.mrf.mxu1  ;;  %v569_v39 = vmul.f32 %v369_v21, %v369_v21 }
  0xfd   : > { %498 = vst [vmem:[%s1044_s11 + $0x30] sm:$0xff] %v364_v27  ;;  %v529_v32 = vadd.f32 %v528_v28, %v364_v27  ;;  %v568_v33 = vmul.f32 %v364_v27, %v364_v27  ;;  %v598_v34 = vadd.f32 %v597_v26, %v567_v25  ;;  %v379_v35 = vadd.f32 %v826_v29, %v1037_v48 }
  0xfe   : > { %v373_v36 = vpop.f32.mrf.mxu0  ;;  %515 = vst [vmem:[%s1044_s11 + $0xb8] sm:$0xff] %v1092_v30  ;;  %v1099_v37 = vadd.f32 %v1037_v48, %v443_v31  ;;  %v850_v38 = vpop.f32.mrf.mxu1 }
  0xff   : > { %v599_v40 = vadd.f32 %v598_v34, %v568_v33  ;;  %501 = vst [vmem:[%s1044_s11 + $0x48] sm:$0xff] %v379_v35  ;;  %v374_v41 = vadd.f32 %v1037_v48, %v373_v36  ;;  %v530_v42 = vadd.f32 %v529_v32, %v369_v21  ;;  %v1106_v44 = vadd.f32 %v850_v38, %v1037_v48 }
 0x100   : > { %v829_v43 = vpop.f32.mrf.mxu0  ;;  %514 = vst [vmem:[%s1044_s11 + $0xb0] sm:$0xff] %v1099_v37  ;;  %v453_v45 = vpop.f32.mrf.mxu1  ;;  %v571_v55 = vmul.f32 %v379_v35, %v379_v35 }
 0x101   : > { %500 = vst [vmem:[%s1044_s11 + $0x40] sm:$0xff] %v374_v41  ;;  %v531_v46 = vadd.f32 %v530_v42, %v374_v41  ;;  %v570_v47 = vmul.f32 %v374_v41, %v374_v41  ;;  %v600_v49 = vadd.f32 %v599_v40, %v569_v39  ;;  %v389_v50 = vadd.f32 %v829_v43, %v1037_v48 }
 0x102   : > { %v383_v51 = vpop.f32.mrf.mxu0  ;;  %517 = vst [vmem:[%s1044_s11 + $0xc8] sm:$0xff] %v1106_v44  ;;  %v1113_v52 = vadd.f32 %v1037_v48, %v453_v45  ;;  %v853_v53 = vpop.f32.mrf.mxu1  ;;  %v578_v40 = vmul.f32 %v1057_v60, %v1057_v60  ;;  %v579_v42 = vmul.f32 %v1050_v54, %v1050_v54 }
 0x103   : > { %v601_v56 = vadd.f32 %v600_v49, %v570_v47  ;;  %503 = vst [vmem:[%s1044_s11 + $0x58] sm:$0xff] %v389_v50  ;;  %v384_v57 = vadd.f32 %v1037_v48, %v383_v51  ;;  %v532_v58 = vadd.f32 %v531_v46, %v379_v35  ;;  %v1120_v61 = vadd.f32 %v853_v53, %v1037_v48 }
 0x104   : > { %v832_v59 = vpop.f32.mrf.mxu0  ;;  %516 = vst [vmem:[%s1044_s11 + $0xc0] sm:$0xff] %v1113_v52  ;;  %v463_v62 = vpop.f32.mrf.mxu1  ;;  %v573_v7 = vmul.f32 %v389_v50, %v389_v50  ;;  %v581_v49 = vmul.f32 %v1062_v1, %v1062_v1  ;;  %v582_v53 = vmul.f32 %v1085_v23, %v1085_v23 }
 0x105   : > { %502 = vst [vmem:[%s1044_s11 + $0x50] sm:$0xff] %v384_v57  ;;  %v533_v63 = vadd.f32 %v532_v58, %v384_v57  ;;  %v572_v0 = vmul.f32 %v384_v57, %v384_v57  ;;  %v602_v2 = vadd.f32 %v601_v56, %v571_v55  ;;  %v399_v3 = vadd.f32 %v832_v59, %v1037_v48 }
 0x106   : > { %v393_v4 = vpop.f32.mrf.mxu0  ;;  %519 = vst [vmem:[%s1044_s11 + $0xd8] sm:$0xff] %v1120_v61  ;;  %v1127_v5 = vadd.f32 %v1037_v48, %v463_v62  ;;  %v856_v6 = vpop.f32.mrf.mxu1  ;;  %v584_v58 = vmul.f32 %v1099_v37, %v1099_v37 }
 0x107   : > { %v603_v8 = vadd.f32 %v602_v2, %v572_v0  ;;  %505 = vst [vmem:[%s1044_s11 + $0x68] sm:$0xff] %v399_v3  ;;  %v394_v10 = vadd.f32 %v1037_v48, %v393_v4  ;;  %v534_v11 = vadd.f32 %v533_v63, %v389_v50  ;;  %v1134_v13 = vadd.f32 %v856_v6, %v1037_v48 }
 0x108   : > { %v835_v12 = vpop.f32.mrf.mxu0  ;;  %518 = vst [vmem:[%s1044_s11 + $0xd0] sm:$0xff] %v1127_v5  ;;  %v473_v14 = vpop.f32.mrf.mxu1  ;;  %v575_v24 = vmul.f32 %v399_v3, %v399_v3  ;;  %v586_v0 = vmul.f32 %v1113_v52, %v1113_v52  ;;  %v588_v6 = vmul.f32 %v1127_v5, %v1127_v5 }
 0x109   : > { %504 = vst [vmem:[%s1044_s11 + $0x60] sm:$0xff] %v394_v10  ;;  %v535_v15 = vadd.f32 %v534_v11, %v394_v10  ;;  %v574_v17 = vmul.f32 %v394_v10, %v394_v10  ;;  %v604_v18 = vadd.f32 %v603_v8, %v573_v7  ;;  %v409_v19 = vadd.f32 %v835_v12, %v1037_v48 }
 0x10a   : > { %v403_v20 = vpop.f32.mrf.mxu0  ;;  %521 = vst [vmem:[%s1044_s11 + $0xe8] sm:$0xff] %v1134_v13  ;;  %v474_v21 = vadd.f32 %v1037_v48, %v473_v14  ;;  %v859_v22 = vpop.f32.mrf.mxu1 }
 0x10b   : > { %v605_v25 = vadd.f32 %v604_v18, %v574_v17  ;;  %507 = vst [vmem:[%s1044_s11 + $0x78] sm:$0xff] %v409_v19  ;;  %v404_v26 = vadd.f32 %v1037_v48, %v403_v20  ;;  %v536_v27 = vadd.f32 %v535_v15, %v399_v3  ;;  %v489_v28 = vadd.f32 %v859_v22, %v1037_v48 }
 0x10c   : > { %520 = vst [vmem:[%s1044_s11 + $0xe0] sm:$0xff] %v474_v21  ;;  %v483_v29 = vpop.f32.mrf.mxu1  ;;  %v577_v35 = vmul.f32 %v409_v19, %v409_v19  ;;  %v590_v11 = vmul.f32 %v474_v21, %v474_v21 }
 0x10d   : > { %506 = vst [vmem:[%s1044_s11 + $0x70] sm:$0xff] %v404_v26  ;;  %v537_v31 = vadd.f32 %v536_v27, %v404_v26  ;;  %v576_v32 = vmul.f32 %v404_v26, %v404_v26  ;;  %v606_v33 = vadd.f32 %v605_v25, %v575_v24  ;;  %v484_v34 = vadd.f32 %v1037_v48, %v483_v29 }
 0x10e   : > { %523 = vst [vmem:[%s1044_s11 + $0xf8] sm:$0xff] %v489_v28  ;;  %v580_v48 = vmul.f32 %v1071_v9, %v1071_v9 }
 0x10f   : > { %v607_v36 = vadd.f32 %v606_v33, %v576_v32  ;;  %v538_v38 = vadd.f32 %v537_v31, %v409_v19  ;;  %522 = vst [vmem:[%s1044_s11 + $0xf0] sm:$0xff] %v484_v34  ;;  %v592_v18 = vmul.f32 %v484_v34, %v484_v34  ;;  %v593_v19 = vmul.f32 %v489_v28, %v489_v28 }
 0x111   : > { %v539_v39 = vadd.f32 %v538_v38, %v1057_v60  ;;  %v608_v41 = vadd.f32 %v607_v36, %v577_v35 }
 0x113   : > { %v609_v43 = vadd.f32 %v608_v41, %v578_v40  ;;  %v540_v45 = vadd.f32 %v539_v39, %v1050_v54  ;;  %v583_v54 = vmul.f32 %v1078_v16, %v1078_v16 }
 0x115   : > { %v541_v46 = vadd.f32 %v540_v45, %v1071_v9  ;;  %v610_v47 = vadd.f32 %v609_v43, %v579_v42 }
 0x117   : > { %v611_v50 = vadd.f32 %v610_v47, %v580_v48  ;;  %v542_v51 = vadd.f32 %v541_v46, %v1062_v1  ;;  %v585_v1 = vmul.f32 %v1092_v30, %v1092_v30 }
 0x119   : > { %v543_v60 = vadd.f32 %v542_v51, %v1085_v23  ;;  %v612_v55 = vadd.f32 %v611_v50, %v581_v49 }
 0x11b   : > { %v613_v56 = vadd.f32 %v612_v55, %v582_v53  ;;  %v544_v57 = vadd.f32 %v543_v60, %v1078_v16  ;;  %v587_v16 = vmul.f32 %v1106_v44, %v1106_v44 }
 0x11d   : > { %v545_v9 = vadd.f32 %v544_v57, %v1099_v37  ;;  %v614_v59 = vadd.f32 %v613_v56, %v583_v54 }
 0x11f   : > { %v615_v62 = vadd.f32 %v614_v59, %v584_v58  ;;  %v546_v63 = vadd.f32 %v545_v9, %v1092_v30  ;;  %v589_v30 = vmul.f32 %v1120_v61, %v1120_v61 }
 0x121   : > { %v547_v23 = vadd.f32 %v546_v63, %v1113_v52  ;;  %v616_v2 = vadd.f32 %v615_v62, %v585_v1 }
 0x123   : > { %v617_v3 = vadd.f32 %v616_v2, %v586_v0  ;;  %v548_v4 = vadd.f32 %v547_v23, %v1106_v44  ;;  %v591_v44 = vmul.f32 %v1134_v13, %v1134_v13 }
 0x125   : > { %v549_v37 = vadd.f32 %v548_v4, %v1127_v5  ;;  %v618_v7 = vadd.f32 %v617_v3, %v587_v16 }
 0x127   : > { %v619_v8 = vadd.f32 %v618_v7, %v588_v6  ;;  %v550_v52 = vadd.f32 %v549_v37, %v1120_v61 }
 0x129   : > { %v551_v10 = vadd.f32 %v550_v52, %v474_v21  ;;  %v620_v12 = vadd.f32 %v619_v8, %v589_v30 }
 0x12b   : > { %v621_v14 = vadd.f32 %v620_v12, %v590_v11  ;;  %v552_v15 = vadd.f32 %v551_v10, %v1134_v13 }
 0x12d   : > { %v553_v17 = vadd.f32 %v552_v15, %v484_v34  ;;  %v622_v5 = vadd.f32 %v621_v14, %v591_v44 }
 0x12f   : > { %v554_v20 = vadd.f32 %v553_v17, %v489_v28  ;;  %v623_v22 = vadd.f32 %v622_v5, %v592_v18 }
 0x131   : > { %v555_v24 = vrot.slane %v554_v20, 4  ;;  %v624_v25 = vadd.f32 %v623_v22, %v593_v19 }
 0x133   : > { %v556_v61 = vadd.f32 %v555_v24, %v554_v20  ;;  %v625_v26 = vrot.slane %v624_v25, 4 }
 0x135   : > { %v557_v21 = vrot.slane %v556_v61, 2  ;;  %v626_v27 = vadd.f32 %v625_v26, %v624_v25 }
 0x137   : > { %v558_v29 = vadd.f32 %v557_v21, %v556_v61  ;;  %v627_v31 = vrot.slane %v626_v27, 2 }
 0x139   : > { %v559_v32 = vrot.slane %v558_v29, 1  ;;  %v628_v33 = vadd.f32 %v627_v31, %v626_v27 }
 0x13b   : > { %v560_v13 = vadd.f32 %v559_v32, %v558_v29  ;;  %v629_v34 = vrot.slane %v628_v33, 1 }
 0x13d   : > { %561 = vst [vmem:[%s211_s12] sm:$0x1] %v560_v13  ;;  %v630_v28 = vadd.f32 %v629_v34, %v628_v33 }
 0x13f   : > { %631 = vst [vmem:[%s211_s12 + $0x1] sm:$0x1] %v630_v28 }
 0x140 PF: > { %s15_s15 = sadd.s32 1, %s906_s15  }
 0x141   : > { %p12_p5 = scmp.ge.s32.totalorder %s15_s15, 4  }
 0x143   :  { %14 = sbr.rel (!%p12_p5) target bundleno = 1 (0x1), region = 74 }

// kernel: _lambda_.7
= control target key start
LH: loop header
LB: loop body
LE: loop exit
PB: predicated region body
PF: predicated region fallthrough
CT: control target
= control target key end

     0   :  { %s729_s21 = smov 0   ;;  %s1004_s0 = inlined_call_operand.vmem [shape: f32[512,128], index: 0, kind: input, shape index: {}]   ;;  %s1005_s1 = inlined_call_operand.vmem [shape: f32[1,128], index: 1, kind: input, shape index: {}]   ;;  %s1006_s2 = inlined_call_operand.vmem [shape: f32[1,128], index: 2, kind: input, shape index: {}]   ;;  %s1007_s3 = inlined_call_operand.vmem [shape: f32[512,128], index: 3, kind: input, shape index: {}]   ;;  %s1008_s4 = inlined_call_operand.vmem [shape: f32[1,128], index: 4, kind: input, shape index: {}]   ;;  %s1009_s5 = inlined_call_operand.vmem [shape: f32[1,128], index: 5, kind: input, shape index: {}]   ;;  %s1010_s6 = inlined_call_operand.vmem [shape: f32[512,128], index: 6, kind: output, shape index: {}]  }
   0x1 LB: > { %s661_s22 = sadd.s32 4294967295, %s692_s21   ;;  %p665_p0 = scmp.ge.s32.totalorder %s692_s21, 1  ;;  %s692_s21 = sphi %s729_s21, %s16_s21  }
   0x2   : > { %p224_p1 = scmp.lt.s32.totalorder %s692_s21, 3 }
   0x4   : > { %p225_p2 = pnand %p665_p0, %p224_p1 }
   0x5   : > { %s666_s23 = sshll.u32 (!%p225_p2), %s661_s22, 5 }
   0x6   : > { %228 = sbr.rel (%p225_p2) target bundleno = 69 (0x45), region = 44  ;;  %p260_p3 = scmp.lt.s32.totalorder (!%p225_p2), %s666_s23, 63 }
   0xb   : > { %s1012_s23 = smov (!%p260_p3, %s666_s23), 63  ;;  %v742_v0 = vld [vmem:[%s1005_s1] ss:$0 sm:$0xff] }
   0xc   : > { %s737_s24 = sshll.u32 %s1012_s23, 3  ;;  %v747_v1 = vld [vmem:[%s1008_s4] ss:$0 sm:$0xff] }
   0xd   : > { %s753_s7 = scalar_lea.vmem %s1004_s0, %s737_s24  ;;  %s759_s10 = scalar_lea.vmem %s1007_s3, %s737_s24  ;;  %v764_v2 = vld [vmem:[%s1006_s2] ss:$0 sm:$0xff] }
   0xe   : > { %v769_v3 = vld [vmem:[%s1009_s5] ss:$0 sm:$0xff]  ;;  %v278_v6 = vld [vmem:[%s753_s7 + $0x8] sm:$0xff]  ;;  %v279_v11 = vld [vmem:[%s753_s7 + $0x10] sm:$0xff]  ;;  %s804_s17 = scalar_lea.vmem %s1010_s6, %s737_s24 }
   0xf   : > { %v277_v4 = vld [vmem:[%s753_s7] sm:$0xff]  ;;  %v317_v9 = vmul.f32 %v742_v0, %v278_v6  ;;  %v388_v10 = vld [vmem:[%s759_s10 + $0x8] sm:$0xff]  ;;  %v389_v12 = vld [vmem:[%s759_s10 + $0x10] sm:$0xff]  ;;  %v318_v14 = vmul.f32 %v742_v0, %v279_v11 }
  0x10   : > { %v387_v5 = vld [vmem:[%s759_s10] sm:$0xff]  ;;  %v316_v7 = vmul.f32 %v742_v0, %v277_v4  ;;  %v427_v13 = vmul.f32 %v747_v1, %v388_v10  ;;  %v428_v15 = vmul.f32 %v747_v1, %v389_v12  ;;  %v280_v16 = vld [vmem:[%s753_s7 + $0x18] sm:$0xff]  ;;  %v282_v24 = vld [vmem:[%s753_s7 + $0x28] sm:$0xff] }
  0x11   : > { %v426_v8 = vmul.f32 %v747_v1, %v387_v5  ;;  %v390_v17 = vld [vmem:[%s759_s10 + $0x18] sm:$0xff]  ;;  %v281_v18 = vld [vmem:[%s753_s7 + $0x20] sm:$0xff]  ;;  %v356_v21 = vadd.f32 %v764_v2, %v317_v9  ;;  %v319_v22 = vmul.f32 %v742_v0, %v280_v16  ;;  %v357_v26 = vadd.f32 %v764_v2, %v318_v14  ;;  %v392_v29 = vld [vmem:[%s759_s10 + $0x28] sm:$0xff] }
  0x12   : > { %v355_v19 = vadd.f32 %v764_v2, %v316_v7  ;;  %v391_v23 = vld [vmem:[%s759_s10 + $0x20] sm:$0xff]  ;;  %v466_v25 = vadd.f32 %v769_v3, %v427_v13  ;;  %v467_v27 = vadd.f32 %v769_v3, %v428_v15  ;;  %v429_v28 = vmul.f32 %v747_v1, %v390_v17  ;;  %v283_v38 = vld [vmem:[%s753_s7 + $0x30] sm:$0xff]  ;;  %v284_v44 = vld [vmem:[%s753_s7 + $0x38] sm:$0xff] }
  0x13   : > { %v465_v20 = vadd.f32 %v769_v3, %v426_v8  ;;  %v358_v31 = vadd.f32 %v764_v2, %v319_v22  ;;  %v320_v32 = vmul.f32 %v742_v0, %v281_v18  ;;  %v430_v33 = vmul.f32 %v747_v1, %v391_v23  ;;  %v393_v39 = vld [vmem:[%s759_s10 + $0x30] sm:$0xff]  ;;  %v394_v45 = vld [vmem:[%s759_s10 + $0x38] sm:$0xff]  ;;  %v285_v46 = vld [vmem:[%s753_s7 + $0x40] sm:$0xff] }
  0x14   : > { %v498_v34 = vadd.f32 %v466_v25, %v356_v21  ;;  %v499_v35 = vadd.f32 %v467_v27, %v357_v26  ;;  %v468_v36 = vadd.f32 %v769_v3, %v429_v28  ;;  %v321_v37 = vmul.f32 %v742_v0, %v282_v24  ;;  %v395_v55 = vld [vmem:[%s759_s10 + $0x40] sm:$0xff]  ;;  %v286_v60 = vld [vmem:[%s753_s7 + $0x48] sm:$0xff]  ;;  %v287_v6 = vld [vmem:[%s753_s7 + $0x50] sm:$0xff] }
  0x15   : > { %v497_v30 = vadd.f32 %v465_v20, %v355_v19  ;;  %v359_v41 = vadd.f32 %v764_v2, %v320_v32  ;;  %v469_v42 = vadd.f32 %v769_v3, %v430_v33  ;;  %v431_v43 = vmul.f32 %v747_v1, %v392_v29  ;;  %v396_v61 = vld [vmem:[%s759_s10 + $0x48] sm:$0xff]  ;;  %v397_v7 = vld [vmem:[%s759_s10 + $0x50] sm:$0xff]  ;;  %v288_v12 = vld [vmem:[%s753_s7 + $0x58] sm:$0xff] }
  0x16   : > { %v530_v47 = vmax.f32 %v498_v34, 0.0  ;;  %v531_v48 = vmax.f32 %v499_v35, 0.0  ;;  %v500_v49 = vadd.f32 %v468_v36, %v358_v31  ;;  %v360_v50 = vadd.f32 %v764_v2, %v321_v37  ;;  %v398_v21 = vld [vmem:[%s759_s10 + $0x58] sm:$0xff]  ;;  %v289_v22 = vld [vmem:[%s753_s7 + $0x60] sm:$0xff]  ;;  %v290_v28 = vld [vmem:[%s753_s7 + $0x68] sm:$0xff] }
  0x17   : > { %v529_v40 = vmax.f32 %v497_v30, 0.0  ;;  %v501_v51 = vadd.f32 %v469_v42, %v359_v41  ;;  %v470_v52 = vadd.f32 %v769_v3, %v431_v43  ;;  %v322_v53 = vmul.f32 %v742_v0, %v283_v38  ;;  %v399_v27 = vld [vmem:[%s759_s10 + $0x60] sm:$0xff]  ;;  %v400_v33 = vld [vmem:[%s759_s10 + $0x68] sm:$0xff]  ;;  %v291_v38 = vld [vmem:[%s753_s7 + $0x70] sm:$0xff] }
  0x18   : > { %v432_v54 = vmul.f32 %v747_v1, %v393_v39  ;;  %562 = vst [vmem:[%s804_s17 + $0x8] sm:$0xff] %v530_v47  ;;  %563 = vst [vmem:[%s804_s17 + $0x10] sm:$0xff] %v531_v48  ;;  %v532_v56 = vmax.f32 %v500_v49, 0.0  ;;  %v323_v57 = vmul.f32 %v742_v0, %v284_v44  ;;  %v433_v58 = vmul.f32 %v747_v1, %v394_v45  ;;  %v401_v43 = vld [vmem:[%s759_s10 + $0x70] sm:$0xff]  ;;  %v292_v44 = vld [vmem:[%s753_s7 + $0x78] sm:$0xff] }
  0x19   : > { %561 = vst [vmem:[%s804_s17] sm:$0xff] %v529_v40  ;;  %v324_v59 = vmul.f32 %v742_v0, %v285_v46  ;;  %v533_v62 = vmax.f32 %v501_v51, 0.0  ;;  %v502_v63 = vadd.f32 %v470_v52, %v360_v50  ;;  %v361_v4 = vadd.f32 %v764_v2, %v322_v53  ;;  %v402_v49 = vld [vmem:[%s759_s10 + $0x78] sm:$0xff]  ;;  %v293_v50 = vld [vmem:[%s753_s7 + $0x80] sm:$0xff] }
  0x1a   : > { %v471_v5 = vadd.f32 %v769_v3, %v432_v54  ;;  %564 = vst [vmem:[%s804_s17 + $0x18] sm:$0xff] %v532_v56  ;;  %v362_v8 = vadd.f32 %v764_v2, %v323_v57  ;;  %v472_v9 = vadd.f32 %v769_v3, %v433_v58  ;;  %v434_v11 = vmul.f32 %v747_v1, %v395_v55 }
  0x1b   : > { %v363_v10 = vadd.f32 %v764_v2, %v324_v59  ;;  %565 = vst [vmem:[%s804_s17 + $0x20] sm:$0xff] %v533_v62  ;;  %v534_v13 = vmax.f32 %v502_v63, 0.0  ;;  %v325_v15 = vmul.f32 %v742_v0, %v286_v60  ;;  %v435_v16 = vmul.f32 %v747_v1, %v396_v61  ;;  %v403_v59 = vld [vmem:[%s759_s10 + $0x80] sm:$0xff] }
  0x1c   : > { %v503_v14 = vadd.f32 %v471_v5, %v361_v4  ;;  %v504_v17 = vadd.f32 %v472_v9, %v362_v8  ;;  %v473_v18 = vadd.f32 %v769_v3, %v434_v11  ;;  %v326_v19 = vmul.f32 %v742_v0, %v287_v6  ;;  %v294_v4 = vld [vmem:[%s753_s7 + $0x88] sm:$0xff]  ;;  %v405_v11 = vld [vmem:[%s759_s10 + $0x90] sm:$0xff] }
  0x1d   : > { %v436_v20 = vmul.f32 %v747_v1, %v397_v7  ;;  %566 = vst [vmem:[%s804_s17 + $0x28] sm:$0xff] %v534_v13  ;;  %v364_v24 = vadd.f32 %v764_v2, %v325_v15  ;;  %v474_v25 = vadd.f32 %v769_v3, %v435_v16  ;;  %v327_v26 = vmul.f32 %v742_v0, %v288_v12  ;;  %v404_v5 = vld [vmem:[%s759_s10 + $0x88] sm:$0xff]  ;;  %v296_v16 = vld [vmem:[%s753_s7 + $0x98] sm:$0xff] }
  0x1e   : > { %v535_v23 = vmax.f32 %v503_v14, 0.0  ;;  %v536_v29 = vmax.f32 %v504_v17, 0.0  ;;  %v505_v30 = vadd.f32 %v473_v18, %v363_v10  ;;  %v365_v31 = vadd.f32 %v764_v2, %v326_v19  ;;  %v295_v10 = vld [vmem:[%s753_s7 + $0x90] sm:$0xff] }
  0x1f   : > { %v475_v32 = vadd.f32 %v769_v3, %v436_v20  ;;  %v506_v34 = vadd.f32 %v474_v25, %v364_v24  ;;  %v366_v35 = vadd.f32 %v764_v2, %v327_v26  ;;  %v437_v36 = vmul.f32 %v747_v1, %v398_v21  ;;  %v406_v25 = vld [vmem:[%s759_s10 + $0x98] sm:$0xff]  ;;  %v297_v26 = vld [vmem:[%s753_s7 + $0xa0] sm:$0xff] }
  0x20   : > { %567 = vst [vmem:[%s804_s17 + $0x30] sm:$0xff] %v535_v23  ;;  %v328_v37 = vmul.f32 %v742_v0, %v289_v22  ;;  %568 = vst [vmem:[%s804_s17 + $0x38] sm:$0xff] %v536_v29  ;;  %v537_v39 = vmax.f32 %v505_v30, 0.0  ;;  %v438_v41 = vmul.f32 %v747_v1, %v399_v27  ;;  %v329_v42 = vmul.f32 %v742_v0, %v290_v28 }
  0x21   : > { %v507_v40 = vadd.f32 %v475_v32, %v365_v31  ;;  %v538_v45 = vmax.f32 %v506_v34, 0.0  ;;  %v476_v46 = vadd.f32 %v769_v3, %v437_v36  ;;  %v439_v48 = vmul.f32 %v747_v1, %v400_v33  ;;  %v407_v31 = vld [vmem:[%s759_s10 + $0xa0] sm:$0xff]  ;;  %v298_v32 = vld [vmem:[%s753_s7 + $0xa8] sm:$0xff] }
  0x22   : > { %v367_v47 = vadd.f32 %v764_v2, %v328_v37  ;;  %569 = vst [vmem:[%s804_s17 + $0x40] sm:$0xff] %v537_v39  ;;  %v477_v52 = vadd.f32 %v769_v3, %v438_v41  ;;  %v368_v53 = vadd.f32 %v764_v2, %v329_v42  ;;  %v330_v54 = vmul.f32 %v742_v0, %v291_v38  ;;  %v408_v37 = vld [vmem:[%s759_s10 + $0xa8] sm:$0xff]  ;;  %v299_v42 = vld [vmem:[%s753_s7 + $0xb0] sm:$0xff] }
  0x23   : > { %v539_v51 = vmax.f32 %v507_v40, 0.0  ;;  %570 = vst [vmem:[%s804_s17 + $0x48] sm:$0xff] %v538_v45  ;;  %v508_v55 = vadd.f32 %v476_v46, %v366_v35  ;;  %v478_v56 = vadd.f32 %v769_v3, %v439_v48  ;;  %v440_v57 = vmul.f32 %v747_v1, %v401_v43  ;;  %v300_v48 = vld [vmem:[%s753_s7 + $0xb8] sm:$0xff] }
  0x24   : > { %v331_v58 = vmul.f32 %v742_v0, %v292_v44  ;;  %v509_v60 = vadd.f32 %v477_v52, %v367_v47  ;;  %v369_v61 = vadd.f32 %v764_v2, %v330_v54  ;;  %v441_v62 = vmul.f32 %v747_v1, %v402_v49  ;;  %v409_v47 = vld [vmem:[%s759_s10 + $0xb0] sm:$0xff]  ;;  %v301_v54 = vld [vmem:[%s753_s7 + $0xc0] sm:$0xff] }
  0x25   : > { %571 = vst [vmem:[%s804_s17 + $0x50] sm:$0xff] %v539_v51  ;;  %v332_v63 = vmul.f32 %v742_v0, %v293_v50  ;;  %v540_v6 = vmax.f32 %v508_v55, 0.0  ;;  %v510_v7 = vadd.f32 %v478_v56, %v368_v53  ;;  %v479_v8 = vadd.f32 %v769_v3, %v440_v57  ;;  %v410_v53 = vld [vmem:[%s759_s10 + $0xb8] sm:$0xff] }
  0x26   : > { %v370_v9 = vadd.f32 %v764_v2, %v331_v58  ;;  %v541_v12 = vmax.f32 %v509_v60, 0.0  ;;  %v480_v13 = vadd.f32 %v769_v3, %v441_v62  ;;  %v442_v15 = vmul.f32 %v747_v1, %v403_v59 }
  0x27   : > { %v371_v14 = vadd.f32 %v764_v2, %v332_v63  ;;  %572 = vst [vmem:[%s804_s17 + $0x58] sm:$0xff] %v540_v6  ;;  %v542_v17 = vmax.f32 %v510_v7, 0.0  ;;  %v511_v18 = vadd.f32 %v479_v8, %v369_v61  ;;  %v333_v19 = vmul.f32 %v742_v0, %v294_v4  ;;  %v411_v63 = vld [vmem:[%s759_s10 + $0xc0] sm:$0xff]  ;;  %v302_v8 = vld [vmem:[%s753_s7 + $0xc8] sm:$0xff] }
  0x28   : > { %v443_v20 = vmul.f32 %v747_v1, %v404_v5  ;;  %573 = vst [vmem:[%s804_s17 + $0x60] sm:$0xff] %v541_v12  ;;  %v512_v21 = vadd.f32 %v480_v13, %v370_v9  ;;  %v481_v22 = vadd.f32 %v769_v3, %v442_v15  ;;  %v334_v23 = vmul.f32 %v742_v0, %v295_v10  ;;  %v412_v9 = vld [vmem:[%s759_s10 + $0xc8] sm:$0xff]  ;;  %v413_v15 = vld [vmem:[%s759_s10 + $0xd0] sm:$0xff] }
  0x29   : > { %v444_v24 = vmul.f32 %v747_v1, %v405_v11  ;;  %574 = vst [vmem:[%s804_s17 + $0x68] sm:$0xff] %v542_v17  ;;  %v543_v27 = vmax.f32 %v511_v18, 0.0  ;;  %v372_v28 = vadd.f32 %v764_v2, %v333_v19  ;;  %v335_v30 = vmul.f32 %v742_v0, %v296_v16 }
  0x2a   : > { %v482_v29 = vadd.f32 %v769_v3, %v443_v20  ;;  %v544_v33 = vmax.f32 %v512_v21, 0.0  ;;  %v513_v34 = vadd.f32 %v481_v22, %v371_v14  ;;  %v373_v35 = vadd.f32 %v764_v2, %v334_v23  ;;  %v303_v14 = vld [vmem:[%s753_s7 + $0xd0] sm:$0xff]  ;;  %v304_v20 = vld [vmem:[%s753_s7 + $0xd8] sm:$0xff] }
  0x2b   : > { %v483_v36 = vadd.f32 %v769_v3, %v444_v24  ;;  %575 = vst [vmem:[%s804_s17 + $0x70] sm:$0xff] %v543_v27  ;;  %v374_v39 = vadd.f32 %v764_v2, %v335_v30  ;;  %v445_v40 = vmul.f32 %v747_v1, %v406_v25  ;;  %v336_v41 = vmul.f32 %v742_v0, %v297_v26  ;;  %v305_v30 = vld [vmem:[%s753_s7 + $0xe0] sm:$0xff] }
  0x2c   : > { %v514_v38 = vadd.f32 %v482_v29, %v372_v28  ;;  %576 = vst [vmem:[%s804_s17 + $0x78] sm:$0xff] %v544_v33  ;;  %v545_v43 = vmax.f32 %v513_v34, 0.0  ;;  %v446_v45 = vmul.f32 %v747_v1, %v407_v31  ;;  %v337_v46 = vmul.f32 %v742_v0, %v298_v32  ;;  %v414_v29 = vld [vmem:[%s759_s10 + $0xd8] sm:$0xff] }
  0x2d   : > { %v515_v44 = vadd.f32 %v483_v36, %v373_v35  ;;  %v484_v50 = vadd.f32 %v769_v3, %v445_v40  ;;  %v375_v51 = vadd.f32 %v764_v2, %v336_v41  ;;  %v447_v52 = vmul.f32 %v747_v1, %v408_v37  ;;  %v415_v35 = vld [vmem:[%s759_s10 + $0xe0] sm:$0xff]  ;;  %v306_v36 = vld [vmem:[%s753_s7 + $0xe8] sm:$0xff] }
  0x2e   : > { %v546_v49 = vmax.f32 %v514_v38, 0.0  ;;  %577 = vst [vmem:[%s804_s17 + $0x80] sm:$0xff] %v545_v43  ;;  %v485_v56 = vadd.f32 %v769_v3, %v446_v45  ;;  %v376_v57 = vadd.f32 %v764_v2, %v337_v46  ;;  %v338_v58 = vmul.f32 %v742_v0, %v299_v42  ;;  %v416_v41 = vld [vmem:[%s759_s10 + $0xe8] sm:$0xff]  ;;  %v307_v46 = vld [vmem:[%s753_s7 + $0xf0] sm:$0xff] }
  0x2f   : > { %v547_v55 = vmax.f32 %v515_v44, 0.0  ;;  %v516_v59 = vadd.f32 %v484_v50, %v374_v39  ;;  %v486_v60 = vadd.f32 %v769_v3, %v447_v52  ;;  %v448_v61 = vmul.f32 %v747_v1, %v409_v47  ;;  %v308_v52 = vld [vmem:[%s753_s7 + $0xf8] sm:$0xff] }
  0x30   : > { %578 = vst [vmem:[%s804_s17 + $0x88] sm:$0xff] %v546_v49  ;;  %v339_v62 = vmul.f32 %v742_v0, %v300_v48  ;;  %v517_v4 = vadd.f32 %v485_v56, %v375_v51  ;;  %v377_v5 = vadd.f32 %v764_v2, %v338_v58  ;;  %v449_v6 = vmul.f32 %v747_v1, %v410_v53  ;;  %v417_v51 = vld [vmem:[%s759_s10 + $0xf0] sm:$0xff] }
  0x31   : > { %579 = vst [vmem:[%s804_s17 + $0x90] sm:$0xff] %v547_v55  ;;  %v340_v7 = vmul.f32 %v742_v0, %v301_v54  ;;  %v548_v10 = vmax.f32 %v516_v59, 0.0  ;;  %v518_v11 = vadd.f32 %v486_v60, %v376_v57  ;;  %v487_v12 = vadd.f32 %v769_v3, %v448_v61  ;;  %v418_v57 = vld [vmem:[%s759_s10 + $0xf8] sm:$0xff] }
  0x32   : > { %v378_v13 = vadd.f32 %v764_v2, %v339_v62  ;;  %v549_v16 = vmax.f32 %v517_v4, 0.0  ;;  %v488_v17 = vadd.f32 %v769_v3, %v449_v6  ;;  %v450_v19 = vmul.f32 %v747_v1, %v411_v63 }
  0x33   : > { %v379_v18 = vadd.f32 %v764_v2, %v340_v7  ;;  %580 = vst [vmem:[%s804_s17 + $0x98] sm:$0xff] %v548_v10  ;;  %v550_v21 = vmax.f32 %v518_v11, 0.0  ;;  %v519_v22 = vadd.f32 %v487_v12, %v377_v5  ;;  %v341_v23 = vmul.f32 %v742_v0, %v302_v8 }
  0x34   : > { %v451_v24 = vmul.f32 %v747_v1, %v412_v9  ;;  %581 = vst [vmem:[%s804_s17 + $0xa0] sm:$0xff] %v549_v16  ;;  %v520_v25 = vadd.f32 %v488_v17, %v378_v13  ;;  %v489_v26 = vadd.f32 %v769_v3, %v450_v19  ;;  %v342_v27 = vmul.f32 %v742_v0, %v303_v14 }
  0x35   : > { %v452_v28 = vmul.f32 %v747_v1, %v413_v15  ;;  %582 = vst [vmem:[%s804_s17 + $0xa8] sm:$0xff] %v550_v21  ;;  %v551_v31 = vmax.f32 %v519_v22, 0.0  ;;  %v380_v32 = vadd.f32 %v764_v2, %v341_v23  ;;  %v343_v34 = vmul.f32 %v742_v0, %v304_v20 }
  0x36   : > { %v490_v33 = vadd.f32 %v769_v3, %v451_v24  ;;  %v552_v37 = vmax.f32 %v520_v25, 0.0  ;;  %v521_v38 = vadd.f32 %v489_v26, %v379_v18  ;;  %v381_v39 = vadd.f32 %v764_v2, %v342_v27 }
  0x37   : > { %v491_v40 = vadd.f32 %v769_v3, %v452_v28  ;;  %583 = vst [vmem:[%s804_s17 + $0xb0] sm:$0xff] %v551_v31  ;;  %v382_v43 = vadd.f32 %v764_v2, %v343_v34  ;;  %v453_v44 = vmul.f32 %v747_v1, %v414_v29  ;;  %v344_v45 = vmul.f32 %v742_v0, %v305_v30 }
  0x38   : > { %v522_v42 = vadd.f32 %v490_v33, %v380_v32  ;;  %584 = vst [vmem:[%s804_s17 + $0xb8] sm:$0xff] %v552_v37  ;;  %v553_v47 = vmax.f32 %v521_v38, 0.0  ;;  %v454_v49 = vmul.f32 %v747_v1, %v415_v35  ;;  %v345_v50 = vmul.f32 %v742_v0, %v306_v36 }
  0x39   : > { %v523_v48 = vadd.f32 %v491_v40, %v381_v39  ;;  %v492_v54 = vadd.f32 %v769_v3, %v453_v44  ;;  %v383_v55 = vadd.f32 %v764_v2, %v344_v45  ;;  %v455_v56 = vmul.f32 %v747_v1, %v416_v41 }
  0x3a   : > { %v554_v53 = vmax.f32 %v522_v42, 0.0  ;;  %585 = vst [vmem:[%s804_s17 + $0xc0] sm:$0xff] %v553_v47  ;;  %v493_v59 = vadd.f32 %v769_v3, %v454_v49  ;;  %v384_v60 = vadd.f32 %v764_v2, %v345_v50  ;;  %v346_v61 = vmul.f32 %v742_v0, %v307_v46 }
  0x3b   : > { %v555_v58 = vmax.f32 %v523_v48, 0.0  ;;  %v524_v62 = vadd.f32 %v492_v54, %v382_v43  ;;  %v494_v63 = vadd.f32 %v769_v3, %v455_v56  ;;  %v456_v4 = vmul.f32 %v747_v1, %v417_v51 }
  0x3c   : > { %586 = vst [vmem:[%s804_s17 + $0xc8] sm:$0xff] %v554_v53  ;;  %v347_v5 = vmul.f32 %v742_v0, %v308_v52  ;;  %v525_v6 = vadd.f32 %v493_v59, %v383_v55  ;;  %v385_v7 = vadd.f32 %v764_v2, %v346_v61  ;;  %v457_v8 = vmul.f32 %v747_v1, %v418_v57 }
  0x3d   : > { %587 = vst [vmem:[%s804_s17 + $0xd0] sm:$0xff] %v555_v58  ;;  %v556_v9 = vmax.f32 %v524_v62, 0.0  ;;  %v526_v10 = vadd.f32 %v494_v63, %v384_v60  ;;  %v495_v11 = vadd.f32 %v769_v3, %v456_v4 }
  0x3e   : > { %v386_v12 = vadd.f32 %v764_v2, %v347_v5  ;;  %v557_v13 = vmax.f32 %v525_v6, 0.0  ;;  %v496_v14 = vadd.f32 %v769_v3, %v457_v8 }
  0x3f   : > { %588 = vst [vmem:[%s804_s17 + $0xd8] sm:$0xff] %v556_v9  ;;  %v558_v0 = vmax.f32 %v526_v10, 0.0  ;;  %v527_v15 = vadd.f32 %v495_v11, %v385_v7 }
  0x40   : > { %589 = vst [vmem:[%s804_s17 + $0xe0] sm:$0xff] %v557_v13  ;;  %v528_v16 = vadd.f32 %v496_v14, %v386_v12 }
  0x41   : > { %590 = vst [vmem:[%s804_s17 + $0xe8] sm:$0xff] %v558_v0  ;;  %v559_v17 = vmax.f32 %v527_v15, 0.0 }
  0x42   : > { %v560_v18 = vmax.f32 %v528_v16, 0.0 }
  0x43   : > { %591 = vst [vmem:[%s804_s17 + $0xf0] sm:$0xff] %v559_v17 }
  0x44   : > { %592 = vst [vmem:[%s804_s17 + $0xf8] sm:$0xff] %v560_v18 }
  0x45 PF: > { %s16_s21 = sadd.s32 1, %s692_s21  }
  0x46   : > { %p13_p4 = scmp.ge.s32.totalorder %s16_s21, 4  }
  0x48   :  { %15 = sbr.rel (!%p13_p4) target bundleno = 1 (0x1), region = 77 }

// kernel: _lambda_.6
= control target key start
LH: loop header
LB: loop body
LE: loop exit
PB: predicated region body
PF: predicated region fallthrough
CT: control target
= control target key end

     0   :  { %s1913_s17 = smov 0   ;;  %s2333_s0 = inlined_call_operand.vmem [shape: f32[512,128], index: 0, kind: input, shape index: {}]   ;;  %s2334_s1 = inlined_call_operand.vmem [shape: f32[1,128], index: 1, kind: input, shape index: {}]   ;;  %s2335_s2 = inlined_call_operand.vmem [shape: f32[1,128], index: 2, kind: input, shape index: {}]   ;;  %s2336_s3 = inlined_call_operand.vmem [shape: f32[128,128], index: 3, kind: input, shape index: {}]   ;;  %s2337_s4 = inlined_call_operand.vmem [shape: f32[1,128], index: 4, kind: input, shape index: {}]   ;;  %s2338_s5 = inlined_call_operand.vmem [shape: f32[512,128], index: 5, kind: input, shape index: {}]   ;;  %s2339_s6 = inlined_call_operand.vmem [shape: f32[128,128], index: 6, kind: input, shape index: {}]   ;;  %s2340_s7 = inlined_call_operand.vmem [shape: f32[1,128], index: 7, kind: input, shape index: {}]   ;;  %s2341_s8 = inlined_call_operand.vmem [shape: f32[512,128], index: 8, kind: output, shape index: {0}]   ;;  %s2342_s9 = inlined_call_operand.vmem [shape: f32[2,2,128], index: 9, kind: output, shape index: {1}]   ;;  %s2343_s10 = inlined_call_operand.vmem [shape: f32[512,128], index: 10, kind: output, shape index: {2}]   ;;  %s2344_s11 = inlined_call_operand.vmem [shape: f32[2,2,128], index: 11, kind: output, shape index: {3}]  }
   0x1 LB: > { %s1919_s18 = sadd.s32 4294967295, %s1851_s17   ;;  %p1564_p0 = scmp.ge.s32.totalorder %s1851_s17, 1  ;;  %s1851_s17 = sphi %s1913_s17, %s22_s17  }
   0x2   : > { %p356_p1 = scmp.lt.s32.totalorder %s1851_s17, 3 }
   0x4   : > { %p357_p2 = pnand %p1564_p0, %p356_p1 }
   0x5   : > { %s1565_s25 = sshll.u32 (!%p357_p2), %s1919_s18, 5  ;;  %p432_p4 = scmp.lt.s32.totalorder (!%p357_p2), %s1919_s18, 1 }
   0x6   : > { %360 = sbr.rel (%p357_p2) target bundleno = 322 (0x142), region = 52  ;;  %p415_p3 = scmp.lt.s32.totalorder (!%p357_p2), %s1565_s25, 63 }
   0xb   : > { %v603_v0 = vld [vmem:[%s2336_s3 + $0x78] sm:$0xff]  ;;  %v602_v2 = vld [vmem:[%s2336_s3 + $0x70] sm:$0xff]  ;;  %v601_v4 = vld [vmem:[%s2336_s3 + $0x68] sm:$0xff]  ;;  %s2346_s25 = smov (!%p415_p3, %s1565_s25), 63  ;;  %s2348_s18 = smov (!%p432_p4, %s1919_s18), 1 }
   0xc   : > { %v1023_v1 = vld [vmem:[%s2339_s6 + $0x78] sm:$0xff]  ;;  %1677 = vmatprep.subr.mxu0 %v603_v0  ;;  %v1022_v3 = vld [vmem:[%s2339_s6 + $0x70] sm:$0xff]  ;;  %v1021_v5 = vld [vmem:[%s2339_s6 + $0x68] sm:$0xff]  ;;  %s1966_s13 = sshll.u32 %s2346_s25, 3 }
   0xd   : > { %1757 = vmatprep.subr.mxu1 %v1023_v1  ;;  %1678 = vmatpush3.msra.mxu0 %v603_v0  ;;  %v600_v6 = vld [vmem:[%s2336_s3 + $0x60] sm:$0xff]  ;;  %v599_v8 = vld [vmem:[%s2336_s3 + $0x58] sm:$0xff]  ;;  %v598_v10 = vld [vmem:[%s2336_s3 + $0x50] sm:$0xff]  ;;  %s1984_s26 = scalar_lea.vmem %s2333_s0, %s1966_s13  ;;  %s2047_s27 = scalar_lea.vmem %s2338_s5, %s1966_s13 }
   0xe   : > { %1758 = vmatpush3.msra.mxu1 %v1023_v1  ;;  %1679 = vmatprep.subr.mxu0 %v602_v2  ;;  %v1020_v7 = vld [vmem:[%s2339_s6 + $0x60] sm:$0xff]  ;;  %v1019_v9 = vld [vmem:[%s2339_s6 + $0x58] sm:$0xff]  ;;  %v1018_v11 = vld [vmem:[%s2339_s6 + $0x50] sm:$0xff]  ;;  %s2186_s21 = scalar_lea.vmem %s2341_s8, %s1966_s13  ;;  %s2192_s23 = scalar_lea.vmem %s2343_s10, %s1966_s13 }
   0xf   : > { %1759 = vmatprep.subr.mxu1 %v1022_v3  ;;  %1680 = vmatpush3.msra.mxu0 %v602_v2  ;;  %v597_v12 = vld [vmem:[%s2336_s3 + $0x48] sm:$0xff]  ;;  %v596_v14 = vld [vmem:[%s2336_s3 + $0x40] sm:$0xff]  ;;  %v595_v16 = vld [vmem:[%s2336_s3 + $0x38] sm:$0xff]  ;;  %s1571_s13 = sshll.u32 %s2348_s18, 1 }
  0x10   : > { %1760 = vmatpush3.msra.mxu1 %v1022_v3  ;;  %1681 = vmatprep.subr.mxu0 %v601_v4  ;;  %v1017_v13 = vld [vmem:[%s2339_s6 + $0x48] sm:$0xff]  ;;  %v1016_v15 = vld [vmem:[%s2339_s6 + $0x40] sm:$0xff]  ;;  %v1015_v17 = vld [vmem:[%s2339_s6 + $0x38] sm:$0xff]  ;;  %s435_s28 = scalar_lea.vmem %s2342_s9, %s1571_s13  ;;  %s445_s12 = scalar_lea.vmem %s2344_s11, %s1571_s13 }
  0x11   : > { %1761 = vmatprep.subr.mxu1 %v1021_v5  ;;  %1682 = vmatpush3.msra.mxu0 %v601_v4  ;;  %v594_v18 = vld [vmem:[%s2336_s3 + $0x30] sm:$0xff]  ;;  %v446_v20 = vld [vmem:[%s1984_s26] sm:$0xff]  ;;  %v593_v22 = vld [vmem:[%s2336_s3 + $0x28] sm:$0xff] }
  0x12   : > { %1762 = vmatpush3.msra.mxu1 %v1021_v5  ;;  %1683 = vmatprep.subr.mxu0 %v600_v6  ;;  %v1014_v19 = vld [vmem:[%s2339_s6 + $0x30] sm:$0xff]  ;;  %v1996_v21 = vld [vmem:[%s2334_s1] ss:$0 sm:$0xff]  ;;  %v1013_v23 = vld [vmem:[%s2339_s6 + $0x28] sm:$0xff] }
  0x13   : > { %1763 = vmatprep.subr.mxu1 %v1020_v7  ;;  %1684 = vmatpush3.msra.mxu0 %v600_v6  ;;  %v447_v24 = vld [vmem:[%s1984_s26 + $0x8] sm:$0xff]  ;;  %v592_v25 = vld [vmem:[%s2336_s3 + $0x20] sm:$0xff]  ;;  %v485_v27 = vmul.f32 %v1996_v21, %v446_v20  ;;  %v448_v28 = vld [vmem:[%s1984_s26 + $0x10] sm:$0xff] }
  0x14   : > { %1764 = vmatpush3.msra.mxu1 %v1020_v7  ;;  %1685 = vmatprep.subr.mxu0 %v599_v8  ;;  %v1012_v26 = vld [vmem:[%s2339_s6 + $0x20] sm:$0xff]  ;;  %v591_v30 = vld [vmem:[%s2336_s3 + $0x18] sm:$0xff]  ;;  %v486_v32 = vmul.f32 %v1996_v21, %v447_v24  ;;  %v487_v33 = vmul.f32 %v1996_v21, %v448_v28  ;;  %v590_v35 = vld [vmem:[%s2336_s3 + $0x10] sm:$0xff] }
  0x15   : > { %1765 = vmatprep.subr.mxu1 %v1019_v9  ;;  %1686 = vmatpush3.msra.mxu0 %v599_v8  ;;  %v2016_v29 = vld [vmem:[%s2335_s2] ss:$0 sm:$0xff]  ;;  %v1011_v31 = vld [vmem:[%s2339_s6 + $0x18] sm:$0xff]  ;;  %v1010_v36 = vld [vmem:[%s2339_s6 + $0x10] sm:$0xff] }
  0x16   : > { %1766 = vmatpush3.msra.mxu1 %v1019_v9  ;;  %1687 = vmatprep.subr.mxu0 %v598_v10  ;;  %v449_v34 = vld [vmem:[%s1984_s26 + $0x18] sm:$0xff]  ;;  %v524_v37 = vadd.f32 %v2016_v29, %v485_v27  ;;  %v450_v38 = vld [vmem:[%s1984_s26 + $0x20] sm:$0xff]  ;;  %v589_v39 = vld [vmem:[%s2336_s3 + $0x8] sm:$0xff]  ;;  %v525_v41 = vadd.f32 %v2016_v29, %v486_v32  ;;  %v526_v43 = vadd.f32 %v2016_v29, %v487_v33 }
  0x17   : > { %1767 = vmatprep.subr.mxu1 %v1018_v11  ;;  %1688 = vmatpush3.msra.mxu0 %v598_v10  ;;  %v1009_v40 = vld [vmem:[%s2339_s6 + $0x8] sm:$0xff]  ;;  %v488_v42 = vmul.f32 %v1996_v21, %v449_v34  ;;  %v489_v44 = vmul.f32 %v1996_v21, %v450_v38  ;;  %v588_v46 = vld [vmem:[%s2336_s3] sm:$0xff]  ;;  %v452_v49 = vld [vmem:[%s1984_s26 + $0x30] sm:$0xff] }
  0x18   : > { %1768 = vmatpush3.msra.mxu1 %v1018_v11  ;;  %1689 = vmatprep.subr.mxu0 %v597_v12  ;;  %v451_v45 = vld [vmem:[%s1984_s26 + $0x28] sm:$0xff]  ;;  %v1008_v47 = vld [vmem:[%s2339_s6] sm:$0xff]  ;;  %v556_v48 = vmax.f32 %v524_v37, 0.0  ;;  %v557_v51 = vmax.f32 %v525_v41, 0.0  ;;  %v558_v55 = vmax.f32 %v526_v43, 0.0  ;;  %v491_v57 = vmul.f32 %v1996_v21, %v452_v49  ;;  %v453_v58 = vld [vmem:[%s1984_s26 + $0x38] sm:$0xff] }
  0x19   : > { %1769 = vmatprep.subr.mxu1 %v1017_v13  ;;  %1690 = vmatpush3.msra.mxu0 %v597_v12  ;;  %v976_v50 = vld [vmem:[%s2047_s27] sm:$0xff]  ;;  %v527_v52 = vadd.f32 %v2016_v29, %v488_v42  ;;  %v490_v53 = vmul.f32 %v1996_v21, %v451_v45  ;;  %v977_v54 = vld [vmem:[%s2047_s27 + $0x8] sm:$0xff]  ;;  %v528_v56 = vadd.f32 %v2016_v29, %v489_v44  ;;  %v978_v59 = vld [vmem:[%s2047_s27 + $0x10] sm:$0xff] }
  0x1a   : > { %1770 = vmatpush3.msra.mxu1 %v1017_v13  ;;  %1691 = vmatprep.subr.mxu0 %v596_v14  ;;  %v454_v60 = vld [vmem:[%s1984_s26 + $0x40] sm:$0xff]  ;;  %v492_v63 = vmul.f32 %v1996_v21, %v453_v58  ;;  %v979_v0 = vld [vmem:[%s2047_s27 + $0x18] sm:$0xff]  ;;  %v530_v2 = vadd.f32 %v2016_v29, %v491_v57  ;;  %v455_v4 = vld [vmem:[%s1984_s26 + $0x48] sm:$0xff] }
  0x1b   : > { %1771 = vmatprep.subr.mxu1 %v1016_v15  ;;  %1692 = vmatpush3.msra.mxu0 %v596_v14  ;;  %v559_v61 = vmax.f32 %v527_v52, 0.0  ;;  %v529_v62 = vadd.f32 %v2016_v29, %v490_v53  ;;  %v560_v1 = vmax.f32 %v528_v56, 0.0  ;;  %v493_v3 = vmul.f32 %v1996_v21, %v454_v60  ;;  %v980_v5 = vld [vmem:[%s2047_s27 + $0x20] sm:$0xff]  ;;  %v456_v6 = vld [vmem:[%s1984_s26 + $0x50] sm:$0xff]  ;;  %v981_v10 = vld [vmem:[%s2047_s27 + $0x28] sm:$0xff] }
  0x1c   : > { %1772 = vmatpush3.msra.mxu1 %v1016_v15  ;;  %1693 = vmatprep.subr.mxu0 %v595_v16  ;;  %v531_v8 = vadd.f32 %v2016_v29, %v492_v63  ;;  %v494_v9 = vmul.f32 %v1996_v21, %v455_v4  ;;  %v562_v11 = vmax.f32 %v530_v2, 0.0  ;;  %v495_v13 = vmul.f32 %v1996_v21, %v456_v6  ;;  %v457_v14 = vld [vmem:[%s1984_s26 + $0x58] sm:$0xff]  ;;  %v982_v15 = vld [vmem:[%s2047_s27 + $0x30] sm:$0xff]  ;;  %v985_v32 = vld [vmem:[%s2047_s27 + $0x48] sm:$0xff] }
  0x1d   : > { %1773 = vmatprep.subr.mxu1 %v1015_v17  ;;  %1694 = vmatpush3.msra.mxu0 %v595_v16  ;;  %v561_v7 = vmax.f32 %v529_v62, 0.0  ;;  %v532_v12 = vadd.f32 %v2016_v29, %v493_v3  ;;  %v458_v16 = vld [vmem:[%s1984_s26 + $0x60] sm:$0xff]  ;;  %v983_v20 = vld [vmem:[%s2047_s27 + $0x38] sm:$0xff]  ;;  %v460_v27 = vld [vmem:[%s1984_s26 + $0x70] sm:$0xff] }
  0x1e   : > { %1774 = vmatpush3.msra.mxu1 %v1015_v17  ;;  %1695 = vmatprep.subr.mxu0 %v594_v18  ;;  %v563_v17 = vmax.f32 %v531_v8, 0.0  ;;  %v497_v24 = vmul.f32 %v1996_v21, %v458_v16  ;;  %v986_v37 = vld [vmem:[%s2047_s27 + $0x50] sm:$0xff]  ;;  %v462_v38 = vld [vmem:[%s1984_s26 + $0x80] sm:$0xff]  ;;  %v987_v42 = vld [vmem:[%s2047_s27 + $0x58] sm:$0xff] }
  0x1f   : > { %1775 = vmatprep.subr.mxu1 %v1014_v19  ;;  %1696 = vmatpush3.msra.mxu0 %v594_v18  ;;  %v533_v18 = vadd.f32 %v2016_v29, %v494_v9  ;;  %v501_v45 = vmul.f32 %v1996_v21, %v462_v38  ;;  %v989_v52 = vld [vmem:[%s2047_s27 + $0x68] sm:$0xff]  ;;  %v465_v56 = vld [vmem:[%s1984_s26 + $0x98] sm:$0xff]  ;;  %v990_v57 = vld [vmem:[%s2047_s27 + $0x70] sm:$0xff] }
  0x20   : > { %1776 = vmatpush3.msra.mxu1 %v1014_v19  ;;  %1697 = vmatprep.subr.mxu0 %v593_v22  ;;  %v496_v19 = vmul.f32 %v1996_v21, %v457_v14  ;;  %v536_v34 = vadd.f32 %v2016_v29, %v497_v24  ;;  %v466_v58 = vld [vmem:[%s1984_s26 + $0xa0] sm:$0xff]  ;;  %v991_v62 = vld [vmem:[%s2047_s27 + $0x78] sm:$0xff]  ;;  %v467_v2 = vld [vmem:[%s1984_s26 + $0xa8] sm:$0xff] }
  0x21   : > { %1777 = vmatprep.subr.mxu1 %v1013_v23  ;;  %1698 = vmatpush3.msra.mxu0 %v593_v22  ;;  %v564_v22 = vmax.f32 %v532_v12, 0.0  ;;  %v565_v28 = vmax.f32 %v533_v18, 0.0  ;;  %v992_v3 = vld [vmem:[%s2047_s27 + $0x80] sm:$0xff]  ;;  %v468_v4 = vld [vmem:[%s1984_s26 + $0xb0] sm:$0xff]  ;;  %v993_v8 = vld [vmem:[%s2047_s27 + $0x88] sm:$0xff] }
  0x22   : > { %1778 = vmatpush3.msra.mxu1 %v1013_v23  ;;  %1699 = vmatprep.subr.mxu0 %v592_v25  ;;  %v534_v23 = vadd.f32 %v2016_v29, %v495_v13  ;;  %v568_v43 = vmax.f32 %v536_v34, 0.0  ;;  %v469_v12 = vld [vmem:[%s1984_s26 + $0xb8] sm:$0xff]  ;;  %v994_v13 = vld [vmem:[%s2047_s27 + $0x90] sm:$0xff]  ;;  %v470_v14 = vld [vmem:[%s1984_s26 + $0xc0] sm:$0xff] }
  0x23   : > { %1779 = vmatprep.subr.mxu1 %v1012_v26  ;;  %1700 = vmatpush3.msra.mxu0 %v592_v25  ;;  %v459_v25 = vld [vmem:[%s1984_s26 + $0x68] sm:$0xff]  ;;  %v995_v18 = vld [vmem:[%s2047_s27 + $0x98] sm:$0xff]  ;;  %v996_v24 = vld [vmem:[%s2047_s27 + $0xa0] sm:$0xff] }
  0x24   : > { %1780 = vmatpush3.msra.mxu1 %v1012_v26  ;;  %1701 = vmatprep.subr.mxu0 %v591_v30  ;;  %v984_v26 = vld [vmem:[%s2047_s27 + $0x40] sm:$0xff]  ;;  %v566_v33 = vmax.f32 %v534_v23, 0.0  ;;  %v471_v23 = vld [vmem:[%s1984_s26 + $0xc8] sm:$0xff]  ;;  %v473_v34 = vld [vmem:[%s1984_s26 + $0xd8] sm:$0xff] }
  0x25   : > { %1781 = vmatprep.subr.mxu1 %v1011_v31  ;;  %1702 = vmatpush3.msra.mxu0 %v591_v30  ;;  %v535_v30 = vadd.f32 %v2016_v29, %v496_v19 }
  0x26   : > { %1782 = vmatpush3.msra.mxu1 %v1011_v31  ;;  %1703 = vmatprep.subr.mxu0 %v590_v35  ;;  %v498_v31 = vmul.f32 %v1996_v21, %v459_v25  ;;  %v472_v25 = vld [vmem:[%s1984_s26 + $0xd0] sm:$0xff] }
  0x27   : > { %1783 = vmatprep.subr.mxu1 %v1010_v36  ;;  %1704 = vmatpush3.msra.mxu0 %v590_v35  ;;  %v499_v35 = vmul.f32 %v1996_v21, %v460_v27 }
  0x28   : > { %1784 = vmatpush3.msra.mxu1 %v1010_v36  ;;  %1705 = vmatprep.subr.mxu0 %v589_v39  ;;  %v461_v36 = vld [vmem:[%s1984_s26 + $0x78] sm:$0xff] }
  0x29   : > { %1785 = vmatprep.subr.mxu1 %v1009_v40  ;;  %1706 = vmatpush3.msra.mxu0 %v589_v39  ;;  %v567_v39 = vmax.f32 %v535_v30, 0.0  ;;  %v500_v41 = vmul.f32 %v1996_v21, %v461_v36  ;;  %v538_v44 = vadd.f32 %v2016_v29, %v499_v35  ;;  %v997_v30 = vld [vmem:[%s2047_s27 + $0xa8] sm:$0xff]  ;;  %v998_v35 = vld [vmem:[%s2047_s27 + $0xb0] sm:$0xff]  ;;  %v474_v36 = vld [vmem:[%s1984_s26 + $0xe0] sm:$0xff] }
  0x2a   : > { %1786 = vmatpush3.msra.mxu1 %v1009_v40  ;;  %1707 = vmatprep.subr.mxu0 %v588_v46  ;;  %v537_v40 = vadd.f32 %v2016_v29, %v498_v31 }
  0x2b   : > { %1787 = vmatprep.subr.mxu1 %v1008_v47  ;;  %1708 = vmatpush3.msra.mxu0 %v588_v46  ;;  %v463_v46 = vld [vmem:[%s1984_s26 + $0x88] sm:$0xff]  ;;  %v570_v53 = vmax.f32 %v538_v44, 0.0 }
  0x2c   : > { %1709 = vmatprep.mubr.f32.mxu0 %v556_v48  ;;  %1788 = vmatpush3.msra.mxu1 %v1008_v47  ;;  %v988_v47 = vld [vmem:[%s2047_s27 + $0x60] sm:$0xff]  ;;  %v464_v48 = vld [vmem:[%s1984_s26 + $0x90] sm:$0xff]  ;;  %v569_v49 = vmax.f32 %v537_v40, 0.0  ;;  %v999_v40 = vld [vmem:[%s2047_s27 + $0xb8] sm:$0xff] }
  0x2d   : > { %1789 = vmatprep.mubr.f32.mxu1 %v976_v50  ;;  %1710 = vmatmul.mubr.f32.vlgmr.msra.gmra.mxu0 %v557_v51  ;;  %v539_v50 = vadd.f32 %v2016_v29, %v500_v41  ;;  %v502_v51 = vmul.f32 %v1996_v21, %v463_v46  ;;  %v475_v44 = vld [vmem:[%s1984_s26 + $0xe8] sm:$0xff]  ;;  %v476_v46 = vld [vmem:[%s1984_s26 + $0xf0] sm:$0xff] }
  0x2e   : > { %1790 = vmatmul.mubr.f32.vlgmr.msra.gmra.mxu1 %v977_v54  ;;  %1712 = vmatprep.mubr.f32.mxu0 %v558_v55  ;;  %v540_v54 = vadd.f32 %v2016_v29, %v501_v45  ;;  %v503_v55 = vmul.f32 %v1996_v21, %v464_v48  ;;  %v1000_v45 = vld [vmem:[%s2047_s27 + $0xc0] sm:$0xff] }
  0x2f   : > { %1792 = vmatprep.mubr.f32.mxu1 %v978_v59  ;;  %v571_v59 = vmax.f32 %v539_v50, 0.0  ;;  %v541_v60 = vadd.f32 %v2016_v29, %v502_v51  ;;  %v1001_v50 = vld [vmem:[%s2047_s27 + $0xc8] sm:$0xff] }
  0x30   : > { %v572_v63 = vmax.f32 %v540_v54, 0.0  ;;  %v477_v54 = vld [vmem:[%s1984_s26 + $0xf8] sm:$0xff] }
  0x31   : > { %1713 = vmatmul.mubr.f32.gmra.mxu0 %v559_v61  ;;  %v504_v61 = vmul.f32 %v1996_v21, %v465_v56 }
  0x32   : > { %1793 = vmatmul.mubr.f32.gmra.mxu1 %v979_v0  ;;  %1715 = vmatprep.mubr.f32.mxu0 %v560_v1  ;;  %v542_v0 = vadd.f32 %v2016_v29, %v503_v55  ;;  %v505_v1 = vmul.f32 %v1996_v21, %v466_v58  ;;  %v1002_v55 = vld [vmem:[%s2047_s27 + $0xd0] sm:$0xff]  ;;  %v516_v58 = vmul.f32 %v1996_v21, %v477_v54 }
  0x33   : > { %1795 = vmatprep.mubr.f32.mxu1 %v980_v5  ;;  %v573_v5 = vmax.f32 %v541_v60, 0.0  ;;  %v543_v6 = vadd.f32 %v2016_v29, %v504_v61 }
  0x34   : > { %v574_v9 = vmax.f32 %v542_v0, 0.0  ;;  %v555_v0 = vadd.f32 %v2016_v29, %v516_v58 }
  0x35   : > { %1716 = vmatmul.mubr.f32.gmra.mxu0 %v561_v7  ;;  %v506_v7 = vmul.f32 %v1996_v21, %v467_v2 }
  0x36   : > { %1796 = vmatmul.mubr.f32.gmra.mxu1 %v981_v10  ;;  %1718 = vmatprep.mubr.f32.mxu0 %v562_v11  ;;  %v544_v10 = vadd.f32 %v2016_v29, %v505_v1  ;;  %v507_v11 = vmul.f32 %v1996_v21, %v468_v4  ;;  %v1005_v1 = vld [vmem:[%s2047_s27 + $0xe8] sm:$0xff]  ;;  %v1007_v4 = vld [vmem:[%s2047_s27 + $0xf8] sm:$0xff] }
  0x37   : > { %1798 = vmatprep.mubr.f32.mxu1 %v982_v15  ;;  %v575_v15 = vmax.f32 %v543_v6, 0.0  ;;  %v545_v16 = vadd.f32 %v2016_v29, %v506_v7 }
  0x38   : > { %v576_v19 = vmax.f32 %v544_v10, 0.0 }
  0x39   : > { %1719 = vmatmul.mubr.f32.gmra.mxu0 %v563_v17  ;;  %v508_v17 = vmul.f32 %v1996_v21, %v469_v12 }
  0x3a   : > { %1799 = vmatmul.mubr.f32.gmra.mxu1 %v983_v20  ;;  %1721 = vmatprep.mubr.f32.mxu0 %v564_v22  ;;  %v546_v20 = vadd.f32 %v2016_v29, %v507_v11  ;;  %v509_v22 = vmul.f32 %v1996_v21, %v470_v14 }
  0x3b   : > { %1801 = vmatprep.mubr.f32.mxu1 %v984_v26  ;;  %v577_v26 = vmax.f32 %v545_v16, 0.0  ;;  %v547_v27 = vadd.f32 %v2016_v29, %v508_v17 }
  0x3c   : > { %v578_v31 = vmax.f32 %v546_v20, 0.0 }
  0x3d   : > { %1722 = vmatmul.mubr.f32.gmra.mxu0 %v565_v28  ;;  %v510_v28 = vmul.f32 %v1996_v21, %v471_v23 }
  0x3e   : > { %1802 = vmatmul.mubr.f32.gmra.mxu1 %v985_v32  ;;  %1724 = vmatprep.mubr.f32.mxu0 %v566_v33  ;;  %v548_v32 = vadd.f32 %v2016_v29, %v509_v22  ;;  %v511_v33 = vmul.f32 %v1996_v21, %v472_v25 }
  0x3f   : > { %1804 = vmatprep.mubr.f32.mxu1 %v986_v37  ;;  %v579_v37 = vmax.f32 %v547_v27, 0.0  ;;  %v549_v38 = vadd.f32 %v2016_v29, %v510_v28 }
  0x40   : > { %v580_v41 = vmax.f32 %v548_v32, 0.0 }
  0x41   : > { %1725 = vmatmul.mubr.f32.gmra.mxu0 %v567_v39  ;;  %v512_v39 = vmul.f32 %v1996_v21, %v473_v34 }
  0x42   : > { %1805 = vmatmul.mubr.f32.gmra.mxu1 %v987_v42  ;;  %1727 = vmatprep.mubr.f32.mxu0 %v568_v43  ;;  %v550_v42 = vadd.f32 %v2016_v29, %v511_v33  ;;  %v513_v43 = vmul.f32 %v1996_v21, %v474_v36 }
  0x43   : > { %1807 = vmatprep.mubr.f32.mxu1 %v988_v47  ;;  %v581_v47 = vmax.f32 %v549_v38, 0.0  ;;  %v551_v48 = vadd.f32 %v2016_v29, %v512_v39 }
  0x44   : > { %v582_v51 = vmax.f32 %v550_v42, 0.0 }
  0x45   : > { %1728 = vmatmul.mubr.f32.gmra.mxu0 %v569_v49  ;;  %v514_v49 = vmul.f32 %v1996_v21, %v475_v44  ;;  %v583_v56 = vmax.f32 %v551_v48, 0.0 }
  0x46   : > { %1808 = vmatmul.mubr.f32.gmra.mxu1 %v989_v52  ;;  %1730 = vmatprep.mubr.f32.mxu0 %v570_v53  ;;  %v552_v52 = vadd.f32 %v2016_v29, %v513_v43  ;;  %v515_v53 = vmul.f32 %v1996_v21, %v476_v46  ;;  %v1006_v21 = vld [vmem:[%s2047_s27 + $0xf0] sm:$0xff] }
  0x47   : > { %1810 = vmatprep.mubr.f32.mxu1 %v990_v57  ;;  %v553_v57 = vadd.f32 %v2016_v29, %v514_v49 }
  0x48   : > { %v584_v60 = vmax.f32 %v552_v52, 0.0  ;;  %v554_v61 = vadd.f32 %v2016_v29, %v515_v53  ;;  %v2180_v29 = vld [vmem:[%s2340_s7] ss:$0 sm:$0xff] }
  0x49   : > { %1731 = vmatmul.mubr.f32.gmra.mxu0 %v571_v59  ;;  %v1003_v59 = vld [vmem:[%s2047_s27 + $0xd8] sm:$0xff] }
  0x4a   : > { %1811 = vmatmul.mubr.f32.gmra.mxu1 %v991_v62  ;;  %1733 = vmatprep.mubr.f32.mxu0 %v572_v63  ;;  %v1004_v62 = vld [vmem:[%s2047_s27 + $0xe0] sm:$0xff]  ;;  %v585_v63 = vmax.f32 %v553_v57, 0.0  ;;  %v586_v2 = vmax.f32 %v554_v61, 0.0 }
  0x4b   : > { %1813 = vmatprep.mubr.f32.mxu1 %v992_v3  ;;  %v587_v3 = vmax.f32 %v555_v0, 0.0 }
  0x4d   : > { %1734 = vmatmul.mubr.f32.gmra.mxu0 %v573_v5  ;;  %v2175_v5 = vld [vmem:[%s2337_s4] ss:$0 sm:$0xff] }
  0x4e   : > { %1814 = vmatmul.mubr.f32.gmra.mxu1 %v993_v8  ;;  %1736 = vmatprep.mubr.f32.mxu0 %v574_v9 }
  0x4f   : > { %1816 = vmatprep.mubr.f32.mxu1 %v994_v13 }
  0x51   : > { %1737 = vmatmul.mubr.f32.gmra.mxu0 %v575_v15 }
  0x52   : > { %1817 = vmatmul.mubr.f32.gmra.mxu1 %v995_v18  ;;  %1739 = vmatprep.mubr.f32.mxu0 %v576_v19 }
  0x53   : > { %1819 = vmatprep.mubr.f32.mxu1 %v996_v24 }
  0x55   : > { %1740 = vmatmul.mubr.f32.gmra.mxu0 %v577_v26 }
  0x56   : > { %1820 = vmatmul.mubr.f32.gmra.mxu1 %v997_v30  ;;  %1742 = vmatprep.mubr.f32.mxu0 %v578_v31 }
  0x57   : > { %1822 = vmatprep.mubr.f32.mxu1 %v998_v35 }
  0x59   : > { %1743 = vmatmul.mubr.f32.gmra.mxu0 %v579_v37 }
  0x5a   : > { %1823 = vmatmul.mubr.f32.gmra.mxu1 %v999_v40  ;;  %1745 = vmatprep.mubr.f32.mxu0 %v580_v41 }
  0x5b   : > { %1825 = vmatprep.mubr.f32.mxu1 %v1000_v45 }
  0x5d   : > { %1746 = vmatmul.mubr.f32.gmra.mxu0 %v581_v47 }
  0x5e   : > { %1826 = vmatmul.mubr.f32.gmra.mxu1 %v1001_v50  ;;  %1748 = vmatprep.mubr.f32.mxu0 %v582_v51 }
  0x5f   : > { %1828 = vmatprep.mubr.f32.mxu1 %v1002_v55 }
  0x61   : > { %1749 = vmatmul.mubr.f32.gmra.mxu0 %v583_v56 }
  0x62   : > { %1829 = vmatmul.mubr.f32.gmra.mxu1 %v1003_v59  ;;  %1751 = vmatprep.mubr.f32.mxu0 %v584_v60 }
  0x63   : > { %1831 = vmatprep.mubr.f32.mxu1 %v1004_v62 }
  0x65   : > { %1752 = vmatmul.mubr.f32.gmra.mxu0 %v585_v63 }
  0x66   : > { %1832 = vmatmul.mubr.f32.gmra.mxu1 %v1005_v1  ;;  %1754 = vmatprep.mubr.f32.mxu0 %v586_v2 }
  0x67   : > { %1834 = vmatprep.mubr.f32.mxu1 %v1006_v21 }
  0x69   : > { %1755 = vmatmul.mubr.f32.gmra.mxu0 %v587_v3 }
  0x6a   : > { %1835 = vmatmul.mubr.f32.gmra.mxu1 %v1007_v4 }
  0xed   : > { %v1711_v6 = vpop.f32.mrf.mxu0 }
  0xee   : > { %v1791_v7 = vpop.f32.mrf.mxu1  ;;  %v683_v8 = vadd.f32 %v1711_v6, %v2175_v5 }
  0xef   : > { %v1103_v9 = vadd.f32 %v1791_v7, %v2180_v29  ;;  %v677_v10 = vpop.f32.mrf.mxu0 }
  0xf0   : > { %v1097_v11 = vpop.f32.mrf.mxu1  ;;  %837 = vst [vmem:[%s2186_s21 + $0x8] sm:$0xff] %v683_v8  ;;  %v678_v12 = vadd.f32 %v2175_v5, %v677_v10  ;;  %v907_v18 = vmul.f32 %v683_v8, %v683_v8 }
  0xf1   : > { %1257 = vst [vmem:[%s2192_s23 + $0x8] sm:$0xff] %v1103_v9  ;;  %v1098_v13 = vadd.f32 %v2180_v29, %v1097_v11  ;;  %v1714_v14 = vpop.f32.mrf.mxu0  ;;  %v1327_v19 = vmul.f32 %v1103_v9, %v1103_v9 }
  0xf2   : > { %v1794_v15 = vpop.f32.mrf.mxu1  ;;  %836 = vst [vmem:[%s2186_s21] sm:$0xff] %v678_v12  ;;  %v906_v16 = vmul.f32 %v678_v12, %v678_v12  ;;  %v693_v20 = vadd.f32 %v1714_v14, %v2175_v5  ;;  %v868_v25 = vadd.f32 %v683_v8, %v678_v12 }
  0xf3   : > { %1256 = vst [vmem:[%s2192_s23] sm:$0xff] %v1098_v13  ;;  %v1326_v17 = vmul.f32 %v1098_v13, %v1098_v13  ;;  %v1113_v22 = vadd.f32 %v1794_v15, %v2180_v29  ;;  %v687_v23 = vpop.f32.mrf.mxu0  ;;  %v1288_v26 = vadd.f32 %v1103_v9, %v1098_v13 }
  0xf4   : > { %v1107_v24 = vpop.f32.mrf.mxu1  ;;  %v688_v27 = vadd.f32 %v2175_v5, %v687_v23  ;;  %v938_v30 = vadd.f32 %v907_v18, %v906_v16  ;;  %839 = vst [vmem:[%s2186_s21 + $0x18] sm:$0xff] %v693_v20  ;;  %v909_v38 = vmul.f32 %v693_v20, %v693_v20 }
  0xf5   : > { %v1108_v28 = vadd.f32 %v2180_v29, %v1107_v24  ;;  %v1358_v31 = vadd.f32 %v1327_v19, %v1326_v17  ;;  %1259 = vst [vmem:[%s2192_s23 + $0x18] sm:$0xff] %v1113_v22  ;;  %v1717_v32 = vpop.f32.mrf.mxu0  ;;  %v1329_v39 = vmul.f32 %v1113_v22, %v1113_v22 }
  0xf6   : > { %v1797_v33 = vpop.f32.mrf.mxu1  ;;  %838 = vst [vmem:[%s2186_s21 + $0x10] sm:$0xff] %v688_v27  ;;  %v869_v34 = vadd.f32 %v868_v25, %v688_v27  ;;  %v908_v35 = vmul.f32 %v688_v27, %v688_v27  ;;  %v703_v40 = vadd.f32 %v1717_v32, %v2175_v5 }
  0xf7   : > { %1258 = vst [vmem:[%s2192_s23 + $0x10] sm:$0xff] %v1108_v28  ;;  %v1289_v36 = vadd.f32 %v1288_v26, %v1108_v28  ;;  %v1328_v37 = vmul.f32 %v1108_v28, %v1108_v28  ;;  %v1123_v41 = vadd.f32 %v1797_v33, %v2180_v29  ;;  %v697_v42 = vpop.f32.mrf.mxu0 }
  0xf8   : > { %v1117_v43 = vpop.f32.mrf.mxu1  ;;  %v939_v44 = vadd.f32 %v938_v30, %v908_v35  ;;  %v698_v46 = vadd.f32 %v2175_v5, %v697_v42  ;;  %v870_v47 = vadd.f32 %v869_v34, %v693_v20  ;;  %841 = vst [vmem:[%s2186_s21 + $0x28] sm:$0xff] %v703_v40  ;;  %v911_v48 = vmul.f32 %v703_v40, %v703_v40 }
  0xf9   : > { %v1359_v45 = vadd.f32 %v1358_v31, %v1328_v37  ;;  %1261 = vst [vmem:[%s2192_s23 + $0x28] sm:$0xff] %v1123_v41  ;;  %v1118_v49 = vadd.f32 %v2180_v29, %v1117_v43  ;;  %v1290_v50 = vadd.f32 %v1289_v36, %v1113_v22  ;;  %v1720_v51 = vpop.f32.mrf.mxu0  ;;  %v1331_v21 = vmul.f32 %v1123_v41, %v1123_v41 }
  0xfa   : > { %v1800_v52 = vpop.f32.mrf.mxu1  ;;  %840 = vst [vmem:[%s2186_s21 + $0x20] sm:$0xff] %v698_v46  ;;  %v871_v53 = vadd.f32 %v870_v47, %v698_v46  ;;  %v910_v54 = vmul.f32 %v698_v46, %v698_v46  ;;  %v940_v55 = vadd.f32 %v939_v44, %v909_v38  ;;  %v713_v59 = vadd.f32 %v1720_v51, %v2175_v5 }
  0xfb   : > { %v1360_v56 = vadd.f32 %v1359_v45, %v1329_v39  ;;  %1260 = vst [vmem:[%s2192_s23 + $0x20] sm:$0xff] %v1118_v49  ;;  %v1291_v57 = vadd.f32 %v1290_v50, %v1118_v49  ;;  %v1330_v58 = vmul.f32 %v1118_v49, %v1118_v49  ;;  %v1133_v60 = vadd.f32 %v1800_v52, %v2180_v29  ;;  %v707_v61 = vpop.f32.mrf.mxu0 }
  0xfc   : > { %v1127_v62 = vpop.f32.mrf.mxu1  ;;  %v941_v63 = vadd.f32 %v940_v55, %v910_v54  ;;  %v708_v0 = vadd.f32 %v2175_v5, %v707_v61  ;;  %v872_v1 = vadd.f32 %v871_v53, %v703_v40  ;;  %843 = vst [vmem:[%s2186_s21 + $0x38] sm:$0xff] %v713_v59  ;;  %v913_v4 = vmul.f32 %v713_v59, %v713_v59 }
  0xfd   : > { %v1128_v2 = vadd.f32 %v2180_v29, %v1127_v62  ;;  %v1361_v3 = vadd.f32 %v1360_v56, %v1330_v58  ;;  %1263 = vst [vmem:[%s2192_s23 + $0x38] sm:$0xff] %v1133_v60  ;;  %v1292_v6 = vadd.f32 %v1291_v57, %v1123_v41  ;;  %v1723_v7 = vpop.f32.mrf.mxu0  ;;  %v1333_v24 = vmul.f32 %v1133_v60, %v1133_v60 }
  0xfe   : > { %v1803_v8 = vpop.f32.mrf.mxu1  ;;  %842 = vst [vmem:[%s2186_s21 + $0x30] sm:$0xff] %v708_v0  ;;  %v873_v9 = vadd.f32 %v872_v1, %v708_v0  ;;  %v912_v10 = vmul.f32 %v708_v0, %v708_v0  ;;  %v942_v11 = vadd.f32 %v941_v63, %v911_v48  ;;  %v723_v15 = vadd.f32 %v1723_v7, %v2175_v5 }
  0xff   : > { %1262 = vst [vmem:[%s2192_s23 + $0x30] sm:$0xff] %v1128_v2  ;;  %v1332_v12 = vmul.f32 %v1128_v2, %v1128_v2  ;;  %v1293_v13 = vadd.f32 %v1292_v6, %v1128_v2  ;;  %v1362_v14 = vadd.f32 %v1361_v3, %v1331_v21  ;;  %v1143_v16 = vadd.f32 %v1803_v8, %v2180_v29  ;;  %v717_v17 = vpop.f32.mrf.mxu0 }
 0x100   : > { %v1137_v18 = vpop.f32.mrf.mxu1  ;;  %v943_v19 = vadd.f32 %v942_v11, %v912_v10  ;;  %v718_v20 = vadd.f32 %v2175_v5, %v717_v17  ;;  %v874_v22 = vadd.f32 %v873_v9, %v713_v59  ;;  %845 = vst [vmem:[%s2186_s21 + $0x48] sm:$0xff] %v723_v15  ;;  %v915_v26 = vmul.f32 %v723_v15, %v723_v15 }
 0x101   : > { %v1138_v23 = vadd.f32 %v2180_v29, %v1137_v18  ;;  %v1363_v25 = vadd.f32 %v1362_v14, %v1332_v12  ;;  %1265 = vst [vmem:[%s2192_s23 + $0x48] sm:$0xff] %v1143_v16  ;;  %v1294_v27 = vadd.f32 %v1293_v13, %v1133_v60  ;;  %v1726_v28 = vpop.f32.mrf.mxu0  ;;  %v1335_v45 = vmul.f32 %v1143_v16, %v1143_v16 }
 0x102   : > { %v1806_v30 = vpop.f32.mrf.mxu1  ;;  %844 = vst [vmem:[%s2186_s21 + $0x40] sm:$0xff] %v718_v20  ;;  %v875_v31 = vadd.f32 %v874_v22, %v718_v20  ;;  %v914_v32 = vmul.f32 %v718_v20, %v718_v20  ;;  %v944_v33 = vadd.f32 %v943_v19, %v913_v4  ;;  %v733_v37 = vadd.f32 %v1726_v28, %v2175_v5 }
 0x103   : > { %1264 = vst [vmem:[%s2192_s23 + $0x40] sm:$0xff] %v1138_v23  ;;  %v1334_v34 = vmul.f32 %v1138_v23, %v1138_v23  ;;  %v1295_v35 = vadd.f32 %v1294_v27, %v1138_v23  ;;  %v1364_v36 = vadd.f32 %v1363_v25, %v1333_v24  ;;  %v1153_v38 = vadd.f32 %v1806_v30, %v2180_v29  ;;  %v727_v39 = vpop.f32.mrf.mxu0 }
 0x104   : > { %v1147_v40 = vpop.f32.mrf.mxu1  ;;  %v945_v41 = vadd.f32 %v944_v33, %v914_v32  ;;  %v728_v42 = vadd.f32 %v2175_v5, %v727_v39  ;;  %v876_v43 = vadd.f32 %v875_v31, %v723_v15  ;;  %847 = vst [vmem:[%s2186_s21 + $0x58] sm:$0xff] %v733_v37  ;;  %v917_v47 = vmul.f32 %v733_v37, %v733_v37 }
 0x105   : > { %v1148_v44 = vadd.f32 %v2180_v29, %v1147_v40  ;;  %v1365_v46 = vadd.f32 %v1364_v36, %v1334_v34  ;;  %1267 = vst [vmem:[%s2192_s23 + $0x58] sm:$0xff] %v1153_v38  ;;  %v1296_v48 = vadd.f32 %v1295_v35, %v1143_v16  ;;  %v1729_v49 = vpop.f32.mrf.mxu0  ;;  %v1337_v1 = vmul.f32 %v1153_v38, %v1153_v38 }
 0x106   : > { %v1809_v50 = vpop.f32.mrf.mxu1  ;;  %846 = vst [vmem:[%s2186_s21 + $0x50] sm:$0xff] %v728_v42  ;;  %v877_v51 = vadd.f32 %v876_v43, %v728_v42  ;;  %v916_v52 = vmul.f32 %v728_v42, %v728_v42  ;;  %v946_v53 = vadd.f32 %v945_v41, %v915_v26  ;;  %v743_v57 = vadd.f32 %v1729_v49, %v2175_v5 }
 0x107   : > { %1266 = vst [vmem:[%s2192_s23 + $0x50] sm:$0xff] %v1148_v44  ;;  %v1336_v54 = vmul.f32 %v1148_v44, %v1148_v44  ;;  %v1297_v55 = vadd.f32 %v1296_v48, %v1148_v44  ;;  %v1366_v56 = vadd.f32 %v1365_v46, %v1335_v45  ;;  %v1163_v58 = vadd.f32 %v1809_v50, %v2180_v29  ;;  %v737_v59 = vpop.f32.mrf.mxu0 }
 0x108   : > { %v1157_v60 = vpop.f32.mrf.mxu1  ;;  %v947_v61 = vadd.f32 %v946_v53, %v916_v52  ;;  %v738_v62 = vadd.f32 %v2175_v5, %v737_v59  ;;  %v878_v63 = vadd.f32 %v877_v51, %v733_v37  ;;  %849 = vst [vmem:[%s2186_s21 + $0x68] sm:$0xff] %v743_v57  ;;  %v919_v21 = vmul.f32 %v743_v57, %v743_v57 }
 0x109   : > { %v1158_v0 = vadd.f32 %v2180_v29, %v1157_v60  ;;  %v1367_v2 = vadd.f32 %v1366_v56, %v1336_v54  ;;  %1269 = vst [vmem:[%s2192_s23 + $0x68] sm:$0xff] %v1163_v58  ;;  %v1298_v3 = vadd.f32 %v1297_v55, %v1153_v38  ;;  %v1732_v4 = vpop.f32.mrf.mxu0  ;;  %v1339_v22 = vmul.f32 %v1163_v58, %v1163_v58 }
 0x10a   : > { %v1812_v6 = vpop.f32.mrf.mxu1  ;;  %848 = vst [vmem:[%s2186_s21 + $0x60] sm:$0xff] %v738_v62  ;;  %v879_v7 = vadd.f32 %v878_v63, %v738_v62  ;;  %v918_v8 = vmul.f32 %v738_v62, %v738_v62  ;;  %v948_v9 = vadd.f32 %v947_v61, %v917_v47  ;;  %v753_v13 = vadd.f32 %v1732_v4, %v2175_v5 }
 0x10b   : > { %1268 = vst [vmem:[%s2192_s23 + $0x60] sm:$0xff] %v1158_v0  ;;  %v1338_v10 = vmul.f32 %v1158_v0, %v1158_v0  ;;  %v1299_v11 = vadd.f32 %v1298_v3, %v1158_v0  ;;  %v1368_v12 = vadd.f32 %v1367_v2, %v1337_v1  ;;  %v1173_v14 = vadd.f32 %v1812_v6, %v2180_v29  ;;  %v747_v15 = vpop.f32.mrf.mxu0 }
 0x10c   : > { %v1167_v16 = vpop.f32.mrf.mxu1  ;;  %v949_v17 = vadd.f32 %v948_v9, %v918_v8  ;;  %v748_v18 = vadd.f32 %v2175_v5, %v747_v15  ;;  %v880_v19 = vadd.f32 %v879_v7, %v743_v57  ;;  %851 = vst [vmem:[%s2186_s21 + $0x78] sm:$0xff] %v753_v13  ;;  %v921_v24 = vmul.f32 %v753_v13, %v753_v13 }
 0x10d   : > { %v1168_v20 = vadd.f32 %v2180_v29, %v1167_v16  ;;  %v1369_v23 = vadd.f32 %v1368_v12, %v1338_v10  ;;  %1271 = vst [vmem:[%s2192_s23 + $0x78] sm:$0xff] %v1173_v14  ;;  %v1300_v25 = vadd.f32 %v1299_v11, %v1163_v58  ;;  %v1735_v26 = vpop.f32.mrf.mxu0  ;;  %v1341_v43 = vmul.f32 %v1173_v14, %v1173_v14 }
 0x10e   : > { %v1815_v27 = vpop.f32.mrf.mxu1  ;;  %850 = vst [vmem:[%s2186_s21 + $0x70] sm:$0xff] %v748_v18  ;;  %v881_v28 = vadd.f32 %v880_v19, %v748_v18  ;;  %v920_v30 = vmul.f32 %v748_v18, %v748_v18  ;;  %v950_v31 = vadd.f32 %v949_v17, %v919_v21  ;;  %v763_v35 = vadd.f32 %v1735_v26, %v2175_v5 }
 0x10f   : > { %1270 = vst [vmem:[%s2192_s23 + $0x70] sm:$0xff] %v1168_v20  ;;  %v1340_v32 = vmul.f32 %v1168_v20, %v1168_v20  ;;  %v1301_v33 = vadd.f32 %v1300_v25, %v1168_v20  ;;  %v1370_v34 = vadd.f32 %v1369_v23, %v1339_v22  ;;  %v1183_v36 = vadd.f32 %v1815_v27, %v2180_v29  ;;  %v757_v37 = vpop.f32.mrf.mxu0 }
 0x110   : > { %v1177_v38 = vpop.f32.mrf.mxu1  ;;  %v951_v39 = vadd.f32 %v950_v31, %v920_v30  ;;  %v758_v40 = vadd.f32 %v2175_v5, %v757_v37  ;;  %v882_v41 = vadd.f32 %v881_v28, %v753_v13  ;;  %853 = vst [vmem:[%s2186_s21 + $0x88] sm:$0xff] %v763_v35  ;;  %v923_v45 = vmul.f32 %v763_v35, %v763_v35 }
 0x111   : > { %v1178_v42 = vadd.f32 %v2180_v29, %v1177_v38  ;;  %v1371_v44 = vadd.f32 %v1370_v34, %v1340_v32  ;;  %1273 = vst [vmem:[%s2192_s23 + $0x88] sm:$0xff] %v1183_v36  ;;  %v1302_v46 = vadd.f32 %v1301_v33, %v1173_v14  ;;  %v1738_v47 = vpop.f32.mrf.mxu0  ;;  %v1343_v63 = vmul.f32 %v1183_v36, %v1183_v36 }
 0x112   : > { %v1818_v48 = vpop.f32.mrf.mxu1  ;;  %852 = vst [vmem:[%s2186_s21 + $0x80] sm:$0xff] %v758_v40  ;;  %v883_v49 = vadd.f32 %v882_v41, %v758_v40  ;;  %v922_v50 = vmul.f32 %v758_v40, %v758_v40  ;;  %v952_v51 = vadd.f32 %v951_v39, %v921_v24  ;;  %v773_v55 = vadd.f32 %v1738_v47, %v2175_v5 }
 0x113   : > { %1272 = vst [vmem:[%s2192_s23 + $0x80] sm:$0xff] %v1178_v42  ;;  %v1342_v52 = vmul.f32 %v1178_v42, %v1178_v42  ;;  %v1303_v53 = vadd.f32 %v1302_v46, %v1178_v42  ;;  %v1372_v54 = vadd.f32 %v1371_v44, %v1341_v43  ;;  %v1193_v56 = vadd.f32 %v1818_v48, %v2180_v29  ;;  %v767_v57 = vpop.f32.mrf.mxu0 }
 0x114   : > { %v1187_v58 = vpop.f32.mrf.mxu1  ;;  %v953_v59 = vadd.f32 %v952_v51, %v922_v50  ;;  %v768_v60 = vadd.f32 %v2175_v5, %v767_v57  ;;  %v884_v61 = vadd.f32 %v883_v49, %v763_v35  ;;  %855 = vst [vmem:[%s2186_s21 + $0x98] sm:$0xff] %v773_v55  ;;  %v925_v1 = vmul.f32 %v773_v55, %v773_v55 }
 0x115   : > { %v1188_v62 = vadd.f32 %v2180_v29, %v1187_v58  ;;  %v1373_v0 = vadd.f32 %v1372_v54, %v1342_v52  ;;  %1275 = vst [vmem:[%s2192_s23 + $0x98] sm:$0xff] %v1193_v56  ;;  %v1304_v2 = vadd.f32 %v1303_v53, %v1183_v36  ;;  %v1741_v21 = vpop.f32.mrf.mxu0  ;;  %v1345_v19 = vmul.f32 %v1193_v56, %v1193_v56 }
 0x116   : > { %v1821_v3 = vpop.f32.mrf.mxu1  ;;  %854 = vst [vmem:[%s2186_s21 + $0x90] sm:$0xff] %v768_v60  ;;  %v885_v4 = vadd.f32 %v884_v61, %v768_v60  ;;  %v924_v6 = vmul.f32 %v768_v60, %v768_v60  ;;  %v954_v7 = vadd.f32 %v953_v59, %v923_v45  ;;  %v783_v11 = vadd.f32 %v1741_v21, %v2175_v5 }
 0x117   : > { %1274 = vst [vmem:[%s2192_s23 + $0x90] sm:$0xff] %v1188_v62  ;;  %v1344_v8 = vmul.f32 %v1188_v62, %v1188_v62  ;;  %v1305_v9 = vadd.f32 %v1304_v2, %v1188_v62  ;;  %v1374_v10 = vadd.f32 %v1373_v0, %v1343_v63  ;;  %v1203_v12 = vadd.f32 %v1821_v3, %v2180_v29  ;;  %v777_v13 = vpop.f32.mrf.mxu0 }
 0x118   : > { %v1197_v14 = vpop.f32.mrf.mxu1  ;;  %v955_v15 = vadd.f32 %v954_v7, %v924_v6  ;;  %v778_v16 = vadd.f32 %v2175_v5, %v777_v13  ;;  %v886_v17 = vadd.f32 %v885_v4, %v773_v55  ;;  %857 = vst [vmem:[%s2186_s21 + $0xa8] sm:$0xff] %v783_v11  ;;  %v927_v22 = vmul.f32 %v783_v11, %v783_v11 }
 0x119   : > { %v1198_v18 = vadd.f32 %v2180_v29, %v1197_v14  ;;  %v1375_v20 = vadd.f32 %v1374_v10, %v1344_v8  ;;  %1277 = vst [vmem:[%s2192_s23 + $0xa8] sm:$0xff] %v1203_v12  ;;  %v1306_v23 = vadd.f32 %v1305_v9, %v1193_v56  ;;  %v1744_v24 = vpop.f32.mrf.mxu0  ;;  %v1347_v41 = vmul.f32 %v1203_v12, %v1203_v12 }
 0x11a   : > { %v1824_v25 = vpop.f32.mrf.mxu1  ;;  %856 = vst [vmem:[%s2186_s21 + $0xa0] sm:$0xff] %v778_v16  ;;  %v887_v26 = vadd.f32 %v886_v17, %v778_v16  ;;  %v926_v27 = vmul.f32 %v778_v16, %v778_v16  ;;  %v956_v28 = vadd.f32 %v955_v15, %v925_v1  ;;  %v793_v33 = vadd.f32 %v1744_v24, %v2175_v5 }
 0x11b   : > { %1276 = vst [vmem:[%s2192_s23 + $0xa0] sm:$0xff] %v1198_v18  ;;  %v1346_v30 = vmul.f32 %v1198_v18, %v1198_v18  ;;  %v1307_v31 = vadd.f32 %v1306_v23, %v1198_v18  ;;  %v1376_v32 = vadd.f32 %v1375_v20, %v1345_v19  ;;  %v1213_v34 = vadd.f32 %v1824_v25, %v2180_v29  ;;  %v787_v35 = vpop.f32.mrf.mxu0 }
 0x11c   : > { %v1207_v36 = vpop.f32.mrf.mxu1  ;;  %v957_v37 = vadd.f32 %v956_v28, %v926_v27  ;;  %v788_v38 = vadd.f32 %v2175_v5, %v787_v35  ;;  %v888_v39 = vadd.f32 %v887_v26, %v783_v11  ;;  %859 = vst [vmem:[%s2186_s21 + $0xb8] sm:$0xff] %v793_v33  ;;  %v929_v43 = vmul.f32 %v793_v33, %v793_v33 }
 0x11d   : > { %v1208_v40 = vadd.f32 %v2180_v29, %v1207_v36  ;;  %v1377_v42 = vadd.f32 %v1376_v32, %v1346_v30  ;;  %1279 = vst [vmem:[%s2192_s23 + $0xb8] sm:$0xff] %v1213_v34  ;;  %v1308_v44 = vadd.f32 %v1307_v31, %v1203_v12  ;;  %v1747_v45 = vpop.f32.mrf.mxu0  ;;  %v1349_v61 = vmul.f32 %v1213_v34, %v1213_v34 }
 0x11e   : > { %v1827_v46 = vpop.f32.mrf.mxu1  ;;  %858 = vst [vmem:[%s2186_s21 + $0xb0] sm:$0xff] %v788_v38  ;;  %v889_v47 = vadd.f32 %v888_v39, %v788_v38  ;;  %v928_v48 = vmul.f32 %v788_v38, %v788_v38  ;;  %v958_v49 = vadd.f32 %v957_v37, %v927_v22  ;;  %v803_v53 = vadd.f32 %v1747_v45, %v2175_v5 }
 0x11f   : > { %1278 = vst [vmem:[%s2192_s23 + $0xb0] sm:$0xff] %v1208_v40  ;;  %v1348_v50 = vmul.f32 %v1208_v40, %v1208_v40  ;;  %v1309_v51 = vadd.f32 %v1308_v44, %v1208_v40  ;;  %v1378_v52 = vadd.f32 %v1377_v42, %v1347_v41  ;;  %v1223_v54 = vadd.f32 %v1827_v46, %v2180_v29  ;;  %v797_v55 = vpop.f32.mrf.mxu0 }
 0x120   : > { %v1217_v56 = vpop.f32.mrf.mxu1  ;;  %v959_v57 = vadd.f32 %v958_v49, %v928_v48  ;;  %v798_v58 = vadd.f32 %v2175_v5, %v797_v55  ;;  %v890_v59 = vadd.f32 %v889_v47, %v793_v33  ;;  %861 = vst [vmem:[%s2186_s21 + $0xc8] sm:$0xff] %v803_v53  ;;  %v931_v63 = vmul.f32 %v803_v53, %v803_v53 }
 0x121   : > { %v1218_v60 = vadd.f32 %v2180_v29, %v1217_v56  ;;  %v1379_v62 = vadd.f32 %v1378_v52, %v1348_v50  ;;  %1281 = vst [vmem:[%s2192_s23 + $0xc8] sm:$0xff] %v1223_v54  ;;  %v1310_v0 = vadd.f32 %v1309_v51, %v1213_v34  ;;  %v1750_v1 = vpop.f32.mrf.mxu0  ;;  %v1351_v17 = vmul.f32 %v1223_v54, %v1223_v54 }
 0x122   : > { %v1830_v2 = vpop.f32.mrf.mxu1  ;;  %860 = vst [vmem:[%s2186_s21 + $0xc0] sm:$0xff] %v798_v58  ;;  %v891_v21 = vadd.f32 %v890_v59, %v798_v58  ;;  %v930_v3 = vmul.f32 %v798_v58, %v798_v58  ;;  %v960_v4 = vadd.f32 %v959_v57, %v929_v43  ;;  %v813_v9 = vadd.f32 %v1750_v1, %v2175_v5 }
 0x123   : > { %1280 = vst [vmem:[%s2192_s23 + $0xc0] sm:$0xff] %v1218_v60  ;;  %v1350_v6 = vmul.f32 %v1218_v60, %v1218_v60  ;;  %v1311_v7 = vadd.f32 %v1310_v0, %v1218_v60  ;;  %v1380_v8 = vadd.f32 %v1379_v62, %v1349_v61  ;;  %v1233_v10 = vadd.f32 %v1830_v2, %v2180_v29  ;;  %v807_v11 = vpop.f32.mrf.mxu0 }
 0x124   : > { %v1227_v12 = vpop.f32.mrf.mxu1  ;;  %v961_v13 = vadd.f32 %v960_v4, %v930_v3  ;;  %v808_v14 = vadd.f32 %v2175_v5, %v807_v11  ;;  %v892_v15 = vadd.f32 %v891_v21, %v803_v53  ;;  %863 = vst [vmem:[%s2186_s21 + $0xd8] sm:$0xff] %v813_v9  ;;  %v933_v19 = vmul.f32 %v813_v9, %v813_v9 }
 0x125   : > { %v1228_v16 = vadd.f32 %v2180_v29, %v1227_v12  ;;  %v1381_v18 = vadd.f32 %v1380_v8, %v1350_v6  ;;  %1283 = vst [vmem:[%s2192_s23 + $0xd8] sm:$0xff] %v1233_v10  ;;  %v1312_v20 = vadd.f32 %v1311_v7, %v1223_v54  ;;  %v1753_v22 = vpop.f32.mrf.mxu0  ;;  %v1353_v39 = vmul.f32 %v1233_v10, %v1233_v10 }
 0x126   : > { %v1833_v23 = vpop.f32.mrf.mxu1  ;;  %862 = vst [vmem:[%s2186_s21 + $0xd0] sm:$0xff] %v808_v14  ;;  %v893_v24 = vadd.f32 %v892_v15, %v808_v14  ;;  %v932_v25 = vmul.f32 %v808_v14, %v808_v14  ;;  %v962_v26 = vadd.f32 %v961_v13, %v931_v63  ;;  %v823_v31 = vadd.f32 %v1753_v22, %v2175_v5 }
 0x127   : > { %1282 = vst [vmem:[%s2192_s23 + $0xd0] sm:$0xff] %v1228_v16  ;;  %v1352_v27 = vmul.f32 %v1228_v16, %v1228_v16  ;;  %v1313_v28 = vadd.f32 %v1312_v20, %v1228_v16  ;;  %v1382_v30 = vadd.f32 %v1381_v18, %v1351_v17  ;;  %v1243_v32 = vadd.f32 %v1833_v23, %v2180_v29  ;;  %v817_v33 = vpop.f32.mrf.mxu0 }
 0x128   : > { %v1237_v34 = vpop.f32.mrf.mxu1  ;;  %v963_v35 = vadd.f32 %v962_v26, %v932_v25  ;;  %v818_v36 = vadd.f32 %v2175_v5, %v817_v33  ;;  %v894_v37 = vadd.f32 %v893_v24, %v813_v9  ;;  %865 = vst [vmem:[%s2186_s21 + $0xe8] sm:$0xff] %v823_v31  ;;  %v935_v41 = vmul.f32 %v823_v31, %v823_v31 }
 0x129   : > { %v1238_v38 = vadd.f32 %v2180_v29, %v1237_v34  ;;  %v1383_v40 = vadd.f32 %v1382_v30, %v1352_v27  ;;  %1285 = vst [vmem:[%s2192_s23 + $0xe8] sm:$0xff] %v1243_v32  ;;  %v1314_v42 = vadd.f32 %v1313_v28, %v1233_v10  ;;  %v1756_v43 = vpop.f32.mrf.mxu0  ;;  %v1355_v59 = vmul.f32 %v1243_v32, %v1243_v32 }
 0x12a   : > { %v1836_v44 = vpop.f32.mrf.mxu1  ;;  %864 = vst [vmem:[%s2186_s21 + $0xe0] sm:$0xff] %v818_v36  ;;  %v895_v45 = vadd.f32 %v894_v37, %v818_v36  ;;  %v934_v46 = vmul.f32 %v818_v36, %v818_v36  ;;  %v964_v47 = vadd.f32 %v963_v35, %v933_v19  ;;  %v833_v51 = vadd.f32 %v1756_v43, %v2175_v5 }
 0x12b   : > { %1284 = vst [vmem:[%s2192_s23 + $0xe0] sm:$0xff] %v1238_v38  ;;  %v1354_v48 = vmul.f32 %v1238_v38, %v1238_v38  ;;  %v1315_v49 = vadd.f32 %v1314_v42, %v1238_v38  ;;  %v1384_v50 = vadd.f32 %v1383_v40, %v1353_v39  ;;  %v1253_v52 = vadd.f32 %v1836_v44, %v2180_v29  ;;  %v827_v53 = vpop.f32.mrf.mxu0 }
 0x12c   : > { %v1247_v54 = vpop.f32.mrf.mxu1  ;;  %v965_v55 = vadd.f32 %v964_v47, %v934_v46  ;;  %v828_v56 = vadd.f32 %v2175_v5, %v827_v53  ;;  %v896_v57 = vadd.f32 %v895_v45, %v823_v31  ;;  %867 = vst [vmem:[%s2186_s21 + $0xf8] sm:$0xff] %v833_v51  ;;  %v937_v3 = vmul.f32 %v833_v51, %v833_v51 }
 0x12d   : > { %v1248_v58 = vadd.f32 %v2180_v29, %v1247_v54  ;;  %v1385_v60 = vadd.f32 %v1384_v50, %v1354_v48  ;;  %1287 = vst [vmem:[%s2192_s23 + $0xf8] sm:$0xff] %v1253_v52  ;;  %v1316_v61 = vadd.f32 %v1315_v49, %v1243_v32  ;;  %v1357_v6 = vmul.f32 %v1253_v52, %v1253_v52 }
 0x12e   : > { %866 = vst [vmem:[%s2186_s21 + $0xf0] sm:$0xff] %v828_v56  ;;  %v897_v62 = vadd.f32 %v896_v57, %v828_v56  ;;  %v936_v63 = vmul.f32 %v828_v56, %v828_v56  ;;  %v966_v0 = vadd.f32 %v965_v55, %v935_v41 }
 0x12f   : > { %1286 = vst [vmem:[%s2192_s23 + $0xf0] sm:$0xff] %v1248_v58  ;;  %v1356_v1 = vmul.f32 %v1248_v58, %v1248_v58  ;;  %v1317_v2 = vadd.f32 %v1316_v61, %v1248_v58  ;;  %v1386_v21 = vadd.f32 %v1385_v60, %v1355_v59 }
 0x130   : > { %v898_v5 = vadd.f32 %v897_v62, %v833_v51  ;;  %v967_v4 = vadd.f32 %v966_v0, %v936_v63 }
 0x131   : > { %v1318_v29 = vadd.f32 %v1317_v2, %v1253_v52  ;;  %v1387_v7 = vadd.f32 %v1386_v21, %v1356_v1 }
 0x132   : > { %v899_v8 = vrot.slane %v898_v5, 4  ;;  %v968_v9 = vadd.f32 %v967_v4, %v937_v3 }
 0x133   : > { %v1319_v10 = vrot.slane %v1318_v29, 4  ;;  %v1388_v11 = vadd.f32 %v1387_v7, %v1357_v6 }
 0x134   : > { %v900_v12 = vadd.f32 %v899_v8, %v898_v5  ;;  %v969_v13 = vrot.slane %v968_v9, 4 }
 0x135   : > { %v1320_v14 = vadd.f32 %v1319_v10, %v1318_v29  ;;  %v1389_v15 = vrot.slane %v1388_v11, 4 }
 0x136   : > { %v901_v16 = vrot.slane %v900_v12, 2  ;;  %v970_v17 = vadd.f32 %v969_v13, %v968_v9 }
 0x137   : > { %v1321_v18 = vrot.slane %v1320_v14, 2  ;;  %v1390_v19 = vadd.f32 %v1389_v15, %v1388_v11 }
 0x138   : > { %v902_v20 = vadd.f32 %v901_v16, %v900_v12  ;;  %v971_v22 = vrot.slane %v970_v17, 2 }
 0x139   : > { %v1322_v23 = vadd.f32 %v1321_v18, %v1320_v14  ;;  %v1391_v24 = vrot.slane %v1390_v19, 2 }
 0x13a   : > { %v903_v25 = vrot.slane %v902_v20, 1  ;;  %v972_v26 = vadd.f32 %v971_v22, %v970_v17 }
 0x13b   : > { %v1323_v27 = vrot.slane %v1322_v23, 1  ;;  %v1392_v28 = vadd.f32 %v1391_v24, %v1390_v19 }
 0x13c   : > { %v904_v30 = vadd.f32 %v903_v25, %v902_v20  ;;  %v973_v31 = vrot.slane %v972_v26, 1 }
 0x13d   : > { %v1324_v32 = vadd.f32 %v1323_v27, %v1322_v23  ;;  %v1393_v33 = vrot.slane %v1392_v28, 1 }
 0x13e   : > { %905 = vst [vmem:[%s435_s28] sm:$0x1] %v904_v30  ;;  %v974_v34 = vadd.f32 %v973_v31, %v972_v26 }
 0x13f   : > { %1325 = vst [vmem:[%s445_s12] sm:$0x1] %v1324_v32  ;;  %v1394_v35 = vadd.f32 %v1393_v33, %v1392_v28 }
 0x140   : > { %975 = vst [vmem:[%s435_s28 + $0x1] sm:$0x1] %v974_v34 }
 0x141   : > { %1395 = vst [vmem:[%s445_s12 + $0x1] sm:$0x1] %v1394_v35 }
 0x142 PF: > { %s22_s17 = sadd.s32 1, %s1851_s17  }
 0x143   : > { %p19_p5 = scmp.ge.s32.totalorder %s22_s17, 4  }
 0x145   :  { %21 = sbr.rel (!%p19_p5) target bundleno = 1 (0x1), region = 121 }

// kernel: _lambda_.5
= control target key start
LH: loop header
LB: loop body
LE: loop exit
PB: predicated region body
PF: predicated region fallthrough
CT: control target
= control target key end

     0   :  { %s2206_s21 = smov 0   ;;  %s2878_s0 = inlined_call_operand.vmem [shape: f32[2,16,16,128], index: 0, kind: input, shape index: {}]   ;;  %s2879_s1 = inlined_call_operand.vmem [shape: f32[1,128], index: 1, kind: input, shape index: {}]   ;;  %s2880_s2 = inlined_call_operand.vmem [shape: f32[1,128], index: 2, kind: input, shape index: {}]   ;;  %s2881_s3 = inlined_call_operand.vmem [shape: f32[9,128,128], index: 3, kind: input, shape index: {}]   ;;  %s2882_s4 = inlined_call_operand.vmem [shape: f32[1,128], index: 4, kind: input, shape index: {}]   ;;  %s2883_s5 = inlined_call_operand.vmem [shape: f32[2,16,16,128], index: 5, kind: output, shape index: {0}]   ;;  %s2884_s6 = inlined_call_operand.vmem [shape: f32[2,2,128], index: 6, kind: output, shape index: {1}]  }
   0x1 LB: > { %s1502_s22 = sadd.s32 4294967295, %s2164_s21   ;;  %p1506_p0 = scmp.ge.s32.totalorder %s2164_s21, 1  ;;  %s2164_s21 = sphi %s2206_s21, %s17_s21  }
   0x2   : > { %p215_p1 = scmp.lt.s32.totalorder %s2164_s21, 3 }
   0x4   : > { %p216_p2 = pnand %p1506_p0, %p215_p1 }
   0x5   : > { %p2221_p3 = scmp.lt.s32.totalorder (!%p216_p2), %s1502_s22, 1  ;;  %s2406_s17 = smov (!%p216_p2), 0  }
   0x6   : > { %219 = sbr.rel (%p216_p2) target bundleno = 442 (0x1ba), region = 40 }
   0xb   : > { %v2217_v0 = vld [vmem:[%s2882_s4] ss:$0 sm:$0xff]  ;;  %v2170_v1 = vmov 0.0   ;;  %s2887_s22 = smov (!%p2221_p3, %s1502_s22), 1 }
   0xc   : > { %266 = vst [vmem:[#allocation2 + $0x18] sm:$0xff] %v2170_v1  ;;  %263 = vst [vmem:[#allocation2] sm:$0xff] %v2170_v1  ;;  %s1658_s26 = sshll.u32 %s2887_s22, 8  ;;  %v2286_v2 = vld [vmem:[%s2879_s1] ss:$0 sm:$0xff]  ;;  %s1511_s29 = sshll.u32 %s2887_s22, 1 }
   0xd   : > { %264 = vst [vmem:[#allocation2 + $0x8] sm:$0xff] %v2170_v1  ;;  %265 = vst [vmem:[#allocation2 + $0x10] sm:$0x3] %v2170_v1  ;;  %s2291_s8 = scalar_lea.vmem %s2878_s0, %s1658_s26  ;;  %s2296_s11 = scalar_lea.vmem %s2883_s5, %s1658_s26  ;;  %v2301_v3 = vld [vmem:[%s2880_s2] ss:$0 sm:$0xff] }
   0xe   : > { %267 = vst [vmem:[#allocation2 + $0x20] sm:$0xff] %v2170_v1  ;;  %268 = vst [vmem:[#allocation2 + $0x28] sm:$0x3] %v2170_v1  ;;  %v317_v4 = vld [vmem:[%s2291_s8] sm:$0xff]  ;;  %v318_v5 = vld [vmem:[%s2291_s8 + $0x8] sm:$0xff]  ;;  %s2309_s16 = scalar_lea.vmem %s2884_s6, %s1511_s29 }
   0xf   : > { %269 = vst [vmem:[#allocation2 + $0x30] sm:$0xff] %v2170_v1  ;;  %270 = vst [vmem:[#allocation2 + $0x38] sm:$0xff] %v2170_v1  ;;  %v319_v6 = vld [vmem:[%s2291_s8 + $0x10] sm:$0xff]  ;;  %v356_v7 = vmul.f32 %v2286_v2, %v317_v4  ;;  %v357_v8 = vmul.f32 %v2286_v2, %v318_v5  ;;  %v320_v10 = vld [vmem:[%s2291_s8 + $0x18] sm:$0xff] }
  0x10   : > { %271 = vst [vmem:[#allocation2 + $0x40] sm:$0x3] %v2170_v1  ;;  %272 = vst [vmem:[#allocation2 + $0x48] sm:$0xff] %v2170_v1  ;;  %v358_v9 = vmul.f32 %v2286_v2, %v319_v6  ;;  %v321_v11 = vld [vmem:[%s2291_s8 + $0x20] sm:$0xff]  ;;  %v322_v12 = vld [vmem:[%s2291_s8 + $0x28] sm:$0xff]  ;;  %v359_v13 = vmul.f32 %v2286_v2, %v320_v10 }
  0x11   : > { %273 = vst [vmem:[#allocation2 + $0x50] sm:$0xff] %v2170_v1  ;;  %274 = vst [vmem:[#allocation2 + $0x58] sm:$0x3] %v2170_v1  ;;  %v360_v14 = vmul.f32 %v2286_v2, %v321_v11  ;;  %v361_v15 = vmul.f32 %v2286_v2, %v322_v12  ;;  %v323_v16 = vld [vmem:[%s2291_s8 + $0x30] sm:$0xff]  ;;  %v324_v17 = vld [vmem:[%s2291_s8 + $0x38] sm:$0xff]  ;;  %v395_v18 = vadd.f32 %v2301_v3, %v356_v7 }
  0x12   : > { %275 = vst [vmem:[#allocation2 + $0x60] sm:$0xff] %v2170_v1  ;;  %276 = vst [vmem:[#allocation2 + $0x68] sm:$0xff] %v2170_v1  ;;  %v396_v19 = vadd.f32 %v2301_v3, %v357_v8  ;;  %v397_v20 = vadd.f32 %v2301_v3, %v358_v9  ;;  %v362_v21 = vmul.f32 %v2286_v2, %v323_v16  ;;  %v325_v26 = vld [vmem:[%s2291_s8 + $0x40] sm:$0xff]  ;;  %v326_v27 = vld [vmem:[%s2291_s8 + $0x48] sm:$0xff] }
  0x13   : > { %277 = vst [vmem:[#allocation2 + $0x70] sm:$0x3] %v2170_v1  ;;  %278 = vst [vmem:[#allocation2 + $0x78] sm:$0xff] %v2170_v1  ;;  %v398_v22 = vadd.f32 %v2301_v3, %v359_v13  ;;  %v399_v23 = vadd.f32 %v2301_v3, %v360_v14  ;;  %v400_v24 = vadd.f32 %v2301_v3, %v361_v15  ;;  %v327_v28 = vld [vmem:[%s2291_s8 + $0x50] sm:$0xff]  ;;  %v427_v29 = vmax.f32 %v395_v18, 0.0  ;;  %v328_v33 = vld [vmem:[%s2291_s8 + $0x58] sm:$0xff] }
  0x14   : > { %279 = vst [vmem:[#allocation2 + $0x80] sm:$0xff] %v2170_v1  ;;  %280 = vst [vmem:[#allocation2 + $0x88] sm:$0x3] %v2170_v1  ;;  %v363_v25 = vmul.f32 %v2286_v2, %v324_v17  ;;  %v428_v30 = vmax.f32 %v396_v19, 0.0  ;;  %v429_v31 = vmax.f32 %v397_v20, 0.0  ;;  %v401_v32 = vadd.f32 %v2301_v3, %v362_v21  ;;  %v329_v34 = vld [vmem:[%s2291_s8 + $0x60] sm:$0xff] }
  0x15   : > { %281 = vst [vmem:[#allocation2 + $0x90] sm:$0xff] %v2170_v1  ;;  %282 = vst [vmem:[#allocation2 + $0x98] sm:$0xff] %v2170_v1  ;;  %v330_v35 = vld [vmem:[%s2291_s8 + $0x68] sm:$0xff]  ;;  %v430_v36 = vmax.f32 %v398_v22, 0.0  ;;  %v431_v37 = vmax.f32 %v399_v23, 0.0  ;;  %v432_v38 = vmax.f32 %v400_v24, 0.0  ;;  %v364_v42 = vmul.f32 %v2286_v2, %v325_v26 }
  0x16   : > { %283 = vst [vmem:[#allocation2 + $0xa0] sm:$0x3] %v2170_v1  ;;  %284 = vst [vmem:[#allocation2 + $0xa8] sm:$0xff] %v2170_v1  ;;  %v402_v39 = vadd.f32 %v2301_v3, %v363_v25  ;;  %v331_v40 = vld [vmem:[%s2291_s8 + $0x70] sm:$0xff]  ;;  %v433_v41 = vmax.f32 %v401_v32, 0.0  ;;  %v365_v43 = vmul.f32 %v2286_v2, %v326_v27  ;;  %v366_v44 = vmul.f32 %v2286_v2, %v327_v28  ;;  %v332_v45 = vld [vmem:[%s2291_s8 + $0x78] sm:$0xff] }
  0x17   : > { %285 = vst [vmem:[#allocation2 + $0xb0] sm:$0xff] %v2170_v1  ;;  %286 = vst [vmem:[#allocation2 + $0xb8] sm:$0x3] %v2170_v1  ;;  %v367_v47 = vmul.f32 %v2286_v2, %v328_v33  ;;  %v368_v48 = vmul.f32 %v2286_v2, %v329_v34  ;;  %v369_v49 = vmul.f32 %v2286_v2, %v330_v35  ;;  %v333_v58 = vld [vmem:[%s2291_s8 + $0x80] sm:$0xff]  ;;  %v334_v59 = vld [vmem:[%s2291_s8 + $0x88] sm:$0xff] }
  0x18   : > { %287 = vst [vmem:[#allocation2 + $0xc0] sm:$0xff] %v2170_v1  ;;  %288 = vst [vmem:[#allocation2 + $0xc8] sm:$0xff] %v2170_v1  ;;  %v434_v46 = vmax.f32 %v402_v39, 0.0  ;;  %v403_v50 = vadd.f32 %v2301_v3, %v364_v42  ;;  %v404_v51 = vadd.f32 %v2301_v3, %v365_v43  ;;  %v405_v52 = vadd.f32 %v2301_v3, %v366_v44  ;;  %v335_v60 = vld [vmem:[%s2291_s8 + $0x90] sm:$0xff]  ;;  %v336_v4 = vld [vmem:[%s2291_s8 + $0x98] sm:$0xff] }
  0x19   : > { %289 = vst [vmem:[#allocation2 + $0xd0] sm:$0x3] %v2170_v1  ;;  %290 = vst [vmem:[#allocation2 + $0xd8] sm:$0xff] %v2170_v1  ;;  %v370_v53 = vmul.f32 %v2286_v2, %v331_v40  ;;  %v406_v54 = vadd.f32 %v2301_v3, %v367_v47  ;;  %v407_v55 = vadd.f32 %v2301_v3, %v368_v48  ;;  %v337_v5 = vld [vmem:[%s2291_s8 + $0xa0] sm:$0xff]  ;;  %v338_v6 = vld [vmem:[%s2291_s8 + $0xa8] sm:$0xff] }
  0x1a   : > { %291 = vst [vmem:[#allocation2 + $0xe0] sm:$0xff] %v2170_v1  ;;  %292 = vst [vmem:[#allocation2 + $0xe8] sm:$0x3] %v2170_v1  ;;  %v408_v56 = vadd.f32 %v2301_v3, %v369_v49  ;;  %v371_v57 = vmul.f32 %v2286_v2, %v332_v45  ;;  %v435_v61 = vmax.f32 %v403_v50, 0.0  ;;  %v436_v62 = vmax.f32 %v404_v51, 0.0  ;;  %v339_v11 = vld [vmem:[%s2291_s8 + $0xb0] sm:$0xff] }
  0x1b   : > { %293 = vst [vmem:[#allocation2 + $0xf0] sm:$0xff] %v2170_v1  ;;  %294 = vst [vmem:[#allocation2 + $0xf8] sm:$0xff] %v2170_v1  ;;  %v437_v63 = vmax.f32 %v405_v52, 0.0  ;;  %v438_v7 = vmax.f32 %v406_v54, 0.0  ;;  %v439_v8 = vmax.f32 %v407_v55, 0.0  ;;  %v372_v13 = vmul.f32 %v2286_v2, %v333_v58  ;;  %v340_v16 = vld [vmem:[%s2291_s8 + $0xb8] sm:$0xff] }
  0x1c   : > { %295 = vst [vmem:[#allocation2 + $0x100] sm:$0x3] %v2170_v1  ;;  %296 = vst [vmem:[#allocation2 + $0x108] sm:$0xff] %v2170_v1  ;;  %v440_v9 = vmax.f32 %v408_v56, 0.0  ;;  %v410_v10 = vadd.f32 %v2301_v3, %v371_v57  ;;  %v373_v14 = vmul.f32 %v2286_v2, %v334_v59  ;;  %v374_v15 = vmul.f32 %v2286_v2, %v335_v60  ;;  %v347_v43 = vld [vmem:[%s2291_s8 + $0xf0] sm:$0xff]  ;;  %v348_v48 = vld [vmem:[%s2291_s8 + $0xf8] sm:$0xff] }
  0x1d   : > { %297 = vst [vmem:[#allocation2 + $0x110] sm:$0xff] %v2170_v1  ;;  %298 = vst [vmem:[#allocation2 + $0x118] sm:$0x3] %v2170_v1  ;;  %v375_v18 = vmul.f32 %v2286_v2, %v336_v4  ;;  %v376_v19 = vmul.f32 %v2286_v2, %v337_v5  ;;  %v377_v20 = vmul.f32 %v2286_v2, %v338_v6 }
  0x1e   : > { %299 = vst [vmem:[#allocation2 + $0x120] sm:$0xff] %v2170_v1  ;;  %300 = vst [vmem:[#allocation2 + $0x128] sm:$0xff] %v2170_v1  ;;  %v442_v17 = vmax.f32 %v410_v10, 0.0  ;;  %v411_v21 = vadd.f32 %v2301_v3, %v372_v13  ;;  %v412_v22 = vadd.f32 %v2301_v3, %v373_v14  ;;  %v413_v23 = vadd.f32 %v2301_v3, %v374_v15 }
  0x1f   : > { %301 = vst [vmem:[#allocation2 + $0x130] sm:$0x3] %v2170_v1  ;;  %302 = vst [vmem:[#allocation2 + $0x138] sm:$0xff] %v2170_v1  ;;  %v378_v24 = vmul.f32 %v2286_v2, %v339_v11  ;;  %v414_v25 = vadd.f32 %v2301_v3, %v375_v18  ;;  %v415_v26 = vadd.f32 %v2301_v3, %v376_v19 }
  0x20   : > { %303 = vst [vmem:[#allocation2 + $0x140] sm:$0xff] %v2170_v1  ;;  %304 = vst [vmem:[#allocation2 + $0x148] sm:$0x3] %v2170_v1  ;;  %v416_v27 = vadd.f32 %v2301_v3, %v377_v20  ;;  %v379_v28 = vmul.f32 %v2286_v2, %v340_v16  ;;  %v443_v32 = vmax.f32 %v411_v21, 0.0  ;;  %v444_v33 = vmax.f32 %v412_v22, 0.0 }
  0x21   : > { %305 = vst [vmem:[#allocation2 + $0x150] sm:$0xff] %v2170_v1  ;;  %306 = vst [vmem:[#allocation2 + $0x158] sm:$0xff] %v2170_v1  ;;  %v445_v34 = vmax.f32 %v413_v23, 0.0  ;;  %v417_v35 = vadd.f32 %v2301_v3, %v378_v24  ;;  %v446_v39 = vmax.f32 %v414_v25, 0.0  ;;  %v447_v40 = vmax.f32 %v415_v26, 0.0 }
  0x22   : > { %307 = vst [vmem:[#allocation2 + $0x160] sm:$0x3] %v2170_v1  ;;  %308 = vst [vmem:[#allocation2 + $0x168] sm:$0xff] %v2170_v1  ;;  %v418_v42 = vadd.f32 %v2301_v3, %v379_v28  ;;  %v386_v56 = vmul.f32 %v2286_v2, %v347_v43  ;;  %v387_v60 = vmul.f32 %v2286_v2, %v348_v48 }
  0x23   : > { %309 = vst [vmem:[#allocation2 + $0x170] sm:$0xff] %v2170_v1  ;;  %310 = vst [vmem:[#allocation2 + $0x178] sm:$0x3] %v2170_v1  ;;  %v449_v44 = vmax.f32 %v417_v35, 0.0 }
  0x24   : > { %311 = vst [vmem:[#allocation2 + $0x180] sm:$0xff] %v2170_v1  ;;  %312 = vst [vmem:[#allocation2 + $0x188] sm:$0xff] %v2170_v1  ;;  %v450_v49 = vmax.f32 %v418_v42, 0.0 }
  0x25   : > { %313 = vst [vmem:[#allocation2 + $0x190] sm:$0x3] %v2170_v1  ;;  %314 = vst [vmem:[#allocation2 + $0x198] sm:$0xff] %v2170_v1 }
  0x26   : > { %315 = vst [vmem:[#allocation2 + $0x1a0] sm:$0xff] %v2170_v1  ;;  %316 = vst [vmem:[#allocation2 + $0x1a8] sm:$0x3] %v2170_v1 }
  0x27   : > { %493 = vst [vmem:[%s2309_s16] sm:$0x3] %v2170_v1  ;;  %460 = vst [vmem:[#allocation2 + $0x19] sm:$0xff] %v427_v29  ;;  %v409_v1 = vadd.f32 %v2301_v3, %v370_v53  ;;  %v341_v29 = vld [vmem:[%s2291_s8 + $0xc0] sm:$0xff] }
  0x28   : > { %461 = vst [vmem:[#allocation2 + $0x21] sm:$0xff] %v428_v30  ;;  %462 = vst [vmem:[#allocation2 + $0x31] sm:$0xff] %v429_v31  ;;  %v342_v30 = vld [vmem:[%s2291_s8 + $0xc8] sm:$0xff]  ;;  %v343_v31 = vld [vmem:[%s2291_s8 + $0xd0] sm:$0xff]  ;;  %v380_v45 = vmul.f32 %v2286_v2, %v341_v29 }
  0x29   : > { %463 = vst [vmem:[#allocation2 + $0x39] sm:$0xff] %v430_v36  ;;  %464 = vst [vmem:[#allocation2 + $0x49] sm:$0xff] %v431_v37  ;;  %v441_v12 = vmax.f32 %v409_v1, 0.0  ;;  %v344_v36 = vld [vmem:[%s2291_s8 + $0xd8] sm:$0xff]  ;;  %v345_v37 = vld [vmem:[%s2291_s8 + $0xe0] sm:$0xff]  ;;  %v382_v47 = vmul.f32 %v2286_v2, %v343_v31  ;;  %v425_v1 = vadd.f32 %v2301_v3, %v386_v56 }
  0x2a   : > { %465 = vst [vmem:[#allocation2 + $0x51] sm:$0xff] %v432_v38  ;;  %466 = vst [vmem:[#allocation2 + $0x61] sm:$0xff] %v433_v41  ;;  %v346_v38 = vld [vmem:[%s2291_s8 + $0xe8] sm:$0xff]  ;;  %v448_v41 = vmax.f32 %v416_v27, 0.0  ;;  %v383_v50 = vmul.f32 %v2286_v2, %v344_v36  ;;  %v384_v51 = vmul.f32 %v2286_v2, %v345_v37  ;;  %v419_v53 = vadd.f32 %v2301_v3, %v380_v45 }
  0x2b   : > { %467 = vst [vmem:[#allocation2 + $0x69] sm:$0xff] %v434_v46  ;;  %468 = vst [vmem:[#allocation2 + $0x79] sm:$0xff] %v435_v61  ;;  %v381_v46 = vmul.f32 %v2286_v2, %v342_v30  ;;  %v385_v52 = vmul.f32 %v2286_v2, %v346_v38  ;;  %v421_v55 = vadd.f32 %v2301_v3, %v382_v47 }
  0x2c   : > { %469 = vst [vmem:[#allocation2 + $0x81] sm:$0xff] %v436_v62  ;;  %470 = vst [vmem:[#allocation2 + $0x91] sm:$0xff] %v437_v63  ;;  %v422_v57 = vadd.f32 %v2301_v3, %v383_v50  ;;  %v423_v58 = vadd.f32 %v2301_v3, %v384_v51  ;;  %v451_v61 = vmax.f32 %v419_v53, 0.0 }
  0x2d   : > { %471 = vst [vmem:[#allocation2 + $0x99] sm:$0xff] %v438_v7  ;;  %472 = vst [vmem:[#allocation2 + $0xa9] sm:$0xff] %v439_v8  ;;  %v420_v54 = vadd.f32 %v2301_v3, %v381_v46  ;;  %v424_v59 = vadd.f32 %v2301_v3, %v385_v52  ;;  %v453_v63 = vmax.f32 %v421_v55, 0.0  ;;  %v426_v7 = vadd.f32 %v2301_v3, %v387_v60 }
  0x2e   : > { %473 = vst [vmem:[#allocation2 + $0xb1] sm:$0xff] %v440_v9  ;;  %474 = vst [vmem:[#allocation2 + $0xc1] sm:$0xff] %v441_v12  ;;  %v454_v4 = vmax.f32 %v422_v57, 0.0  ;;  %v455_v5 = vmax.f32 %v423_v58, 0.0  ;;  %v457_v8 = vmax.f32 %v425_v1, 0.0 }
  0x2f   : > { %475 = vst [vmem:[#allocation2 + $0xc9] sm:$0xff] %v442_v17  ;;  %476 = vst [vmem:[#allocation2 + $0xd9] sm:$0xff] %v443_v32  ;;  %v452_v62 = vmax.f32 %v420_v54, 0.0  ;;  %v456_v6 = vmax.f32 %v424_v59, 0.0  ;;  %v458_v9 = vmax.f32 %v426_v7, 0.0 }
  0x30   : > { %477 = vst [vmem:[#allocation2 + $0xe1] sm:$0xff] %v444_v33  ;;  %478 = vst [vmem:[#allocation2 + $0xf1] sm:$0xff] %v445_v34 }
  0x31   : > { %479 = vst [vmem:[#allocation2 + $0xf9] sm:$0xff] %v446_v39  ;;  %480 = vst [vmem:[#allocation2 + $0x109] sm:$0xff] %v447_v40 }
  0x32   : > { %481 = vst [vmem:[#allocation2 + $0x111] sm:$0xff] %v448_v41  ;;  %482 = vst [vmem:[#allocation2 + $0x121] sm:$0xff] %v449_v44 }
  0x33   : > { %483 = vst [vmem:[#allocation2 + $0x129] sm:$0xff] %v450_v49  ;;  %484 = vst [vmem:[#allocation2 + $0x139] sm:$0xff] %v451_v61 }
  0x34   : > { %485 = vst [vmem:[#allocation2 + $0x141] sm:$0xff] %v452_v62  ;;  %486 = vst [vmem:[#allocation2 + $0x151] sm:$0xff] %v453_v63 }
  0x35   : > { %487 = vst [vmem:[#allocation2 + $0x159] sm:$0xff] %v454_v4  ;;  %488 = vst [vmem:[#allocation2 + $0x169] sm:$0xff] %v455_v5 }
  0x36   : > { %489 = vst [vmem:[#allocation2 + $0x171] sm:$0xff] %v456_v6  ;;  %490 = vst [vmem:[#allocation2 + $0x181] sm:$0xff] %v457_v8 }
  0x37   : > { %491 = vst [vmem:[#allocation2 + $0x189] sm:$0xff] %v458_v9 }
  0x38 LB: >> { %v1529_v2 = vld [vmem:[%s2881_s3 + $0xf8] sm:$0xff]  ;;  %v1528_v10 = vld [vmem:[%s2881_s3 + $0xf0] sm:$0xff]  ;;  %v1527_v12 = vld [vmem:[%s2881_s3 + $0xe8] sm:$0xff]  ;;  %s500_s7 = smul.u32 24, %s2168_s17  ;;  %s2168_s17 = sphi %s2406_s17, %s499_s17  }
  0x39   : >> { %v519_v3 = vld [vmem:[%s2881_s3 + $0x78] sm:$0xff]  ;;  %1822 = vmatprep.subr.mxu0 %v1529_v2  ;;  %v518_v11 = vld [vmem:[%s2881_s3 + $0x70] sm:$0xff]  ;;  %v517_v13 = vld [vmem:[%s2881_s3 + $0x68] sm:$0xff] }
  0x3a   : >> { %1857 = vmatprep.subr.mxu1 %v519_v3  ;;  %1823 = vmatpush3.msra.mxu0 %v1529_v2  ;;  %v1526_v14 = vld [vmem:[%s2881_s3 + $0xe0] sm:$0xff]  ;;  %v1525_v16 = vld [vmem:[%s2881_s3 + $0xd8] sm:$0xff]  ;;  %v1524_v18 = vld [vmem:[%s2881_s3 + $0xd0] sm:$0xff]  ;;  %s2508_s24 = scalar_lea.vmem [#allocation2], %s500_s7 }
  0x3b   : >> { %1858 = vmatpush3.msra.mxu1 %v519_v3  ;;  %1824 = vmatprep.subr.mxu0 %v1528_v10  ;;  %v516_v15 = vld [vmem:[%s2881_s3 + $0x60] sm:$0xff]  ;;  %v515_v17 = vld [vmem:[%s2881_s3 + $0x58] sm:$0xff]  ;;  %v514_v19 = vld [vmem:[%s2881_s3 + $0x50] sm:$0xff] }
  0x3c   : >> { %1859 = vmatprep.subr.mxu1 %v518_v11  ;;  %1825 = vmatpush3.msra.mxu0 %v1528_v10  ;;  %v1523_v20 = vld [vmem:[%s2881_s3 + $0xc8] sm:$0xff]  ;;  %v1522_v22 = vld [vmem:[%s2881_s3 + $0xc0] sm:$0xff]  ;;  %v1521_v24 = vld [vmem:[%s2881_s3 + $0xb8] sm:$0xff] }
  0x3d   : >> { %1860 = vmatpush3.msra.mxu1 %v518_v11  ;;  %1826 = vmatprep.subr.mxu0 %v1527_v12  ;;  %v513_v21 = vld [vmem:[%s2881_s3 + $0x48] sm:$0xff]  ;;  %v512_v23 = vld [vmem:[%s2881_s3 + $0x40] sm:$0xff]  ;;  %v511_v25 = vld [vmem:[%s2881_s3 + $0x38] sm:$0xff] }
  0x3e   : >> { %1861 = vmatprep.subr.mxu1 %v517_v13  ;;  %1827 = vmatpush3.msra.mxu0 %v1527_v12  ;;  %v1520_v26 = vld [vmem:[%s2881_s3 + $0xb0] sm:$0xff]  ;;  %v1519_v28 = vld [vmem:[%s2881_s3 + $0xa8] sm:$0xff]  ;;  %v1518_v30 = vld [vmem:[%s2881_s3 + $0xa0] sm:$0xff] }
  0x3f   : >> { %1862 = vmatpush3.msra.mxu1 %v517_v13  ;;  %1828 = vmatprep.subr.mxu0 %v1526_v14  ;;  %v510_v27 = vld [vmem:[%s2881_s3 + $0x30] sm:$0xff]  ;;  %v509_v29 = vld [vmem:[%s2881_s3 + $0x28] sm:$0xff]  ;;  %v508_v31 = vld [vmem:[%s2881_s3 + $0x20] sm:$0xff] }
  0x40   : >> { %1863 = vmatprep.subr.mxu1 %v516_v15  ;;  %1829 = vmatpush3.msra.mxu0 %v1526_v14  ;;  %v1517_v32 = vld [vmem:[%s2881_s3 + $0x98] sm:$0xff]  ;;  %v1516_v34 = vld [vmem:[%s2881_s3 + $0x90] sm:$0xff]  ;;  %v1515_v36 = vld [vmem:[%s2881_s3 + $0x88] sm:$0xff] }
  0x41   : >> { %1864 = vmatpush3.msra.mxu1 %v516_v15  ;;  %1830 = vmatprep.subr.mxu0 %v1525_v16  ;;  %v507_v33 = vld [vmem:[%s2881_s3 + $0x18] sm:$0xff]  ;;  %v506_v35 = vld [vmem:[%s2881_s3 + $0x10] sm:$0xff]  ;;  %v505_v37 = vld [vmem:[%s2881_s3 + $0x8] sm:$0xff] }
  0x42   : >> { %1865 = vmatprep.subr.mxu1 %v515_v17  ;;  %1831 = vmatpush3.msra.mxu0 %v1525_v16  ;;  %v1514_v38 = vld [vmem:[%s2881_s3 + $0x80] sm:$0xff]  ;;  %v521_v42 = vld [vmem:[%s2508_s24 + $0x9] sm:$0xff]  ;;  %v1545_v44 = vld [vmem:[%s2881_s3 + $0x178] sm:$0xff] }
  0x43   : >> { %1866 = vmatpush3.msra.mxu1 %v515_v17  ;;  %1832 = vmatprep.subr.mxu0 %v1524_v18  ;;  %v504_v39 = vld [vmem:[%s2881_s3] sm:$0xff]  ;;  %v503_v43 = vld [vmem:[%s2508_s24 + $0x8] sm:$0xff]  ;;  %v1563_v45 = vld [vmem:[%s2881_s3 + $0x1f8] sm:$0xff] }
  0x44   : >> { %1867 = vmatprep.subr.mxu1 %v514_v19  ;;  %1833 = vmatpush3.msra.mxu0 %v1524_v18  ;;  %v520_v40 = vld [vmem:[%s2508_s24 + $0x1] sm:$0xff]  ;;  %v1544_v46 = vld [vmem:[%s2881_s3 + $0x170] sm:$0xff]  ;;  %v1541_v52 = vld [vmem:[%s2881_s3 + $0x158] sm:$0xff] }
  0x45   : >> { %1868 = vmatpush3.msra.mxu1 %v514_v19  ;;  %1834 = vmatprep.subr.mxu0 %v1523_v20  ;;  %v502_v41 = vld [vmem:[%s2508_s24] sm:$0xff]  ;;  %v1562_v47 = vld [vmem:[%s2881_s3 + $0x1f0] sm:$0xff]  ;;  %v1543_v48 = vld [vmem:[%s2881_s3 + $0x168] sm:$0xff] }
  0x46   : >> { %1869 = vmatprep.subr.mxu1 %v513_v21  ;;  %1835 = vmatpush3.msra.mxu0 %v1523_v20  ;;  %v1561_v49 = vld [vmem:[%s2881_s3 + $0x1e8] sm:$0xff]  ;;  %v1542_v50 = vld [vmem:[%s2881_s3 + $0x160] sm:$0xff]  ;;  %v1559_v53 = vld [vmem:[%s2881_s3 + $0x1d8] sm:$0xff] }
  0x47   : >> { %1870 = vmatpush3.msra.mxu1 %v513_v21  ;;  %1836 = vmatprep.subr.mxu0 %v1522_v22  ;;  %v1560_v51 = vld [vmem:[%s2881_s3 + $0x1e0] sm:$0xff]  ;;  %v1540_v54 = vld [vmem:[%s2881_s3 + $0x150] sm:$0xff]  ;;  %v1539_v56 = vld [vmem:[%s2881_s3 + $0x148] sm:$0xff] }
  0x48   : >> { %1871 = vmatprep.subr.mxu1 %v512_v23  ;;  %1837 = vmatpush3.msra.mxu0 %v1522_v22  ;;  %v1558_v55 = vld [vmem:[%s2881_s3 + $0x1d0] sm:$0xff]  ;;  %v1557_v57 = vld [vmem:[%s2881_s3 + $0x1c8] sm:$0xff]  ;;  %v1538_v58 = vld [vmem:[%s2881_s3 + $0x140] sm:$0xff] }
  0x49   : >> { %1872 = vmatpush3.msra.mxu1 %v512_v23  ;;  %1838 = vmatprep.subr.mxu0 %v1521_v24  ;;  %v1556_v59 = vld [vmem:[%s2881_s3 + $0x1c0] sm:$0xff]  ;;  %v1537_v60 = vld [vmem:[%s2881_s3 + $0x138] sm:$0xff]  ;;  %v1536_v62 = vld [vmem:[%s2881_s3 + $0x130] sm:$0xff] }
  0x4a   : >> { %1873 = vmatprep.subr.mxu1 %v511_v25  ;;  %1839 = vmatpush3.msra.mxu0 %v1521_v24  ;;  %v1555_v61 = vld [vmem:[%s2881_s3 + $0x1b8] sm:$0xff]  ;;  %v1554_v63 = vld [vmem:[%s2881_s3 + $0x1b0] sm:$0xff]  ;;  %v1535_v1 = vld [vmem:[%s2881_s3 + $0x128] sm:$0xff] }
  0x4b   : >> { %1874 = vmatpush3.msra.mxu1 %v511_v25  ;;  %1840 = vmatprep.subr.mxu0 %v1520_v26  ;;  %v1553_v4 = vld [vmem:[%s2881_s3 + $0x1a8] sm:$0xff]  ;;  %v1534_v5 = vld [vmem:[%s2881_s3 + $0x120] sm:$0xff]  ;;  %v1533_v7 = vld [vmem:[%s2881_s3 + $0x118] sm:$0xff] }
  0x4c   : >> { %1875 = vmatprep.subr.mxu1 %v510_v27  ;;  %1841 = vmatpush3.msra.mxu0 %v1520_v26  ;;  %v1552_v6 = vld [vmem:[%s2881_s3 + $0x1a0] sm:$0xff]  ;;  %v1551_v8 = vld [vmem:[%s2881_s3 + $0x198] sm:$0xff]  ;;  %v1532_v9 = vld [vmem:[%s2881_s3 + $0x110] sm:$0xff] }
  0x4d   : >> { %1876 = vmatpush3.msra.mxu1 %v510_v27  ;;  %1842 = vmatprep.subr.mxu0 %v1519_v28  ;;  %v1550_v2 = vld [vmem:[%s2881_s3 + $0x190] sm:$0xff]  ;;  %v1531_v3 = vld [vmem:[%s2881_s3 + $0x108] sm:$0xff]  ;;  %v1530_v12 = vld [vmem:[%s2881_s3 + $0x100] sm:$0xff] }
  0x4e   : >> { %1877 = vmatprep.subr.mxu1 %v509_v29  ;;  %1843 = vmatpush3.msra.mxu0 %v1519_v28  ;;  %v1549_v10 = vld [vmem:[%s2881_s3 + $0x188] sm:$0xff]  ;;  %v1548_v13 = vld [vmem:[%s2881_s3 + $0x180] sm:$0xff]  ;;  %v1581_v15 = vld [vmem:[%s2881_s3 + $0x278] sm:$0xff] }
  0x4f   : >> { %1878 = vmatpush3.msra.mxu1 %v509_v29  ;;  %1844 = vmatprep.subr.mxu0 %v1518_v30  ;;  %v689_v11 = vld [vmem:[%s2508_s24 + $0x2] sm:$0xff]  ;;  %v690_v14 = vld [vmem:[%s2508_s24 + $0xa] sm:$0xff]  ;;  %v1546_v16 = vld [vmem:[%s2508_s24 + $0x18] sm:$0xff] }
  0x50   : >> { %1879 = vmatprep.subr.mxu1 %v508_v31  ;;  %1845 = vmatpush3.msra.mxu0 %v1518_v30  ;;  %v1547_v17 = vld [vmem:[%s2508_s24 + $0x20] sm:$0xff]  ;;  %v1580_v18 = vld [vmem:[%s2881_s3 + $0x270] sm:$0xff]  ;;  %v1599_v19 = vld [vmem:[%s2881_s3 + $0x2f8] sm:$0xff] }
  0x51   : >> { %1880 = vmatpush3.msra.mxu1 %v508_v31  ;;  %1846 = vmatprep.subr.mxu0 %v1517_v32  ;;  %v1579_v20 = vld [vmem:[%s2881_s3 + $0x268] sm:$0xff]  ;;  %v1598_v21 = vld [vmem:[%s2881_s3 + $0x2f0] sm:$0xff]  ;;  %v1578_v22 = vld [vmem:[%s2881_s3 + $0x260] sm:$0xff] }
  0x52   : >> { %1881 = vmatprep.subr.mxu1 %v507_v33  ;;  %1847 = vmatpush3.msra.mxu0 %v1517_v32  ;;  %v1597_v23 = vld [vmem:[%s2881_s3 + $0x2e8] sm:$0xff]  ;;  %v1577_v24 = vld [vmem:[%s2881_s3 + $0x258] sm:$0xff]  ;;  %v1596_v25 = vld [vmem:[%s2881_s3 + $0x2e0] sm:$0xff] }
  0x53   : >> { %1882 = vmatpush3.msra.mxu1 %v507_v33  ;;  %1848 = vmatprep.subr.mxu0 %v1516_v34  ;;  %v1576_v26 = vld [vmem:[%s2881_s3 + $0x250] sm:$0xff]  ;;  %v1595_v27 = vld [vmem:[%s2881_s3 + $0x2d8] sm:$0xff]  ;;  %v1575_v28 = vld [vmem:[%s2881_s3 + $0x248] sm:$0xff] }
  0x54   : >> { %1883 = vmatprep.subr.mxu1 %v506_v35  ;;  %1849 = vmatpush3.msra.mxu0 %v1516_v34  ;;  %v1594_v29 = vld [vmem:[%s2881_s3 + $0x2d0] sm:$0xff]  ;;  %v1574_v30 = vld [vmem:[%s2881_s3 + $0x240] sm:$0xff]  ;;  %v1593_v31 = vld [vmem:[%s2881_s3 + $0x2c8] sm:$0xff] }
  0x55   : >> { %1884 = vmatpush3.msra.mxu1 %v506_v35  ;;  %1850 = vmatprep.subr.mxu0 %v1515_v36  ;;  %v1573_v32 = vld [vmem:[%s2881_s3 + $0x238] sm:$0xff]  ;;  %v1592_v33 = vld [vmem:[%s2881_s3 + $0x2c0] sm:$0xff]  ;;  %v1572_v34 = vld [vmem:[%s2881_s3 + $0x230] sm:$0xff] }
  0x56   : >> { %1885 = vmatprep.subr.mxu1 %v505_v37  ;;  %1851 = vmatpush3.msra.mxu0 %v1515_v36  ;;  %v1591_v35 = vld [vmem:[%s2881_s3 + $0x2b8] sm:$0xff]  ;;  %v1571_v36 = vld [vmem:[%s2881_s3 + $0x228] sm:$0xff] }
  0x57   : >> { %1886 = vmatpush3.msra.mxu1 %v505_v37  ;;  %1852 = vmatprep.subr.mxu0 %v1514_v38  ;;  %v1590_v37 = vld [vmem:[%s2881_s3 + $0x2b0] sm:$0xff] }
  0x58   : >> { %1887 = vmatprep.subr.mxu1 %v504_v39  ;;  %1853 = vmatpush3.msra.mxu0 %v1514_v38  ;;  %v1570_v38 = vld [vmem:[%s2881_s3 + $0x220] sm:$0xff] }
  0x59   : >> { %1854 = vmatprep.mubr.f32.mxu0 %v520_v40  ;;  %1888 = vmatpush3.msra.mxu1 %v504_v39  ;;  %v1589_v39 = vld [vmem:[%s2881_s3 + $0x2a8] sm:$0xff]  ;;  %v1569_v40 = vld [vmem:[%s2881_s3 + $0x218] sm:$0xff] }
  0x5a   : >> { %1889 = vmatprep.mubr.f32.mxu1 %v502_v41  ;;  %1855 = vmatmul.mubr.f32.vlgmr.msra.gmra.mxu0 %v521_v42  ;;  %v1588_v41 = vld [vmem:[%s2881_s3 + $0x2a0] sm:$0xff]  ;;  %v1568_v42 = vld [vmem:[%s2881_s3 + $0x210] sm:$0xff] }
  0x5b   : >> { %1890 = vmatmul.mubr.f32.vlgmr.msra.gmra.mxu1 %v503_v43  ;;  %1892 = vmatprep.subr.mxu0 %v1545_v44  ;;  %v1587_v43 = vld [vmem:[%s2881_s3 + $0x298] sm:$0xff] }
  0x5c   : >> { %1927 = vmatprep.subr.mxu1 %v1563_v45  ;;  %1893 = vmatpush3.msra.mxu0 %v1545_v44  ;;  %v1567_v44 = vld [vmem:[%s2881_s3 + $0x208] sm:$0xff] }
  0x5d   : >> { %1928 = vmatpush3.msra.mxu1 %v1563_v45  ;;  %1894 = vmatprep.subr.mxu0 %v1544_v46  ;;  %v1586_v45 = vld [vmem:[%s2881_s3 + $0x290] sm:$0xff] }
  0x5e   : >> { %1929 = vmatprep.subr.mxu1 %v1562_v47  ;;  %1895 = vmatpush3.msra.mxu0 %v1544_v46  ;;  %v1566_v46 = vld [vmem:[%s2881_s3 + $0x200] sm:$0xff] }
  0x5f   : >> { %1930 = vmatpush3.msra.mxu1 %v1562_v47  ;;  %1896 = vmatprep.subr.mxu0 %v1543_v48  ;;  %v1585_v47 = vld [vmem:[%s2881_s3 + $0x288] sm:$0xff] }
  0x60   : >> { %1931 = vmatprep.subr.mxu1 %v1561_v49  ;;  %1897 = vmatpush3.msra.mxu0 %v1543_v48  ;;  %v1564_v48 = vld [vmem:[%s2508_s24 + $0x19] sm:$0xff] }
  0x61   : >> { %1932 = vmatpush3.msra.mxu1 %v1561_v49  ;;  %1898 = vmatprep.subr.mxu0 %v1542_v50  ;;  %v1565_v49 = vld [vmem:[%s2508_s24 + $0x21] sm:$0xff] }
  0x62   : >> { %1933 = vmatprep.subr.mxu1 %v1560_v51  ;;  %1899 = vmatpush3.msra.mxu0 %v1542_v50  ;;  %v1584_v50 = vld [vmem:[%s2881_s3 + $0x280] sm:$0xff] }
  0x63   : >> { %1934 = vmatpush3.msra.mxu1 %v1560_v51  ;;  %1900 = vmatprep.subr.mxu0 %v1541_v52  ;;  %v1617_v51 = vld [vmem:[%s2881_s3 + $0x378] sm:$0xff] }
  0x64   : >> { %1935 = vmatprep.subr.mxu1 %v1559_v53  ;;  %1901 = vmatpush3.msra.mxu0 %v1541_v52  ;;  %v1582_v52 = vld [vmem:[%s2508_s24 + $0x1a] sm:$0xff] }
  0x65   : >> { %1936 = vmatpush3.msra.mxu1 %v1559_v53  ;;  %1902 = vmatprep.subr.mxu0 %v1540_v54  ;;  %v1583_v53 = vld [vmem:[%s2508_s24 + $0x22] sm:$0xff] }
  0x66   : >> { %1937 = vmatprep.subr.mxu1 %v1558_v55  ;;  %1903 = vmatpush3.msra.mxu0 %v1540_v54  ;;  %v1616_v54 = vld [vmem:[%s2881_s3 + $0x370] sm:$0xff] }
  0x67   : >> { %1938 = vmatpush3.msra.mxu1 %v1558_v55  ;;  %1904 = vmatprep.subr.mxu0 %v1539_v56  ;;  %v1635_v55 = vld [vmem:[%s2881_s3 + $0x3f8] sm:$0xff] }
  0x68   : >> { %1939 = vmatprep.subr.mxu1 %v1557_v57  ;;  %1905 = vmatpush3.msra.mxu0 %v1539_v56  ;;  %v1615_v56 = vld [vmem:[%s2881_s3 + $0x368] sm:$0xff] }
  0x69   : >> { %1940 = vmatpush3.msra.mxu1 %v1557_v57  ;;  %1906 = vmatprep.subr.mxu0 %v1538_v58  ;;  %v1634_v57 = vld [vmem:[%s2881_s3 + $0x3f0] sm:$0xff] }
  0x6a   : >> { %1941 = vmatprep.subr.mxu1 %v1556_v59  ;;  %1907 = vmatpush3.msra.mxu0 %v1538_v58  ;;  %v1614_v58 = vld [vmem:[%s2881_s3 + $0x360] sm:$0xff] }
  0x6b   : >> { %1942 = vmatpush3.msra.mxu1 %v1556_v59  ;;  %1908 = vmatprep.subr.mxu0 %v1537_v60  ;;  %v1633_v59 = vld [vmem:[%s2881_s3 + $0x3e8] sm:$0xff] }
  0x6c   : >> { %1943 = vmatprep.subr.mxu1 %v1555_v61  ;;  %1909 = vmatpush3.msra.mxu0 %v1537_v60  ;;  %v1613_v60 = vld [vmem:[%s2881_s3 + $0x358] sm:$0xff] }
  0x6d   : >> { %1944 = vmatpush3.msra.mxu1 %v1555_v61  ;;  %1910 = vmatprep.subr.mxu0 %v1536_v62  ;;  %v1632_v61 = vld [vmem:[%s2881_s3 + $0x3e0] sm:$0xff] }
  0x6e   : >> { %1945 = vmatprep.subr.mxu1 %v1554_v63  ;;  %1911 = vmatpush3.msra.mxu0 %v1536_v62  ;;  %v1612_v62 = vld [vmem:[%s2881_s3 + $0x350] sm:$0xff] }
  0x6f   : >> { %1946 = vmatpush3.msra.mxu1 %v1554_v63  ;;  %1912 = vmatprep.subr.mxu0 %v1535_v1  ;;  %v1631_v63 = vld [vmem:[%s2881_s3 + $0x3d8] sm:$0xff] }
  0x70   : >> { %1947 = vmatprep.subr.mxu1 %v1553_v4  ;;  %1913 = vmatpush3.msra.mxu0 %v1535_v1  ;;  %v1611_v1 = vld [vmem:[%s2881_s3 + $0x348] sm:$0xff] }
  0x71   : >> { %1948 = vmatpush3.msra.mxu1 %v1553_v4  ;;  %1914 = vmatprep.subr.mxu0 %v1534_v5  ;;  %v1630_v4 = vld [vmem:[%s2881_s3 + $0x3d0] sm:$0xff] }
  0x72   : >> { %1949 = vmatprep.subr.mxu1 %v1552_v6  ;;  %1915 = vmatpush3.msra.mxu0 %v1534_v5  ;;  %v1610_v5 = vld [vmem:[%s2881_s3 + $0x340] sm:$0xff] }
  0x73   : >> { %1950 = vmatpush3.msra.mxu1 %v1552_v6  ;;  %1916 = vmatprep.subr.mxu0 %v1533_v7  ;;  %v1629_v6 = vld [vmem:[%s2881_s3 + $0x3c8] sm:$0xff] }
  0x74   : >> { %1951 = vmatprep.subr.mxu1 %v1551_v8  ;;  %1917 = vmatpush3.msra.mxu0 %v1533_v7  ;;  %v1609_v7 = vld [vmem:[%s2881_s3 + $0x338] sm:$0xff] }
  0x75   : >> { %1952 = vmatpush3.msra.mxu1 %v1551_v8  ;;  %1918 = vmatprep.subr.mxu0 %v1532_v9  ;;  %v1628_v8 = vld [vmem:[%s2881_s3 + $0x3c0] sm:$0xff] }
  0x76   : >> { %1953 = vmatprep.subr.mxu1 %v1550_v2  ;;  %1919 = vmatpush3.msra.mxu0 %v1532_v9  ;;  %v1608_v9 = vld [vmem:[%s2881_s3 + $0x330] sm:$0xff] }
  0x77   : >> { %1954 = vmatpush3.msra.mxu1 %v1550_v2  ;;  %1920 = vmatprep.subr.mxu0 %v1531_v3  ;;  %v1627_v2 = vld [vmem:[%s2881_s3 + $0x3b8] sm:$0xff] }
  0x78   : >> { %1955 = vmatprep.subr.mxu1 %v1549_v10  ;;  %1921 = vmatpush3.msra.mxu0 %v1531_v3  ;;  %v1607_v3 = vld [vmem:[%s2881_s3 + $0x328] sm:$0xff] }
  0x79   : >> { %1924 = vmatprep.mubr.f32.mxu0 %v689_v11  ;;  %1922 = vmatprep.subr.mxu0 %v1530_v12  ;;  %v1606_v11 = vld [vmem:[%s2881_s3 + $0x320] sm:$0xff] }
  0x7a   : >> { %1956 = vmatpush3.msra.mxu1 %v1549_v10  ;;  %1923 = vmatpush3.msra.mxu0 %v1530_v12  ;;  %v1626_v10 = vld [vmem:[%s2881_s3 + $0x3b0] sm:$0xff]  ;;  %v1625_v12 = vld [vmem:[%s2881_s3 + $0x3a8] sm:$0xff] }
  0x7b   : >> { %1957 = vmatprep.subr.mxu1 %v1548_v13  ;;  %1925 = vmatmul.mubr.f32.vlgmr.msra.gmra.mxu0 %v690_v14  ;;  %v1624_v14 = vld [vmem:[%s2881_s3 + $0x3a0] sm:$0xff] }
  0x7c   : >> { %1962 = vmatprep.subr.mxu0 %v1581_v15  ;;  %1958 = vmatpush3.msra.mxu1 %v1548_v13  ;;  %v1605_v13 = vld [vmem:[%s2881_s3 + $0x318] sm:$0xff] }
  0x7d   : >> { %1959 = vmatprep.mubr.f32.mxu1 %v1546_v16  ;;  %1963 = vmatpush3.msra.mxu0 %v1581_v15  ;;  %v1604_v15 = vld [vmem:[%s2881_s3 + $0x310] sm:$0xff]  ;;  %v1623_v16 = vld [vmem:[%s2881_s3 + $0x398] sm:$0xff] }
  0x7e   : >> { %1960 = vmatmul.mubr.f32.vlgmr.msra.gmra.mxu1 %v1547_v17  ;;  %1964 = vmatprep.subr.mxu0 %v1580_v18  ;;  %v1603_v17 = vld [vmem:[%s2881_s3 + $0x308] sm:$0xff] }
  0x7f   : >> { %1997 = vmatprep.subr.mxu1 %v1599_v19  ;;  %1965 = vmatpush3.msra.mxu0 %v1580_v18  ;;  %v1622_v18 = vld [vmem:[%s2881_s3 + $0x390] sm:$0xff] }
  0x80   : >> { %1998 = vmatpush3.msra.mxu1 %v1599_v19  ;;  %1966 = vmatprep.subr.mxu0 %v1579_v20  ;;  %v1602_v19 = vld [vmem:[%s2881_s3 + $0x300] sm:$0xff] }
  0x81   : >> { %1999 = vmatprep.subr.mxu1 %v1598_v21  ;;  %1967 = vmatpush3.msra.mxu0 %v1579_v20  ;;  %v1621_v20 = vld [vmem:[%s2881_s3 + $0x388] sm:$0xff] }
  0x82   : >> { %2000 = vmatpush3.msra.mxu1 %v1598_v21  ;;  %1968 = vmatprep.subr.mxu0 %v1578_v22  ;;  %v1600_v21 = vld [vmem:[%s2508_s24 + $0x30] sm:$0xff] }
  0x83   : >> { %2001 = vmatprep.subr.mxu1 %v1597_v23  ;;  %1969 = vmatpush3.msra.mxu0 %v1578_v22  ;;  %v1601_v22 = vld [vmem:[%s2508_s24 + $0x38] sm:$0xff] }
  0x84   : >> { %2002 = vmatpush3.msra.mxu1 %v1597_v23  ;;  %1970 = vmatprep.subr.mxu0 %v1577_v24  ;;  %v1620_v23 = vld [vmem:[%s2881_s3 + $0x380] sm:$0xff] }
  0x85   : >> { %2003 = vmatprep.subr.mxu1 %v1596_v25  ;;  %1971 = vmatpush3.msra.mxu0 %v1577_v24  ;;  %v1653_v24 = vld [vmem:[%s2881_s3 + $0x478] sm:$0xff] }
  0x86   : >> { %2004 = vmatpush3.msra.mxu1 %v1596_v25  ;;  %1972 = vmatprep.subr.mxu0 %v1576_v26  ;;  %v1618_v25 = vld [vmem:[%s2508_s24 + $0x31] sm:$0xff] }
  0x87   : >> { %2005 = vmatprep.subr.mxu1 %v1595_v27  ;;  %1973 = vmatpush3.msra.mxu0 %v1576_v26  ;;  %v1619_v26 = vld [vmem:[%s2508_s24 + $0x39] sm:$0xff] }
  0x88   : >> { %2006 = vmatpush3.msra.mxu1 %v1595_v27  ;;  %1974 = vmatprep.subr.mxu0 %v1575_v28  ;;  %v1652_v27 = vld [vmem:[%s2881_s3 + $0x470] sm:$0xff] }
  0x89   : >> { %2007 = vmatprep.subr.mxu1 %v1594_v29  ;;  %1975 = vmatpush3.msra.mxu0 %v1575_v28  ;;  %v1636_v28 = vld [vmem:[%s2508_s24 + $0x32] sm:$0xff] }
  0x8a   : >> { %2008 = vmatpush3.msra.mxu1 %v1594_v29  ;;  %1976 = vmatprep.subr.mxu0 %v1574_v30  ;;  %v1651_v29 = vld [vmem:[%s2881_s3 + $0x468] sm:$0xff] }
  0x8b   : >> { %2009 = vmatprep.subr.mxu1 %v1593_v31  ;;  %1977 = vmatpush3.msra.mxu0 %v1574_v30  ;;  %v1650_v30 = vld [vmem:[%s2881_s3 + $0x460] sm:$0xff] }
  0x8c   : >> { %2010 = vmatpush3.msra.mxu1 %v1593_v31  ;;  %1978 = vmatprep.subr.mxu0 %v1573_v32  ;;  %v1649_v31 = vld [vmem:[%s2881_s3 + $0x458] sm:$0xff] }
  0x8d   : >> { %2011 = vmatprep.subr.mxu1 %v1592_v33  ;;  %1979 = vmatpush3.msra.mxu0 %v1573_v32  ;;  %v1648_v32 = vld [vmem:[%s2881_s3 + $0x450] sm:$0xff] }
  0x8e   : >> { %2012 = vmatpush3.msra.mxu1 %v1592_v33  ;;  %1980 = vmatprep.subr.mxu0 %v1572_v34  ;;  %v1647_v33 = vld [vmem:[%s2881_s3 + $0x448] sm:$0xff] }
  0x8f   : >> { %2013 = vmatprep.subr.mxu1 %v1591_v35  ;;  %1981 = vmatpush3.msra.mxu0 %v1572_v34  ;;  %v1646_v34 = vld [vmem:[%s2881_s3 + $0x440] sm:$0xff] }
  0x90   : >> { %2014 = vmatpush3.msra.mxu1 %v1591_v35  ;;  %1982 = vmatprep.subr.mxu0 %v1571_v36  ;;  %v1645_v35 = vld [vmem:[%s2881_s3 + $0x438] sm:$0xff] }
  0x91   : >> { %2015 = vmatprep.subr.mxu1 %v1590_v37  ;;  %1983 = vmatpush3.msra.mxu0 %v1571_v36  ;;  %v1644_v36 = vld [vmem:[%s2881_s3 + $0x430] sm:$0xff] }
  0x92   : >> { %2016 = vmatpush3.msra.mxu1 %v1590_v37  ;;  %1984 = vmatprep.subr.mxu0 %v1570_v38  ;;  %v1643_v37 = vld [vmem:[%s2881_s3 + $0x428] sm:$0xff] }
  0x93   : >> { %2017 = vmatprep.subr.mxu1 %v1589_v39  ;;  %1985 = vmatpush3.msra.mxu0 %v1570_v38  ;;  %v1642_v38 = vld [vmem:[%s2881_s3 + $0x420] sm:$0xff] }
  0x94   : >> { %2018 = vmatpush3.msra.mxu1 %v1589_v39  ;;  %1986 = vmatprep.subr.mxu0 %v1569_v40  ;;  %v1641_v39 = vld [vmem:[%s2881_s3 + $0x418] sm:$0xff] }
  0x95   : >> { %2019 = vmatprep.subr.mxu1 %v1588_v41  ;;  %1987 = vmatpush3.msra.mxu0 %v1569_v40  ;;  %v1640_v40 = vld [vmem:[%s2881_s3 + $0x410] sm:$0xff] }
  0x96   : >> { %2020 = vmatpush3.msra.mxu1 %v1588_v41  ;;  %1988 = vmatprep.subr.mxu0 %v1568_v42  ;;  %v1639_v41 = vld [vmem:[%s2881_s3 + $0x408] sm:$0xff] }
  0x97   : >> { %2021 = vmatprep.subr.mxu1 %v1587_v43  ;;  %1989 = vmatpush3.msra.mxu0 %v1568_v42  ;;  %v1638_v42 = vld [vmem:[%s2881_s3 + $0x400] sm:$0xff] }
  0x98   : >> { %2022 = vmatpush3.msra.mxu1 %v1587_v43  ;;  %1990 = vmatprep.subr.mxu0 %v1567_v44  ;;  %v1637_v43 = vld [vmem:[%s2508_s24 + $0x3a] sm:$0xff]  ;;  %s1655_s24 = sshll.u32 %s2168_s17, 4  ;;  %s499_s17 = sadd.s32 1, %s2168_s17  }
  0x99   : >> { %2023 = vmatprep.subr.mxu1 %v1586_v45  ;;  %1991 = vmatpush3.msra.mxu0 %v1567_v44  ;;  %s1376_s19 = scalar_lea.vmem %s2296_s11, %s1655_s24  ;;  %p496_p4 = scmp.ge.s32.totalorder %s499_s17, 16  }
  0x9a   : >> { %2024 = vmatpush3.msra.mxu1 %v1586_v45  ;;  %1992 = vmatprep.subr.mxu0 %v1566_v46 }
  0x9b   : >> { %2025 = vmatprep.subr.mxu1 %v1585_v47  ;;  %1993 = vmatpush3.msra.mxu0 %v1566_v46 }
  0x9c   : >> { %1994 = vmatprep.mubr.f32.mxu0 %v1564_v48  ;;  %2026 = vmatpush3.msra.mxu1 %v1585_v47 }
  0x9d   : >> { %1995 = vmatmul.mubr.f32.vlgmr.msra.gmra.mxu0 %v1565_v49  ;;  %2027 = vmatprep.subr.mxu1 %v1584_v50 }
  0x9e   : >> { %2032 = vmatprep.subr.mxu0 %v1617_v51  ;;  %2028 = vmatpush3.msra.mxu1 %v1584_v50 }
  0x9f   : >> { %2029 = vmatprep.mubr.f32.mxu1 %v1582_v52  ;;  %2033 = vmatpush3.msra.mxu0 %v1617_v51 }
  0xa0   : >> { %2030 = vmatmul.mubr.f32.vlgmr.msra.gmra.mxu1 %v1583_v53  ;;  %2034 = vmatprep.subr.mxu0 %v1616_v54 }
  0xa1   : >> { %2067 = vmatprep.subr.mxu1 %v1635_v55  ;;  %2035 = vmatpush3.msra.mxu0 %v1616_v54 }
  0xa2   : >> { %2068 = vmatpush3.msra.mxu1 %v1635_v55  ;;  %2036 = vmatprep.subr.mxu0 %v1615_v56 }
  0xa3   : >> { %2069 = vmatprep.subr.mxu1 %v1634_v57  ;;  %2037 = vmatpush3.msra.mxu0 %v1615_v56 }
  0xa4   : >> { %2070 = vmatpush3.msra.mxu1 %v1634_v57  ;;  %2038 = vmatprep.subr.mxu0 %v1614_v58 }
  0xa5   : >> { %2071 = vmatprep.subr.mxu1 %v1633_v59  ;;  %2039 = vmatpush3.msra.mxu0 %v1614_v58 }
  0xa6   : >> { %2072 = vmatpush3.msra.mxu1 %v1633_v59  ;;  %2040 = vmatprep.subr.mxu0 %v1613_v60 }
  0xa7   : >> { %2073 = vmatprep.subr.mxu1 %v1632_v61  ;;  %2041 = vmatpush3.msra.mxu0 %v1613_v60 }
  0xa8   : >> { %2074 = vmatpush3.msra.mxu1 %v1632_v61  ;;  %2042 = vmatprep.subr.mxu0 %v1612_v62 }
  0xa9   : >> { %2075 = vmatprep.subr.mxu1 %v1631_v63  ;;  %2043 = vmatpush3.msra.mxu0 %v1612_v62 }
  0xaa   : >> { %2076 = vmatpush3.msra.mxu1 %v1631_v63  ;;  %2044 = vmatprep.subr.mxu0 %v1611_v1 }
  0xab   : >> { %2077 = vmatprep.subr.mxu1 %v1630_v4  ;;  %2045 = vmatpush3.msra.mxu0 %v1611_v1 }
  0xac   : >> { %2078 = vmatpush3.msra.mxu1 %v1630_v4  ;;  %2046 = vmatprep.subr.mxu0 %v1610_v5 }
  0xad   : >> { %2079 = vmatprep.subr.mxu1 %v1629_v6  ;;  %2047 = vmatpush3.msra.mxu0 %v1610_v5 }
  0xae   : >> { %2080 = vmatpush3.msra.mxu1 %v1629_v6  ;;  %2048 = vmatprep.subr.mxu0 %v1609_v7 }
  0xaf   : >> { %2081 = vmatprep.subr.mxu1 %v1628_v8  ;;  %2049 = vmatpush3.msra.mxu0 %v1609_v7 }
  0xb0   : >> { %2082 = vmatpush3.msra.mxu1 %v1628_v8  ;;  %2050 = vmatprep.subr.mxu0 %v1608_v9 }
  0xb1   : >> { %2083 = vmatprep.subr.mxu1 %v1627_v2  ;;  %2051 = vmatpush3.msra.mxu0 %v1608_v9 }
  0xb2   : >> { %2084 = vmatpush3.msra.mxu1 %v1627_v2  ;;  %2052 = vmatprep.subr.mxu0 %v1607_v3 }
  0xb3   : >> { %2085 = vmatprep.subr.mxu1 %v1626_v10  ;;  %2053 = vmatpush3.msra.mxu0 %v1607_v3 }
  0xb4   : >> { %2086 = vmatpush3.msra.mxu1 %v1626_v10  ;;  %2054 = vmatprep.subr.mxu0 %v1606_v11 }
  0xb5   : >> { %2087 = vmatprep.subr.mxu1 %v1625_v12  ;;  %2055 = vmatpush3.msra.mxu0 %v1606_v11 }
  0xb6   : >> { %2088 = vmatpush3.msra.mxu1 %v1625_v12  ;;  %2056 = vmatprep.subr.mxu0 %v1605_v13 }
  0xb7   : >> { %2089 = vmatprep.subr.mxu1 %v1624_v14  ;;  %2057 = vmatpush3.msra.mxu0 %v1605_v13 }
  0xb8   : >> { %2090 = vmatpush3.msra.mxu1 %v1624_v14  ;;  %2058 = vmatprep.subr.mxu0 %v1604_v15 }
  0xb9   : >> { %2091 = vmatprep.subr.mxu1 %v1623_v16  ;;  %2059 = vmatpush3.msra.mxu0 %v1604_v15 }
  0xba   : >> { %2092 = vmatpush3.msra.mxu1 %v1623_v16  ;;  %2060 = vmatprep.subr.mxu0 %v1603_v17 }
  0xbb   : >> { %2093 = vmatprep.subr.mxu1 %v1622_v18  ;;  %2061 = vmatpush3.msra.mxu0 %v1603_v17 }
  0xbc   : >> { %2094 = vmatpush3.msra.mxu1 %v1622_v18  ;;  %2062 = vmatprep.subr.mxu0 %v1602_v19 }
  0xbd   : >> { %2095 = vmatprep.subr.mxu1 %v1621_v20  ;;  %2063 = vmatpush3.msra.mxu0 %v1602_v19 }
  0xbe   : >> { %2064 = vmatprep.mubr.f32.mxu0 %v1600_v21  ;;  %2096 = vmatpush3.msra.mxu1 %v1621_v20 }
  0xbf   : >> { %2065 = vmatmul.mubr.f32.vlgmr.msra.gmra.mxu0 %v1601_v22  ;;  %2097 = vmatprep.subr.mxu1 %v1620_v23 }
  0xc0   : >> { %2102 = vmatprep.subr.mxu0 %v1653_v24  ;;  %2098 = vmatpush3.msra.mxu1 %v1620_v23 }
  0xc1   : >> { %2099 = vmatprep.mubr.f32.mxu1 %v1618_v25  ;;  %2103 = vmatpush3.msra.mxu0 %v1653_v24 }
  0xc2   : >> { %2100 = vmatmul.mubr.f32.vlgmr.msra.gmra.mxu1 %v1619_v26  ;;  %2104 = vmatprep.subr.mxu0 %v1652_v27 }
  0xc3   : >> { %2134 = vmatprep.mubr.f32.mxu0 %v1636_v28  ;;  %2105 = vmatpush3.msra.mxu0 %v1652_v27 }
  0xc4   : >> { %2106 = vmatprep.subr.mxu0 %v1651_v29 }
  0xc5   : >> { %2107 = vmatpush3.msra.mxu0 %v1651_v29 }
  0xc6   : >> { %2108 = vmatprep.subr.mxu0 %v1650_v30 }
  0xc7   : >> { %2109 = vmatpush3.msra.mxu0 %v1650_v30  ;;  %v1379_v30 = vld [vmem:[%s2309_s16] sm:$0x1] }
  0xc8   : >> { %2110 = vmatprep.subr.mxu0 %v1649_v31 }
  0xc9   : >> { %2111 = vmatpush3.msra.mxu0 %v1649_v31 }
  0xca   : >> { %2112 = vmatprep.subr.mxu0 %v1648_v32 }
  0xcb   : >> { %2113 = vmatpush3.msra.mxu0 %v1648_v32 }
  0xcc   : >> { %2114 = vmatprep.subr.mxu0 %v1647_v33 }
  0xcd   : >> { %2115 = vmatpush3.msra.mxu0 %v1647_v33  ;;  %v1389_v33 = vld [vmem:[%s2309_s16 + $0x1] sm:$0x1] }
  0xce   : >> { %2116 = vmatprep.subr.mxu0 %v1646_v34 }
  0xcf   : >> { %2117 = vmatpush3.msra.mxu0 %v1646_v34 }
  0xd0   : >> { %2118 = vmatprep.subr.mxu0 %v1645_v35 }
  0xd1   : >> { %2119 = vmatpush3.msra.mxu0 %v1645_v35 }
  0xd2   : >> { %2120 = vmatprep.subr.mxu0 %v1644_v36 }
  0xd3   : >> { %2121 = vmatpush3.msra.mxu0 %v1644_v36 }
  0xd4   : >> { %2122 = vmatprep.subr.mxu0 %v1643_v37 }
  0xd5   : >> { %2123 = vmatpush3.msra.mxu0 %v1643_v37 }
  0xd6   : >> { %2124 = vmatprep.subr.mxu0 %v1642_v38 }
  0xd7   : >> { %2125 = vmatpush3.msra.mxu0 %v1642_v38 }
  0xd8   : >> { %2126 = vmatprep.subr.mxu0 %v1641_v39 }
  0xd9   : >> { %2127 = vmatpush3.msra.mxu0 %v1641_v39 }
  0xda   : >> { %2128 = vmatprep.subr.mxu0 %v1640_v40 }
  0xdb   : >> { %2129 = vmatpush3.msra.mxu0 %v1640_v40 }
  0xdc   : >> { %2130 = vmatprep.subr.mxu0 %v1639_v41 }
  0xdd   : >> { %2131 = vmatpush3.msra.mxu0 %v1639_v41 }
  0xde   : >> { %2132 = vmatprep.subr.mxu0 %v1638_v42 }
  0xdf   : >> { %2133 = vmatpush3.msra.mxu0 %v1638_v42 }
  0xe0   : >> { %2135 = vmatmul.mubr.f32.vlgmr.msra.gmra.mxu0 %v1637_v43 }
 0x11a   : >> { %v1856_v44 = vpop.f32.mrf.mxu0 }
 0x11b   : >> { %v1891_v45 = vpop.f32.mrf.mxu1 }
 0x11c   : >> { %v605_v46 = vpop.f32.mrf.mxu0  ;;  %v686_v49 = vadd.f32 %v1891_v45, %v1856_v44 }
 0x11d   : >> { %v680_v48 = vpop.f32.mrf.mxu1 }
 0x11e   : >> { %v681_v52 = vadd.f32 %v680_v48, %v605_v46 }
 0x13b   : >> { %v1926_v47 = vpop.f32.mrf.mxu0 }
 0x13c   : >> { %v784_v53 = vadd.f32 %v1926_v47, %v686_v49 }
 0x13d   : >> { %v774_v50 = vpop.f32.mrf.mxu0 }
 0x13e   : >> { %v1961_v51 = vpop.f32.mrf.mxu1  ;;  %v783_v55 = vadd.f32 %v774_v50, %v681_v52 }
 0x13f   : >> { %v883_v57 = vadd.f32 %v1961_v51, %v784_v53 }
 0x140   : >> { %v873_v56 = vpop.f32.mrf.mxu1 }
 0x141   : >> { %v882_v60 = vadd.f32 %v873_v56, %v783_v55 }
 0x15d   : >> { %v1996_v54 = vpop.f32.mrf.mxu0 }
 0x15e   : >> { %v979_v61 = vadd.f32 %v1996_v54, %v883_v57 }
 0x15f   : >> { %v969_v58 = vpop.f32.mrf.mxu0 }
 0x160   : >> { %v2031_v59 = vpop.f32.mrf.mxu1  ;;  %v978_v63 = vadd.f32 %v969_v58, %v882_v60 }
 0x161   : >> { %v1075_v4 = vadd.f32 %v2031_v59, %v979_v61 }
 0x162   : >> { %v1065_v1 = vpop.f32.mrf.mxu1 }
 0x163   : >> { %v1074_v7 = vadd.f32 %v1065_v1, %v978_v63 }
 0x17f   : >> { %v2066_v62 = vpop.f32.mrf.mxu0 }
 0x180   : >> { %v1174_v8 = vadd.f32 %v2066_v62, %v1075_v4 }
 0x181   : >> { %v1164_v5 = vpop.f32.mrf.mxu0 }
 0x182   : >> { %v2101_v6 = vpop.f32.mrf.mxu1  ;;  %v1173_v9 = vadd.f32 %v1164_v5, %v1074_v7 }
 0x183   : >> { %v1270_v3 = vadd.f32 %v2101_v6, %v1174_v8 }
 0x184   : >> { %v1260_v2 = vpop.f32.mrf.mxu1 }
 0x185   : >> { %v1269_v11 = vadd.f32 %v1260_v2, %v1173_v9 }
 0x1a0   : >> { %v2136_v10 = vpop.f32.mrf.mxu0 }
 0x1a1   : >> { %v1366_v12 = vadd.f32 %v2136_v10, %v1270_v3 }
 0x1a2   : >> { %v1356_v13 = vpop.f32.mrf.mxu0 }
 0x1a3   : >> { %v1374_v14 = vadd.f32 %v2217_v0, %v1366_v12  ;;  %v1365_v15 = vadd.f32 %v1356_v13, %v1269_v11 }
 0x1a5   : >> { %1378 = vst [vmem:[%s1376_s19 + $0x8] sm:$0xff] %v1374_v14  ;;  %v1373_v16 = vadd.f32 %v2217_v0, %v1365_v15  ;;  %v1391_v17 = vmul.f32 %v1374_v14, %v1374_v14 }
 0x1a7   : >> { %1377 = vst [vmem:[%s1376_s19] sm:$0xff] %v1373_v16  ;;  %v1380_v18 = vadd.f32 %v1374_v14, %v1373_v16  ;;  %v1390_v19 = vmul.f32 %v1373_v16, %v1373_v16 }
 0x1a9   : >> { %v1381_v20 = vrot.slane %v1380_v18, 4  ;;  %v1392_v21 = vadd.f32 %v1391_v17, %v1390_v19 }
 0x1ab   : >> { %v1382_v22 = vadd.f32 %v1381_v20, %v1380_v18  ;;  %v1393_v23 = vrot.slane %v1392_v21, 4 }
 0x1ad   : >> { %v1383_v24 = vrot.slane %v1382_v22, 2  ;;  %v1394_v25 = vadd.f32 %v1393_v23, %v1392_v21 }
 0x1af   : >> { %v1384_v26 = vadd.f32 %v1383_v24, %v1382_v22  ;;  %v1395_v27 = vrot.slane %v1394_v25, 2 }
 0x1b1   : >> { %v1385_v28 = vrot.slane %v1384_v26, 1  ;;  %v1396_v29 = vadd.f32 %v1395_v27, %v1394_v25 }
 0x1b3   : >> { %v1386_v31 = vadd.f32 %v1385_v28, %v1384_v26  ;;  %v1397_v32 = vrot.slane %v1396_v29, 1 }
 0x1b5   : >> { %v1387_v34 = vadd.f32 %v1386_v31, %v1379_v30  ;;  %v1398_v35 = vadd.f32 %v1397_v32, %v1396_v29  ;;  %498 = sbr.rel (!%p496_p4) target bundleno = 56 (0x38), region = 102 }
 0x1b7   : >> { %1388 = vst [vmem:[%s2309_s16] sm:$0x1] %v1387_v34  ;;  %v1399_v36 = vadd.f32 %v1398_v35, %v1389_v33 }
 0x1b9   : >> { %1400 = vst [vmem:[%s2309_s16 + $0x1] sm:$0x1] %v1399_v36 }
 0x1ba PF: > { %s17_s21 = sadd.s32 1, %s2164_s21  }
 0x1bb   : > { %p14_p5 = scmp.ge.s32.totalorder %s17_s21, 4  }
 0x1bd   :  { %16 = sbr.rel (!%p14_p5) target bundleno = 1 (0x1), region = 113 }

</bundles_post_ra>
